<compile_context>
chip_gen: v7x
topology: tpu7x:2x2x1
jax: 0.10.0
libtpu: 0.0.40
codegen_flags: <defaults>
</compile_context>

<pallas_src>
import functools

import jax
import jax.numpy as jnp
from jax import lax
from jax.experimental import pallas as pl
from jax.experimental.pallas import tpu as pltpu

# Deterministic stand-in for the (undefined) global `pattern_dic`: sixteen 3x3 binary masks.
PATTERN_DIC = [
    [1, 1, 1, 1, 1, 1, 1, 1, 1],
    [0, 1, 0, 1, 1, 1, 0, 1, 0],
    [1, 0, 1, 0, 1, 0, 1, 0, 1],
    [1, 1, 0, 1, 1, 0, 1, 1, 0],
    [0, 1, 1, 0, 1, 1, 0, 1, 1],
    [1, 1, 1, 0, 1, 0, 1, 1, 1],
    [0, 0, 1, 1, 1, 1, 1, 0, 0],
    [1, 0, 0, 1, 1, 1, 0, 0, 1],
    [0, 1, 0, 0, 1, 0, 0, 1, 0],
    [1, 1, 1, 1, 1, 1, 0, 0, 0],
    [0, 0, 0, 1, 1, 1, 1, 1, 1],
    [1, 0, 1, 1, 1, 1, 1, 0, 1],
    [0, 1, 1, 1, 1, 0, 0, 1, 1],
    [1, 1, 0, 0, 1, 1, 1, 1, 0],
    [0, 1, 0, 1, 1, 1, 1, 0, 1],
    [1, 0, 1, 1, 1, 0, 0, 1, 1],
]


# ----------------------------- quantization glue (plain JAX) -----------------------------

def weight_quantize(w, w_bit):
    """DoReFa weight quantization."""
    if w_bit >= 32:
        return w
    n = float(2 ** w_bit - 1)
    wt = jnp.tanh(w)
    wt = wt / (2.0 * jnp.max(jnp.abs(wt))) + 0.5
    wq = jnp.round(wt * n) / n
    return 2.0 * wq - 1.0


def _quant_act(y, a_bit):
    """DoReFa activation: clamp to [0,1] + uniform quantization (relu for full precision)."""
    if a_bit < 32:
        n = float(2 ** a_bit - 1)
        y = jnp.clip(y, 0.0, 1.0)
        return jnp.round(y * n) / n
    return jnp.maximum(y, 0.0)


def im2col_3x3(x, stride=1):
    """x: (N, H, W, C), kernel 3x3, padding 1 -> (N*Ho*Wo, 9*C). Fallback path only."""
    N, H, W, C = x.shape
    xp = jnp.pad(x, ((0, 0), (1, 1), (1, 1), (0, 0)))
    Ho = (H + 2 - 3) // stride + 1
    Wo = (W + 2 - 3) // stride + 1
    cols = []
    for dh in range(3):
        for dw in range(3):
            cols.append(xp[:, dh:dh + (Ho - 1) * stride + 1:stride,
                              dw:dw + (Wo - 1) * stride + 1:stride, :])
    patches = jnp.concatenate(cols, axis=-1)          # (N, Ho, Wo, 9*C), (kh, kw, Cin) order
    return patches.reshape(N * Ho * Wo, 9 * C), (N, Ho, Wo)


# ------------------------- fully fused basic-block kernel (stride 1) ---------------------

def _basic_block_kernel(x_ref, w1_ref, b1_ref, w2_ref, b2_ref, ring_ref, sc_ref,
                        o_ref, h1_ref, *, npos, wp, ext, a_bit):
    """One image per grid step.

    x_ref  : (E, Cin)    bf16  halo-extended flattened padded image, E = npos + 2*ext
    w1_ref : (9, Cin, P) bf16  conv1 taps, BN1 scale folded in
    b1_ref : (1, P)      f32   BN1 bias
    w2_ref : (9, P, P)   bf16  conv2 taps, channels-major (Cout, Cin), BN2 scale folded in
    b2_ref : (P, 1)      f32   BN2 bias (channels-major)
    ring_ref:(npos, 1)   f32   1 at valid padded positions, 0 on the zero ring / lane pad
    sc_ref : (P, npos)   bf16  shortcut (identity LambdaLayer path), channels-major
    o_ref  : (P, npos)   bf16  output, channels-major (== NCHW after wrapper reshape)
    h1_ref : (E, P)      bf16  VMEM scratch holding act1(bn1(conv1(x))) with halo rows
    npos is the lane-padded (multiple-of-128) padded-grid position count.
    """
    planes = w1_ref.shape[2]

    # ---- conv1 (3x3, pad 1) + folded BN1 + act1, computed over the whole padded grid ----
    acc1 = jnp.zeros((npos, planes), jnp.float32)
    for t in range(9):
        dh, dw = divmod(t, 3)
        start = ext + (dh - 1) * wp + (dw - 1)        # constant flat shift per tap
        acc1 = acc1 + jnp.dot(x_ref[start:start + npos, :], w1_ref[t],
                              preferred_element_type=jnp.float32)
    h1 = _quant_act(acc1 + b1_ref[...], a_bit) * ring_ref[...]   # zero the pad ring / lane pad

    # h1 stays resident in VMEM (halo bands zeroed, centre written once in place)
    zero_halo = jnp.zeros((ext, planes), h1_ref.dtype)
    h1_ref[:ext, :] = zero_halo
    h1_ref[ext + npos:, :] = zero_halo
    h1_ref[ext:ext + npos, :] = h1.astype(h1_ref.dtype)

    # ---- conv2 (3x3, pad 1) + folded BN2, channels-major NT dots (lane-dense output) ----
    acc2 = jnp.zeros((planes, npos), jnp.float32)
    for t in range(9):
        dh, dw = divmod(t, 3)
        start = ext + (dh - 1) * wp + (dw - 1)
        tap = h1_ref[start:start + npos, :]           # (npos, P)
        # (P, Pin) x (npos, Pin)^T -> (P, npos)   (same NT pattern as q @ k^T)
        acc2 = acc2 + lax.dot_general(w2_ref[t], tap, (((1,), (1,)), ((), ())),
                                      preferred_element_type=jnp.float32)

    y = acc2 + b2_ref[...] + sc_ref[...].astype(jnp.float32)   # bias + residual shortcut
    o_ref[...] = _quant_act(y, a_bit).astype(o_ref.dtype)


# ------------------- fallback kernels (stride != 1 downsampling blocks) ------------------

def _mm_bias_act_kernel(p_ref, w_ref, b_ref, o_ref, *, a_bit):
    y = jnp.dot(p_ref[...], w_ref[...], preferred_element_type=jnp.float32)
    o_ref[...] = _quant_act(y + b_ref[...], a_bit).astype(o_ref.dtype)


def _mm_bias_res_act_kernel(p_ref, w_ref, b_ref, r_ref, o_ref, *, a_bit):
    y = jnp.dot(p_ref[...], w_ref[...], preferred_element_type=jnp.float32)
    y = y + b_ref[...] + r_ref[...].astype(jnp.float32)
    o_ref[...] = _quant_act(y, a_bit).astype(o_ref.dtype)


def _fused_matmul(patches, w_mat, bias, a_bit, residual=None, tm=256):
    """patches: (M, K), w_mat: (K, Cout) bf16 (BN scale folded), bias: (Cout,)."""
    M, K = patches.shape
    Cout = w_mat.shape[1]
    tm = min(tm, M)                                   # avoid blocks larger than the array
    bias2 = bias.reshape(1, Cout).astype(jnp.float32)
    in_specs = [
        pl.BlockSpec((tm, K), lambda i: (i, 0)),
        pl.BlockSpec((K, Cout), lambda i: (0, 0)),
        pl.BlockSpec((1, Cout), lambda i: (0, 0)),
    ]
    args = [patches.astype(jnp.bfloat16), w_mat, bias2]
    if residual is None:
        kernel = functools.partial(_mm_bias_act_kernel, a_bit=a_bit)
    else:
        in_specs.append(pl.BlockSpec((tm, Cout), lambda i: (i, 0)))
        args.append(residual.astype(jnp.bfloat16))
        kernel = functools.partial(_mm_bias_res_act_kernel, a_bit=a_bit)
    return pl.pallas_call(
        kernel,
        out_shape=jax.ShapeDtypeStruct((M, Cout), jnp.bfloat16),
        grid=(pl.cdiv(M, tm),),
        in_specs=in_specs,
        out_specs=pl.BlockSpec((tm, Cout), lambda i: (i, 0)),
        compiler_params=pltpu.CompilerParams(dimension_semantics=("parallel",)),
    )(*args)


# ------------------------------------- the module ----------------------------------------

class BasicBlockQPallas:
    expansion = 1

    def __init__(self, a_bit, w_bit, in_planes, planes, stride=1, option='A', key=None):
        assert option == 'A', "only option A shortcut is implemented (as in the reference)"
        self.a_bit, self.w_bit = a_bit, w_bit
        self.in_planes, self.planes, self.stride = in_planes, planes, stride

        k1, k2, k3, k4 = jax.random.split(key, 4)
        # conv weights stored PyTorch-style: (Cout, Cin, kh, kw)
        self.w1 = jax.random.normal(k1, (planes, in_planes, 3, 3), jnp.float32) * 0.1
        self.w2 = jax.random.normal(k2, (planes, planes, 3, 3), jnp.float32) * 0.1

        def bn_params(k, c, eps=1e-5):   # eval-mode BN: y = scale*x + bias
            ka, kb, kc, kd = jax.random.split(k, 4)
            gamma = 1.0 + 0.1 * jax.random.normal(ka, (c,), jnp.float32)
            beta = 0.1 * jax.random.normal(kb, (c,), jnp.float32)
            mean = 0.1 * jax.random.normal(kc, (c,), jnp.float32)
            var = 1.0 + 0.1 * jnp.abs(jax.random.normal(kd, (c,), jnp.float32))
            scale = gamma / jnp.sqrt(var + eps)
            return scale, beta - mean * scale

        self.bn1_scale, self.bn1_bias = bn_params(k3, planes)
        self.bn2_scale, self.bn2_bias = bn_params(k4, planes)

        # pattern masks (mirrors the pattern_dic index selection in the reference)
        if in_planes != planes:
            idx = {16: 0, 32: 6, 64: 12}.get(in_planes, 0)
            self.mask1 = None                 # conv1 is Conv2d_Q_ (unmasked)
            self.mask2 = jnp.array(PATTERN_DIC[idx], jnp.float32).reshape(3, 3)
        else:
            i1, i2 = {16: (1, 2), 32: (7, 8), 64: (13, 14)}.get(planes, (1, 2))
            self.mask1 = jnp.array(PATTERN_DIC[i1], jnp.float32).reshape(3, 3)
            self.mask2 = jnp.array(PATTERN_DIC[i2], jnp.float32).reshape(3, 3)

    def _w_taps(self, w, mask, bn_scale):
        """quantize + pattern-mask + fold eval-mode BN scale -> (9, Cin, Cout) bf16."""
        wq = weight_quantize(w, self.w_bit)
        if mask is not None:
            wq = wq * mask[None, None, :, :]
        wt = jnp.transpose(wq, (2, 3, 1, 0))                 # (kh, kw, Cin, Cout)
        wt = wt * bn_scale[None, None, None, :]              # fold BN scale into weights
        return wt.reshape(9, w.shape[1], w.shape[0]).astype(jnp.bfloat16)

    def __call__(self, x_nchw):
        N, Cin, H, W = x_nchw.shape
        assert Cin == self.in_planes
        if self.stride == 1 and self.in_planes == self.planes:
            return self._forward_fused(x_nchw)
        return self._forward_fallback(x_nchw)

    # ---- fully fused path (identity shortcut, stride 1) ----
    def _forward_fused(self, x_nchw):
        N, Cin, H, W = x_nchw.shape
        P = self.planes
        Hp, Wp = H + 2, W + 2
        npos = Hp * Wp
        npos_pad = ((npos + 127) // 128) * 128   # lane-dense position axis (multiple of 128)
        ext = ((Wp + 1 + 7) // 8) * 8            # sublane-aligned halo for the flat tap shifts
        E = npos_pad + 2 * ext

        # padded NHWC image, flattened over (Hp, Wp), with zero halo rows on both ends
        x_nhwc = jnp.transpose(x_nchw, (0, 2, 3, 1))
        xpad = jnp.pad(x_nhwc, ((0, 0), (1, 1), (1, 1), (0, 0)))
        x_ext = jnp.pad(xpad.reshape(N, npos, Cin),
                        ((0, 0), (ext, ext + npos_pad - npos), (0, 0))).astype(jnp.bfloat16)

        # ring mask: 1 at valid padded positions, 0 on the 1-px zero ring and lane padding
        ring = jnp.pad(jnp.ones((H, W), jnp.float32), ((1, 1), (1, 1))).reshape(npos, 1)
        ring = jnp.pad(ring, ((0, npos_pad - npos), (0, 0)))

        # identity shortcut, channels-major over the (lane-padded) padded grid
        sc = jnp.pad(x_nchw, ((0, 0), (0, 0), (1, 1), (1, 1))).reshape(N, P, npos)
        sc = jnp.pad(sc, ((0, 0), (0, 0), (0, npos_pad - npos))).astype(jnp.bfloat16)

        w1 = self._w_taps(self.w1, self.mask1, self.bn1_scale)            # (9, Cin, P)
        w2 = jnp.transpose(self._w_taps(self.w2, self.mask2, self.bn2_scale),
                           (0, 2, 1))                                     # (9, P, P) chan-major
        b1 = self.bn1_bias.reshape(1, P).astype(jnp.float32)
        b2 = self.bn2_bias.reshape(P, 1).astype(jnp.float32)

        kernel = functools.partial(_basic_block_kernel, npos=npos_pad, wp=Wp, ext=ext,
                                   a_bit=self.a_bit)
        out = pl.pallas_call(
            kernel,
            out_shape=jax.ShapeDtypeStruct((N, P, npos_pad), jnp.bfloat16),
            grid=(N,),
            in_specs=[
                pl.BlockSpec((None, E, Cin), lambda n: (n, 0, 0)),
                pl.BlockSpec((9, Cin, P), lambda n: (0, 0, 0)),
                pl.BlockSpec((1, P), lambda n: (0, 0)),
                pl.BlockSpec((9, P, P), lambda n: (0, 0, 0)),
                pl.BlockSpec((P, 1), lambda n: (0, 0)),
                pl.BlockSpec((npos_pad, 1), lambda n: (0, 0)),
                pl.BlockSpec((None, P, npos_pad), lambda n: (n, 0, 0)),
            ],
            out_specs=pl.BlockSpec((None, P, npos_pad), lambda n: (n, 0, 0)),
            scratch_shapes=[pltpu.VMEM((E, P), jnp.bfloat16)],
            compiler_params=pltpu.CompilerParams(dimension_semantics=("parallel",)),
        )(x_ext, w1, b1, w2, b2, ring, sc)

        # drop lane padding and the pad-ring positions -> NCHW
        return out[:, :, :npos].reshape(N, P, Hp, Wp)[:, :, 1:H + 1, 1:W + 1]

    # ---- fallback for downsampling blocks (option-A LambdaLayer shortcut) ----
    def _forward_fallback(self, x_nchw):
        # TODO(synk): stride != 1 blocks keep the simpler (non-fused, position-major) im2col
        # path; only the stride-1 identity block is fully fused in a single Pallas kernel.
        N, Cin, H, W = x_nchw.shape
        P, s = self.planes, self.stride
        x_nhwc = jnp.transpose(x_nchw, (0, 2, 3, 1))

        w1 = self._w_taps(self.w1, self.mask1, self.bn1_scale).reshape(9 * Cin, P)
        w2 = self._w_taps(self.w2, self.mask2, self.bn2_scale).reshape(9 * P, P)

        patches1, (Nb, Ho, Wo) = im2col_3x3(x_nhwc, s)
        h1 = _fused_matmul(patches1, w1, self.bn1_bias, self.a_bit)
        h1 = h1.reshape(Nb, Ho, Wo, P)

        if s != 1 or self.in_planes != self.planes:     # option-A LambdaLayer shortcut
            sc = x_nhwc[:, ::2, ::2, :]                  # lambda x: pad(x[:, :, ::2, ::2], ...)
            pad = P // 4
            sc = jnp.pad(sc, ((0, 0), (0, 0), (0, 0), (pad, pad)))
        else:
            sc = x_nhwc
        sc_flat = sc.reshape(Nb * Ho * Wo, P)

        patches2, _ = im2col_3x3(h1.astype(jnp.float32), 1)
        out = _fused_matmul(patches2, w2, self.bn2_bias, self.a_bit, residual=sc_flat)
        return jnp.transpose(out.reshape(Nb, Ho, Wo, P), (0, 3, 1, 2))


if __name__ == "__main__":
    key = jax.random.PRNGKey(0)
    kx, kp1, kp2 = jax.random.split(key, 3)

    # small shapes: batch=2, in_planes=planes=16 (identity shortcut), spatial 16x16
    N, C, H, W = 2, 16, 16, 16
    x_nchw = jax.random.normal(kx, (N, C, H, W), jnp.float32)

    # stage-1 block: identity shortcut, fully fused single-kernel path
    block1 = BasicBlockQPallas(a_bit=4, w_bit=4, in_planes=16, planes=16, stride=1,
                               option='A', key=kp1)
    y1 = block1(x_nchw)                     # (2, 16, 16, 16) bf16

    # stage-2 block: stride-2 downsample -> option-A LambdaLayer shortcut path
    block2 = BasicBlockQPallas(a_bit=4, w_bit=4, in_planes=16, planes=32, stride=2,
                               option='A', key=kp2)
    y2 = block2(y1.astype(jnp.float32))     # (2, 32, 8, 8) bf16

    jax.block_until_ready((y1, y2))

    assert y1.shape == (N, 16, H, W)
    assert y2.shape == (N, 32, H // 2, W // 2)
    assert bool(jnp.all(jnp.isfinite(y1.astype(jnp.float32))))
    assert bool(jnp.all(jnp.isfinite(y2.astype(jnp.float32))))
    print("KERNEL_OK")
</pallas_src>

<mosaic_0001>
module attributes {stable_mosaic.version = 11 : i64} {
  func.func @_basic_block_kernel(%arg0: i32, %arg1: memref<1x432x16xbf16, #tpu.memory_space<vmem>>, %arg2: memref<9x16x16xbf16, #tpu.memory_space<vmem>>, %arg3: memref<1x16xf32, #tpu.memory_space<vmem>>, %arg4: memref<9x16x16xbf16, #tpu.memory_space<vmem>>, %arg5: memref<16x1xf32, #tpu.memory_space<vmem>>, %arg6: memref<384x1xf32, #tpu.memory_space<vmem>>, %arg7: memref<1x16x384xbf16, #tpu.memory_space<vmem>>, %arg8: memref<1x16x384xbf16, #tpu.memory_space<vmem>>, %arg9: memref<432x16xbf16, #tpu.memory_space<vmem>>) attributes {dimension_semantics = [#tpu.dimension_semantics<parallel>], iteration_bounds = array<i64: 2>, scalar_prefetch = 0 : i64, scratch_operands = 1 : i64, tpu.core_type = #tpu.core_type<tc>, window_params = [{transform_indices = @transform_0, window_bounds = array<i64: 1, 432, 16>}, {pipeline_mode = #tpu.pipeline_mode<synchronous>, transform_indices = @transform_1, window_bounds = array<i64: 9, 16, 16>}, {pipeline_mode = #tpu.pipeline_mode<synchronous>, transform_indices = @transform_2, window_bounds = array<i64: 1, 16>}, {pipeline_mode = #tpu.pipeline_mode<synchronous>, transform_indices = @transform_3, window_bounds = array<i64: 9, 16, 16>}, {pipeline_mode = #tpu.pipeline_mode<synchronous>, transform_indices = @transform_4, window_bounds = array<i64: 16, 1>}, {pipeline_mode = #tpu.pipeline_mode<synchronous>, transform_indices = @transform_5, window_bounds = array<i64: 384, 1>}, {transform_indices = @transform_6, window_bounds = array<i64: 1, 16, 384>}, {transform_indices = @transform_7, window_bounds = array<i64: 1, 16, 384>}]} {
    %cst = arith.constant 0.000000e+00 : f32
    %0 = vector.broadcast %cst : f32 to vector<384x16xf32>
    %c0 = arith.constant 0 : index
    %c5 = arith.constant 5 : index
    %c0_0 = arith.constant 0 : index
    %1 = vector.load %arg1[%c0, %c5, %c0_0] : memref<1x432x16xbf16, #tpu.memory_space<vmem>>, vector<1x384x16xbf16>
    %2 = vector.shape_cast %1 : vector<1x384x16xbf16> to vector<384x16xbf16>
    %c0_1 = arith.constant 0 : index
    %c0_2 = arith.constant 0 : index
    %c0_3 = arith.constant 0 : index
    %3 = vector.load %arg2[%c0_1, %c0_2, %c0_3] : memref<9x16x16xbf16, #tpu.memory_space<vmem>>, vector<1x16x16xbf16>
    %4 = vector.shape_cast %3 : vector<1x16x16xbf16> to vector<16x16xbf16>
    %cst_4 = arith.constant dense<0.000000e+00> : vector<384x16xf32>
    %5 = tpu.matmul %2, %4, %cst_4 {dimension_numbers = #tpu.dot_dimension_numbers<[1], [0], [0], [1], [0, 0, 1, 1], [], []>} : vector<384x16xbf16>, vector<16x16xbf16>, vector<384x16xf32> -> vector<384x16xf32>
    %6 = arith.addf %0, %5 : vector<384x16xf32>
    %c0_5 = arith.constant 0 : index
    %c6 = arith.constant 6 : index
    %c0_6 = arith.constant 0 : index
    %7 = vector.load %arg1[%c0_5, %c6, %c0_6] : memref<1x432x16xbf16, #tpu.memory_space<vmem>>, vector<1x384x16xbf16>
    %8 = vector.shape_cast %7 : vector<1x384x16xbf16> to vector<384x16xbf16>
    %c1 = arith.constant 1 : index
    %c0_7 = arith.constant 0 : index
    %c0_8 = arith.constant 0 : index
    %9 = vector.load %arg2[%c1, %c0_7, %c0_8] : memref<9x16x16xbf16, #tpu.memory_space<vmem>>, vector<1x16x16xbf16>
    %10 = vector.shape_cast %9 : vector<1x16x16xbf16> to vector<16x16xbf16>
    %cst_9 = arith.constant dense<0.000000e+00> : vector<384x16xf32>
    %11 = tpu.matmul %8, %10, %cst_9 {dimension_numbers = #tpu.dot_dimension_numbers<[1], [0], [0], [1], [0, 0, 1, 1], [], []>} : vector<384x16xbf16>, vector<16x16xbf16>, vector<384x16xf32> -> vector<384x16xf32>
    %12 = arith.addf %6, %11 : vector<384x16xf32>
    %c0_10 = arith.constant 0 : index
    %c7 = arith.constant 7 : index
    %c0_11 = arith.constant 0 : index
    %13 = vector.load %arg1[%c0_10, %c7, %c0_11] : memref<1x432x16xbf16, #tpu.memory_space<vmem>>, vector<1x384x16xbf16>
    %14 = vector.shape_cast %13 : vector<1x384x16xbf16> to vector<384x16xbf16>
    %c2 = arith.constant 2 : index
    %c0_12 = arith.constant 0 : index
    %c0_13 = arith.constant 0 : index
    %15 = vector.load %arg2[%c2, %c0_12, %c0_13] : memref<9x16x16xbf16, #tpu.memory_space<vmem>>, vector<1x16x16xbf16>
    %16 = vector.shape_cast %15 : vector<1x16x16xbf16> to vector<16x16xbf16>
    %cst_14 = arith.constant dense<0.000000e+00> : vector<384x16xf32>
    %17 = tpu.matmul %14, %16, %cst_14 {dimension_numbers = #tpu.dot_dimension_numbers<[1], [0], [0], [1], [0, 0, 1, 1], [], []>} : vector<384x16xbf16>, vector<16x16xbf16>, vector<384x16xf32> -> vector<384x16xf32>
    %18 = arith.addf %12, %17 : vector<384x16xf32>
    %c0_15 = arith.constant 0 : index
    %c23 = arith.constant 23 : index
    %c0_16 = arith.constant 0 : index
    %19 = vector.load %arg1[%c0_15, %c23, %c0_16] : memref<1x432x16xbf16, #tpu.memory_space<vmem>>, vector<1x384x16xbf16>
    %20 = vector.shape_cast %19 : vector<1x384x16xbf16> to vector<384x16xbf16>
    %c3 = arith.constant 3 : index
    %c0_17 = arith.constant 0 : index
    %c0_18 = arith.constant 0 : index
    %21 = vector.load %arg2[%c3, %c0_17, %c0_18] : memref<9x16x16xbf16, #tpu.memory_space<vmem>>, vector<1x16x16xbf16>
    %22 = vector.shape_cast %21 : vector<1x16x16xbf16> to vector<16x16xbf16>
    %cst_19 = arith.constant dense<0.000000e+00> : vector<384x16xf32>
    %23 = tpu.matmul %20, %22, %cst_19 {dimension_numbers = #tpu.dot_dimension_numbers<[1], [0], [0], [1], [0, 0, 1, 1], [], []>} : vector<384x16xbf16>, vector<16x16xbf16>, vector<384x16xf32> -> vector<384x16xf32>
    %24 = arith.addf %18, %23 : vector<384x16xf32>
    %c0_20 = arith.constant 0 : index
    %c24 = arith.constant 24 : index
    %c0_21 = arith.constant 0 : index
    %25 = vector.load %arg1[%c0_20, %c24, %c0_21] : memref<1x432x16xbf16, #tpu.memory_space<vmem>>, vector<1x384x16xbf16>
    %26 = vector.shape_cast %25 : vector<1x384x16xbf16> to vector<384x16xbf16>
    %c4 = arith.constant 4 : index
    %c0_22 = arith.constant 0 : index
    %c0_23 = arith.constant 0 : index
    %27 = vector.load %arg2[%c4, %c0_22, %c0_23] : memref<9x16x16xbf16, #tpu.memory_space<vmem>>, vector<1x16x16xbf16>
    %28 = vector.shape_cast %27 : vector<1x16x16xbf16> to vector<16x16xbf16>
    %cst_24 = arith.constant dense<0.000000e+00> : vector<384x16xf32>
    %29 = tpu.matmul %26, %28, %cst_24 {dimension_numbers = #tpu.dot_dimension_numbers<[1], [0], [0], [1], [0, 0, 1, 1], [], []>} : vector<384x16xbf16>, vector<16x16xbf16>, vector<384x16xf32> -> vector<384x16xf32>
    %30 = arith.addf %24, %29 : vector<384x16xf32>
    %c0_25 = arith.constant 0 : index
    %c25 = arith.constant 25 : index
    %c0_26 = arith.constant 0 : index
    %31 = vector.load %arg1[%c0_25, %c25, %c0_26] : memref<1x432x16xbf16, #tpu.memory_space<vmem>>, vector<1x384x16xbf16>
    %32 = vector.shape_cast %31 : vector<1x384x16xbf16> to vector<384x16xbf16>
    %c5_27 = arith.constant 5 : index
    %c0_28 = arith.constant 0 : index
    %c0_29 = arith.constant 0 : index
    %33 = vector.load %arg2[%c5_27, %c0_28, %c0_29] : memref<9x16x16xbf16, #tpu.memory_space<vmem>>, vector<1x16x16xbf16>
    %34 = vector.shape_cast %33 : vector<1x16x16xbf16> to vector<16x16xbf16>
    %cst_30 = arith.constant dense<0.000000e+00> : vector<384x16xf32>
    %35 = tpu.matmul %32, %34, %cst_30 {dimension_numbers = #tpu.dot_dimension_numbers<[1], [0], [0], [1], [0, 0, 1, 1], [], []>} : vector<384x16xbf16>, vector<16x16xbf16>, vector<384x16xf32> -> vector<384x16xf32>
    %36 = arith.addf %30, %35 : vector<384x16xf32>
    %c0_31 = arith.constant 0 : index
    %c41 = arith.constant 41 : index
    %c0_32 = arith.constant 0 : index
    %37 = vector.load %arg1[%c0_31, %c41, %c0_32] : memref<1x432x16xbf16, #tpu.memory_space<vmem>>, vector<1x384x16xbf16>
    %38 = vector.shape_cast %37 : vector<1x384x16xbf16> to vector<384x16xbf16>
    %c6_33 = arith.constant 6 : index
    %c0_34 = arith.constant 0 : index
    %c0_35 = arith.constant 0 : index
    %39 = vector.load %arg2[%c6_33, %c0_34, %c0_35] : memref<9x16x16xbf16, #tpu.memory_space<vmem>>, vector<1x16x16xbf16>
    %40 = vector.shape_cast %39 : vector<1x16x16xbf16> to vector<16x16xbf16>
    %cst_36 = arith.constant dense<0.000000e+00> : vector<384x16xf32>
    %41 = tpu.matmul %38, %40, %cst_36 {dimension_numbers = #tpu.dot_dimension_numbers<[1], [0], [0], [1], [0, 0, 1, 1], [], []>} : vector<384x16xbf16>, vector<16x16xbf16>, vector<384x16xf32> -> vector<384x16xf32>
    %42 = arith.addf %36, %41 : vector<384x16xf32>
    %c0_37 = arith.constant 0 : index
    %c42 = arith.constant 42 : index
    %c0_38 = arith.constant 0 : index
    %43 = vector.load %arg1[%c0_37, %c42, %c0_38] : memref<1x432x16xbf16, #tpu.memory_space<vmem>>, vector<1x384x16xbf16>
    %44 = vector.shape_cast %43 : vector<1x384x16xbf16> to vector<384x16xbf16>
    %c7_39 = arith.constant 7 : index
    %c0_40 = arith.constant 0 : index
    %c0_41 = arith.constant 0 : index
    %45 = vector.load %arg2[%c7_39, %c0_40, %c0_41] : memref<9x16x16xbf16, #tpu.memory_space<vmem>>, vector<1x16x16xbf16>
    %46 = vector.shape_cast %45 : vector<1x16x16xbf16> to vector<16x16xbf16>
    %cst_42 = arith.constant dense<0.000000e+00> : vector<384x16xf32>
    %47 = tpu.matmul %44, %46, %cst_42 {dimension_numbers = #tpu.dot_dimension_numbers<[1], [0], [0], [1], [0, 0, 1, 1], [], []>} : vector<384x16xbf16>, vector<16x16xbf16>, vector<384x16xf32> -> vector<384x16xf32>
    %48 = arith.addf %42, %47 : vector<384x16xf32>
    %c0_43 = arith.constant 0 : index
    %c43 = arith.constant 43 : index
    %c0_44 = arith.constant 0 : index
    %49 = vector.load %arg1[%c0_43, %c43, %c0_44] : memref<1x432x16xbf16, #tpu.memory_space<vmem>>, vector<1x384x16xbf16>
    %50 = vector.shape_cast %49 : vector<1x384x16xbf16> to vector<384x16xbf16>
    %c8 = arith.constant 8 : index
    %c0_45 = arith.constant 0 : index
    %c0_46 = arith.constant 0 : index
    %51 = vector.load %arg2[%c8, %c0_45, %c0_46] : memref<9x16x16xbf16, #tpu.memory_space<vmem>>, vector<1x16x16xbf16>
    %52 = vector.shape_cast %51 : vector<1x16x16xbf16> to vector<16x16xbf16>
    %cst_47 = arith.constant dense<0.000000e+00> : vector<384x16xf32>
    %53 = tpu.matmul %50, %52, %cst_47 {dimension_numbers = #tpu.dot_dimension_numbers<[1], [0], [0], [1], [0, 0, 1, 1], [], []>} : vector<384x16xbf16>, vector<16x16xbf16>, vector<384x16xf32> -> vector<384x16xf32>
    %54 = arith.addf %48, %53 : vector<384x16xf32>
    %c0_48 = arith.constant 0 : index
    %c0_49 = arith.constant 0 : index
    %55 = vector.load %arg3[%c0_48, %c0_49] : memref<1x16xf32, #tpu.memory_space<vmem>>, vector<1x16xf32>
    %56 = vector.broadcast %55 : vector<1x16xf32> to vector<384x16xf32>
    %57 = arith.addf %54, %56 : vector<384x16xf32>
    %cst_50 = arith.constant 0.000000e+00 : f32
    %cst_51 = arith.constant 1.000000e+00 : f32
    %58 = vector.broadcast %cst_50 : f32 to vector<384x16xf32>
    %59 = arith.maximumf %58, %57 : vector<384x16xf32>
    %60 = vector.broadcast %cst_51 : f32 to vector<384x16xf32>
    %61 = arith.minimumf %60, %59 : vector<384x16xf32>
    %cst_52 = arith.constant 1.500000e+01 : f32
    %62 = vector.broadcast %cst_52 : f32 to vector<384x16xf32>
    %63 = arith.mulf %61, %62 : vector<384x16xf32>
    %64 = math.roundeven %63 : vector<384x16xf32>
    %cst_53 = arith.constant 1.500000e+01 : f32
    %65 = vector.broadcast %cst_53 : f32 to vector<384x16xf32>
    %66 = arith.divf %64, %65 : vector<384x16xf32>
    %c0_54 = arith.constant 0 : index
    %c0_55 = arith.constant 0 : index
    %67 = vector.load %arg6[%c0_54, %c0_55] : memref<384x1xf32, #tpu.memory_space<vmem>>, vector<384x1xf32>
    %68 = vector.broadcast %67 : vector<384x1xf32> to vector<384x16xf32>
    %69 = arith.mulf %66, %68 : vector<384x16xf32>
    %cst_56 = arith.constant 0.000000e+00 : bf16
    %70 = vector.broadcast %cst_56 : bf16 to vector<24x16xbf16>
    %c0_57 = arith.constant 0 : index
    %c0_58 = arith.constant 0 : index
    %71 = vector.load %arg9[%c0_57, %c0_58] : memref<432x16xbf16, #tpu.memory_space<vmem>>, vector<24x16xbf16>
    tpu.vector_store %arg9[%c0_57, %c0_58], %70 {strides = array<i32>} : memref<432x16xbf16, #tpu.memory_space<vmem>>, vector<24x16xbf16>,
    %c408 = arith.constant 408 : index
    %c0_59 = arith.constant 0 : index
    %72 = vector.load %arg9[%c408, %c0_59] : memref<432x16xbf16, #tpu.memory_space<vmem>>, vector<24x16xbf16>
    tpu.vector_store %arg9[%c408, %c0_59], %70 {strides = array<i32>} : memref<432x16xbf16, #tpu.memory_space<vmem>>, vector<24x16xbf16>,
    %73 = arith.truncf %69 : vector<384x16xf32> to vector<384x16xbf16>
    %c24_60 = arith.constant 24 : index
    %c0_61 = arith.constant 0 : index
    %74 = vector.load %arg9[%c24_60, %c0_61] : memref<432x16xbf16, #tpu.memory_space<vmem>>, vector<384x16xbf16>
    tpu.vector_store %arg9[%c24_60, %c0_61], %73 {strides = array<i32>} : memref<432x16xbf16, #tpu.memory_space<vmem>>, vector<384x16xbf16>,
    %cst_62 = arith.constant 0.000000e+00 : f32
    %75 = vector.broadcast %cst_62 : f32 to vector<16x384xf32>
    %c5_63 = arith.constant 5 : index
    %c0_64 = arith.constant 0 : index
    %76 = vector.load %arg9[%c5_63, %c0_64] : memref<432x16xbf16, #tpu.memory_space<vmem>>, vector<384x16xbf16>
    %c0_65 = arith.constant 0 : index
    %c0_66 = arith.constant 0 : index
    %c0_67 = arith.constant 0 : index
    %77 = vector.load %arg4[%c0_65, %c0_66, %c0_67] : memref<9x16x16xbf16, #tpu.memory_space<vmem>>, vector<1x16x16xbf16>
    %78 = vector.shape_cast %77 : vector<1x16x16xbf16> to vector<16x16xbf16>
    %cst_68 = arith.constant dense<0.000000e+00> : vector<16x384xf32>
    %79 = tpu.matmul %78, %76, %cst_68 {dimension_numbers = #tpu.dot_dimension_numbers<[1], [1], [0], [0], [0, 0, 1, 0], [], []>} : vector<16x16xbf16>, vector<384x16xbf16>, vector<16x384xf32> -> vector<16x384xf32>
    %80 = arith.addf %75, %79 : vector<16x384xf32>
    %c6_69 = arith.constant 6 : index
    %c0_70 = arith.constant 0 : index
    %81 = vector.load %arg9[%c6_69, %c0_70] : memref<432x16xbf16, #tpu.memory_space<vmem>>, vector<384x16xbf16>
    %c1_71 = arith.constant 1 : index
    %c0_72 = arith.constant 0 : index
    %c0_73 = arith.constant 0 : index
    %82 = vector.load %arg4[%c1_71, %c0_72, %c0_73] : memref<9x16x16xbf16, #tpu.memory_space<vmem>>, vector<1x16x16xbf16>
    %83 = vector.shape_cast %82 : vector<1x16x16xbf16> to vector<16x16xbf16>
    %cst_74 = arith.constant dense<0.000000e+00> : vector<16x384xf32>
    %84 = tpu.matmul %83, %81, %cst_74 {dimension_numbers = #tpu.dot_dimension_numbers<[1], [1], [0], [0], [0, 0, 1, 0], [], []>} : vector<16x16xbf16>, vector<384x16xbf16>, vector<16x384xf32> -> vector<16x384xf32>
    %85 = arith.addf %80, %84 : vector<16x384xf32>
    %c7_75 = arith.constant 7 : index
    %c0_76 = arith.constant 0 : index
    %86 = vector.load %arg9[%c7_75, %c0_76] : memref<432x16xbf16, #tpu.memory_space<vmem>>, vector<384x16xbf16>
    %c2_77 = arith.constant 2 : index
    %c0_78 = arith.constant 0 : index
    %c0_79 = arith.constant 0 : index
    %87 = vector.load %arg4[%c2_77, %c0_78, %c0_79] : memref<9x16x16xbf16, #tpu.memory_space<vmem>>, vector<1x16x16xbf16>
    %88 = vector.shape_cast %87 : vector<1x16x16xbf16> to vector<16x16xbf16>
    %cst_80 = arith.constant dense<0.000000e+00> : vector<16x384xf32>
    %89 = tpu.matmul %88, %86, %cst_80 {dimension_numbers = #tpu.dot_dimension_numbers<[1], [1], [0], [0], [0, 0, 1, 0], [], []>} : vector<16x16xbf16>, vector<384x16xbf16>, vector<16x384xf32> -> vector<16x384xf32>
    %90 = arith.addf %85, %89 : vector<16x384xf32>
    %c23_81 = arith.constant 23 : index
    %c0_82 = arith.constant 0 : index
    %91 = vector.load %arg9[%c23_81, %c0_82] : memref<432x16xbf16, #tpu.memory_space<vmem>>, vector<384x16xbf16>
    %c3_83 = arith.constant 3 : index
    %c0_84 = arith.constant 0 : index
    %c0_85 = arith.constant 0 : index
    %92 = vector.load %arg4[%c3_83, %c0_84, %c0_85] : memref<9x16x16xbf16, #tpu.memory_space<vmem>>, vector<1x16x16xbf16>
    %93 = vector.shape_cast %92 : vector<1x16x16xbf16> to vector<16x16xbf16>
    %cst_86 = arith.constant dense<0.000000e+00> : vector<16x384xf32>
    %94 = tpu.matmul %93, %91, %cst_86 {dimension_numbers = #tpu.dot_dimension_numbers<[1], [1], [0], [0], [0, 0, 1, 0], [], []>} : vector<16x16xbf16>, vector<384x16xbf16>, vector<16x384xf32> -> vector<16x384xf32>
    %95 = arith.addf %90, %94 : vector<16x384xf32>
    %c24_87 = arith.constant 24 : index
    %c0_88 = arith.constant 0 : index
    %96 = vector.load %arg9[%c24_87, %c0_88] : memref<432x16xbf16, #tpu.memory_space<vmem>>, vector<384x16xbf16>
    %c4_89 = arith.constant 4 : index
    %c0_90 = arith.constant 0 : index
    %c0_91 = arith.constant 0 : index
    %97 = vector.load %arg4[%c4_89, %c0_90, %c0_91] : memref<9x16x16xbf16, #tpu.memory_space<vmem>>, vector<1x16x16xbf16>
    %98 = vector.shape_cast %97 : vector<1x16x16xbf16> to vector<16x16xbf16>
    %cst_92 = arith.constant dense<0.000000e+00> : vector<16x384xf32>
    %99 = tpu.matmul %98, %96, %cst_92 {dimension_numbers = #tpu.dot_dimension_numbers<[1], [1], [0], [0], [0, 0, 1, 0], [], []>} : vector<16x16xbf16>, vector<384x16xbf16>, vector<16x384xf32> -> vector<16x384xf32>
    %100 = arith.addf %95, %99 : vector<16x384xf32>
    %c25_93 = arith.constant 25 : index
    %c0_94 = arith.constant 0 : index
    %101 = vector.load %arg9[%c25_93, %c0_94] : memref<432x16xbf16, #tpu.memory_space<vmem>>, vector<384x16xbf16>
    %c5_95 = arith.constant 5 : index
    %c0_96 = arith.constant 0 : index
    %c0_97 = arith.constant 0 : index
    %102 = vector.load %arg4[%c5_95, %c0_96, %c0_97] : memref<9x16x16xbf16, #tpu.memory_space<vmem>>, vector<1x16x16xbf16>
    %103 = vector.shape_cast %102 : vector<1x16x16xbf16> to vector<16x16xbf16>
    %cst_98 = arith.constant dense<0.000000e+00> : vector<16x384xf32>
    %104 = tpu.matmul %103, %101, %cst_98 {dimension_numbers = #tpu.dot_dimension_numbers<[1], [1], [0], [0], [0, 0, 1, 0], [], []>} : vector<16x16xbf16>, vector<384x16xbf16>, vector<16x384xf32> -> vector<16x384xf32>
    %105 = arith.addf %100, %104 : vector<16x384xf32>
    %c41_99 = arith.constant 41 : index
    %c0_100 = arith.constant 0 : index
    %106 = vector.load %arg9[%c41_99, %c0_100] : memref<432x16xbf16, #tpu.memory_space<vmem>>, vector<384x16xbf16>
    %c6_101 = arith.constant 6 : index
    %c0_102 = arith.constant 0 : index
    %c0_103 = arith.constant 0 : index
    %107 = vector.load %arg4[%c6_101, %c0_102, %c0_103] : memref<9x16x16xbf16, #tpu.memory_space<vmem>>, vector<1x16x16xbf16>
    %108 = vector.shape_cast %107 : vector<1x16x16xbf16> to vector<16x16xbf16>
    %cst_104 = arith.constant dense<0.000000e+00> : vector<16x384xf32>
    %109 = tpu.matmul %108, %106, %cst_104 {dimension_numbers = #tpu.dot_dimension_numbers<[1], [1], [0], [0], [0, 0, 1, 0], [], []>} : vector<16x16xbf16>, vector<384x16xbf16>, vector<16x384xf32> -> vector<16x384xf32>
    %110 = arith.addf %105, %109 : vector<16x384xf32>
    %c42_105 = arith.constant 42 : index
    %c0_106 = arith.constant 0 : index
    %111 = vector.load %arg9[%c42_105, %c0_106] : memref<432x16xbf16, #tpu.memory_space<vmem>>, vector<384x16xbf16>
    %c7_107 = arith.constant 7 : index
    %c0_108 = arith.constant 0 : index
    %c0_109 = arith.constant 0 : index
    %112 = vector.load %arg4[%c7_107, %c0_108, %c0_109] : memref<9x16x16xbf16, #tpu.memory_space<vmem>>, vector<1x16x16xbf16>
    %113 = vector.shape_cast %112 : vector<1x16x16xbf16> to vector<16x16xbf16>
    %cst_110 = arith.constant dense<0.000000e+00> : vector<16x384xf32>
    %114 = tpu.matmul %113, %111, %cst_110 {dimension_numbers = #tpu.dot_dimension_numbers<[1], [1], [0], [0], [0, 0, 1, 0], [], []>} : vector<16x16xbf16>, vector<384x16xbf16>, vector<16x384xf32> -> vector<16x384xf32>
    %115 = arith.addf %110, %114 : vector<16x384xf32>
    %c43_111 = arith.constant 43 : index
    %c0_112 = arith.constant 0 : index
    %116 = vector.load %arg9[%c43_111, %c0_112] : memref<432x16xbf16, #tpu.memory_space<vmem>>, vector<384x16xbf16>
    %c8_113 = arith.constant 8 : index
    %c0_114 = arith.constant 0 : index
    %c0_115 = arith.constant 0 : index
    %117 = vector.load %arg4[%c8_113, %c0_114, %c0_115] : memref<9x16x16xbf16, #tpu.memory_space<vmem>>, vector<1x16x16xbf16>
    %118 = vector.shape_cast %117 : vector<1x16x16xbf16> to vector<16x16xbf16>
    %cst_116 = arith.constant dense<0.000000e+00> : vector<16x384xf32>
    %119 = tpu.matmul %118, %116, %cst_116 {dimension_numbers = #tpu.dot_dimension_numbers<[1], [1], [0], [0], [0, 0, 1, 0], [], []>} : vector<16x16xbf16>, vector<384x16xbf16>, vector<16x384xf32> -> vector<16x384xf32>
    %120 = arith.addf %115, %119 : vector<16x384xf32>
    %c0_117 = arith.constant 0 : index
    %c0_118 = arith.constant 0 : index
    %121 = vector.load %arg5[%c0_117, %c0_118] : memref<16x1xf32, #tpu.memory_space<vmem>>, vector<16x1xf32>
    %122 = vector.broadcast %121 : vector<16x1xf32> to vector<16x384xf32>
    %123 = arith.addf %120, %122 : vector<16x384xf32>
    %c0_119 = arith.constant 0 : index
    %c0_120 = arith.constant 0 : index
    %c0_121 = arith.constant 0 : index
    %124 = vector.load %arg7[%c0_119, %c0_120, %c0_121] : memref<1x16x384xbf16, #tpu.memory_space<vmem>>, vector<1x16x384xbf16>
    %125 = vector.shape_cast %124 : vector<1x16x384xbf16> to vector<16x384xbf16>
    %126 = arith.extf %125 : vector<16x384xbf16> to vector<16x384xf32>
    %127 = arith.addf %123, %126 : vector<16x384xf32>
    %cst_122 = arith.constant 0.000000e+00 : f32
    %cst_123 = arith.constant 1.000000e+00 : f32
    %128 = vector.broadcast %cst_122 : f32 to vector<16x384xf32>
    %129 = arith.maximumf %128, %127 : vector<16x384xf32>
    %130 = vector.broadcast %cst_123 : f32 to vector<16x384xf32>
    %131 = arith.minimumf %130, %129 : vector<16x384xf32>
    %cst_124 = arith.constant 1.500000e+01 : f32
    %132 = vector.broadcast %cst_124 : f32 to vector<16x384xf32>
    %133 = arith.mulf %131, %132 : vector<16x384xf32>
    %134 = math.roundeven %133 : vector<16x384xf32>
    %cst_125 = arith.constant 1.500000e+01 : f32
    %135 = vector.broadcast %cst_125 : f32 to vector<16x384xf32>
    %136 = arith.divf %134, %135 : vector<16x384xf32>
    %137 = arith.truncf %136 : vector<16x384xf32> to vector<16x384xbf16>
    %c0_126 = arith.constant 0 : index
    %c0_127 = arith.constant 0 : index
    %c0_128 = arith.constant 0 : index
    %138 = vector.load %arg8[%c0_126, %c0_127, %c0_128] : memref<1x16x384xbf16, #tpu.memory_space<vmem>>, vector<1x16x384xbf16>
    %139 = vector.shape_cast %138 : vector<1x16x384xbf16> to vector<16x384xbf16>
    %140 = vector.shape_cast %137 : vector<16x384xbf16> to vector<1x16x384xbf16>
    tpu.vector_store %arg8[%c0_126, %c0_127, %c0_128], %140 {strides = array<i32>} : memref<1x16x384xbf16, #tpu.memory_space<vmem>>, vector<1x16x384xbf16>,
    return
  }
  func.func @transform_0(%arg0: i32) -> (i32, i32, i32) {
    %c0_i32 = arith.constant 0 : i32
    %c0_i32_0 = arith.constant 0 : i32
    %c0_i32_1 = arith.constant 0 : i32
    return %arg0, %c0_i32, %c0_i32_0 : i32, i32, i32
  }
  func.func @transform_1(%arg0: i32) -> (i32, i32, i32) {
    %c0_i32 = arith.constant 0 : i32
    %c0_i32_0 = arith.constant 0 : i32
    %c0_i32_1 = arith.constant 0 : i32
    %c0_i32_2 = arith.constant 0 : i32
    return %c0_i32, %c0_i32_0, %c0_i32_1 : i32, i32, i32
  }
  func.func @transform_2(%arg0: i32) -> (i32, i32) {
    %c0_i32 = arith.constant 0 : i32
    %c0_i32_0 = arith.constant 0 : i32
    %c0_i32_1 = arith.constant 0 : i32
    return %c0_i32, %c0_i32_0 : i32, i32
  }
  func.func @transform_3(%arg0: i32) -> (i32, i32, i32) {
    %c0_i32 = arith.constant 0 : i32
    %c0_i32_0 = arith.constant 0 : i32
    %c0_i32_1 = arith.constant 0 : i32
    %c0_i32_2 = arith.constant 0 : i32
    return %c0_i32, %c0_i32_0, %c0_i32_1 : i32, i32, i32
  }
  func.func @transform_4(%arg0: i32) -> (i32, i32) {
    %c0_i32 = arith.constant 0 : i32
    %c0_i32_0 = arith.constant 0 : i32
    %c0_i32_1 = arith.constant 0 : i32
    return %c0_i32, %c0_i32_0 : i32, i32
  }
  func.func @transform_5(%arg0: i32) -> (i32, i32) {
    %c0_i32 = arith.constant 0 : i32
    %c0_i32_0 = arith.constant 0 : i32
    %c0_i32_1 = arith.constant 0 : i32
    return %c0_i32, %c0_i32_0 : i32, i32
  }
  func.func @transform_6(%arg0: i32) -> (i32, i32, i32) {
    %c0_i32 = arith.constant 0 : i32
    %c0_i32_0 = arith.constant 0 : i32
    %c0_i32_1 = arith.constant 0 : i32
    return %arg0, %c0_i32, %c0_i32_0 : i32, i32, i32
  }
  func.func @transform_7(%arg0: i32) -> (i32, i32, i32) {
    %c0_i32 = arith.constant 0 : i32
    %c0_i32_0 = arith.constant 0 : i32
    %c0_i32_1 = arith.constant 0 : i32
    return %arg0, %c0_i32, %c0_i32_0 : i32, i32, i32
  }
}

</mosaic_0001>

<bundles_post_ra>
// kernel: tpu_custom_call.1
= control target key start
LH: loop header
LB: loop body
LE: loop exit
PB: predicated region body
PF: predicated region fallthrough
CT: control target
= control target key end

     0   :  { %12 = vsyncpa [#allocation4], 0  ;;  %s15362_s0 = inlined_call_operand.vmem [shape: bf16[2,432,16], index: 0, kind: input, shape index: {}]   ;;  %s15363_s1 = inlined_call_operand.vmem [shape: bf16[9,16,16], index: 1, kind: input, shape index: {}]   ;;  %s15364_s2 = inlined_call_operand.vmem [shape: f32[1,16], index: 2, kind: input, shape index: {}]   ;;  %s15365_s3 = inlined_call_operand.vmem [shape: bf16[9,16,16], index: 3, kind: input, shape index: {}]   ;;  %s15366_s4 = inlined_call_operand.vmem [shape: f32[16,1], index: 4, kind: input, shape index: {}]   ;;  %s15367_s5 = inlined_call_operand.vmem [shape: f32[384,1], index: 5, kind: input, shape index: {}]   ;;  %s15368_s6 = inlined_call_operand.vmem [shape: bf16[2,16,384], index: 6, kind: input, shape index: {}]   ;;  %s15369_s7 = inlined_call_operand.hbm [shape: bf16[2,16,384], index: 7, kind: output, shape index: {}]  }
   0x1   :  { %14 = vsyncpa [#allocation4 + $0x1], 0  ;;  %s11478_s24 = smov 0   ;;  %s11480_s25 = smov 0  }
   0x2   :  { %s11482_s26 = smov 0   ;;  %s11484_s27 = smov 0  }
   0x3 LB: > { %s11499_s28 = sadd.s32 4294967295, %s11430_s27   ;;  %s9087_s29 = sadd.s32 4294967294, %s11430_s27   ;;  %s11430_s27 = sphi %s11484_s27, %s15791_s27   ;;  %s11426_s26 = sphi %s11482_s26, %s15790_s26   ;;  %s11422_s25 = sphi %s11480_s25, %s15789_s25   ;;  %s11418_s24 = sphi %s11478_s24, %s15788_s24  }
   0x4   : > { %s11503_s30 = sadd.s32 1, %s11430_s27   ;;  %s184_s8 = sadd.s32 1, %s11426_s26 }
   0x5   : > { %s181_s9 = ssub.s32 %s11430_s27, %s11503_s30  ;;  %p194_p0 = scmp.ne.s32.totalorder %s11426_s26, %s11422_s25 }
   0x6   : > { %p182_p1 = scmp.eq.s32.totalorder %s181_s9, 0  ;;  %p195_p2 = scmp.eq.s32.totalorder %s11499_s28, 1 }
   0x7   : > { %p200_p3 = scmp.ne.s32.totalorder %s11422_s25, %s11418_s24  ;;  %p201_p4 = scmp.eq.s32.totalorder %s9087_s29, 1 }
   0x8   : > { %s11514_s10 = scalar_select %p182_p1, %s11426_s26, %s184_s8  }
   0x9   : > { %p11516_p5 = por %p195_p2, %p194_p0  ;;  %p11520_p6 = por %p201_p4, %p200_p3 }
   0xa   : > { %p9090_p7 = scmp.ge.s32.totalorder %s11430_s27, 1  ;;  %p250_p8 = scmp.lt.s32.totalorder %s11430_s27, 3 }
   0xc   : > { %p251_p9 = pnand %p9090_p7, %p250_p8 }
   0xe   : > { %254 = sbr.rel (%p251_p9) target bundleno = 2313 (0x909), region = 48 }
  0x15   : > { %v11209_v0 = vld [vmem:[%s15363_s1 + $0x8] sm:$0xff]   ;;  %p287_p10 = scmp.lt.s32.totalorder %s11499_s28, 1  ;;  %v11213_v1 = vld [vmem:[%s15363_s1] sm:$0xff]   ;;  %vm476_vm0 = vcmask 1044480   ;;  %vm532_vm1 = vcmask 130048   ;;  %v11561_v11 = vld [vmem:[%s15363_s1 + $0x10] sm:$0xff]  }
  0x16   : > { %9985 = vmatprep.subr.bf16.mxu0 %v11209_v0  ;;  %vm833_vm2 = vsmask.f32 5376  ;;  %vm1368_vm3 = vsmask.f32 4352  ;;  %vm3132_vm4 = vsmask.f32 7424 }
  0x17   : > { %s11531_s15 = scalar_select %p287_p10, %s11499_s28, 1  ;;  %9986 = vmatpush3.bf16.msra.mxu0 %v11209_v0  ;;  %vm4817_vm5 = vsmask.f32 6400  ;;  %vm4409_vm6 = vcmask 1046528   ;;  %vm5913_vm7 = vcmask 130052   ;;  %vm5911_vm8 = vcmask 125952  }
  0x18   : > { %10035 = vmatprep.subr.bf16.mxu0 %v11213_v1  ;;  %vm11434_vm9 = vmmov 0   ;;  %vm5964_vm10 = vcmask 1043456   ;;  %vm7681_vm11 = vsmask.f32 3328  ;;  %vm8412_vm12 = vcmask 1042432   ;;  %s11162_s16 = smul.u32 384, %s11499_s28 }
  0x19   : > { %s11106_s18 = smul.u32 216, %s11531_s15  ;;  %vm8636_vm13 = vsmask.f32 2304  ;;  %s11435_s22 = smov [#allocation3]  }
  0x1a   : > { %s11107_s23 = smul.u32 24, %s11531_s15  ;;  %s284_s15 = sand.u32 1, %s11422_s25  }
  0x1b   : > { %s11540_s21 = scalar_lea.vmem %s15362_s0, %s11106_s18  ;;  %s11105_s13 = smul.u32 24, %s284_s15 }
  0x1c   : > { %v299_v2 = vld [vmem:[%s11540_s21 + $0x4] sm:$0xf]  ;;  %v349_v3 = vld [vmem:[%s11540_s21] sm:$0x8]  ;;  %v11545_v4 = vld [vmem:[%s11540_s21 + $0x8] sm:$0xff]   ;;  %s15289_s9 = scalar_lea.vmem %s15368_s6, %s11107_s23  ;;  %s15316_s20 = scalar_lea.hbm %s15369_s7, %s11162_s16 }
  0x1d   : > { %v11547_v5 = vcombine.low %v349_v3, %v299_v2  ;;  %v11550_v6 = vld [vmem:[%s11540_s21 + $0x10] sm:$0xff]   ;;  %v478_v7 = vrot.slane %v11545_v4, 3  ;;  %v11554_v8 = vld [vmem:[%s11540_s21 + $0x18] sm:$0xff]   ;;  %v11565_v13 = vld [vmem:[%s11540_s21 + $0x20] sm:$0xff]   ;;  %v843_v42 = vshrl.u32 %v11545_v4, 16  ;;  %v846_v43 = vshll.u32 %v11545_v4, 16 }
  0x1e   : > { %v480_v10 = vrot.slane %v11550_v6, 3  ;;  %v482_v12 = vrot.slane %v11554_v8, 3  ;;  %v11570_v16 = vld [vmem:[%s11540_s21 + $0x28] sm:$0xff]   ;;  %v484_v18 = vrot.slane %v11565_v13, 3  ;;  %v298_v20 = vld [vmem:[%s11540_s21] sm:$0xc] }
  0x1f   : > { %v477_v9 = vrot.slane %v11547_v5, 3  ;;  %v486_v19 = vrot.slane %v11570_v16, 3  ;;  %v11582_v22 = vld [vmem:[%s11540_s21 + $0x30] sm:$0xff]   ;;  %v11586_v24 = vld [vmem:[%s11540_s21 + $0x38] sm:$0xff]   ;;  %v9145_v25 = vcombine.low %v298_v20, %v299_v2  ;;  %v11593_v28 = vld [vmem:[%s11540_s21 + $0x40] sm:$0xff]   ;;  %v852_v46 = vshrl.u32 %v11550_v6, 16 }
  0x20   : > { %v481_v15 = vsel %vm476_vm0, %v478_v7, %v480_v10  ;;  %v483_v17 = vsel %vm476_vm0, %v480_v10, %v482_v12  ;;  %v485_v21 = vsel %vm476_vm0, %v482_v12, %v484_v18  ;;  %v488_v26 = vrot.slane %v11582_v22, 3  ;;  %v11596_v29 = vld [vmem:[%s11540_s21 + $0x48] sm:$0xff]   ;;  %v11599_v30 = vld [vmem:[%s11540_s21 + $0x50] sm:$0xff]   ;;  %v11603_v33 = vld [vmem:[%s11540_s21 + $0x58] sm:$0xff]   ;;  %s15302_s14 = scalar_lea.vmem [#allocation3], %s11105_s13  ;;  %s11372_s23 = sshll.u32 %s11435_s22, 4  ;;  %s11373_s23 = int_to_ptr.vmem [resolvable:$false] %s11372_s23 }
  0x21   : > { %v479_v14 = vsel %vm476_vm0, %v477_v9, %v478_v7  ;;  %v487_v23 = vsel %vm476_vm0, %v484_v18, %v486_v19  ;;  %v490_v27 = vrot.slane %v11586_v24, 3  ;;  %v835_v31 = vshrl.u32 %v9145_v25, 16  ;;  %v11609_v37 = vld [vmem:[%s11540_s21 + $0x60] sm:$0xff]   ;;  %s9013_s17 = sshll.u32 %s15302_s14, 4  ;;  %s11374_s29 = scalar_lea.vmem %s11373_s23, 768  ;;  %s15310_s17 = int_to_ptr.vmem [resolvable:$true] %s9013_s17 }
  0x22   : > { %9987 = vmatprep.mubr.msk.bf16.mxu0 %vm532_vm1, %v479_v14  ;;  %v489_v32 = vsel %vm476_vm0, %v486_v19, %v488_v26  ;;  %v492_v35 = vrot.slane %v11593_v28, 3  ;;  %v494_v36 = vrot.slane %v11596_v29, 3  ;;  %v496_v38 = vrot.slane %v11599_v30, 3  ;;  %s11368_s28 = scalar_lea.vmem %s15310_s17, 384  ;;  %p11375_p0 = scmp.lt.s32.totalorder %s15310_s17, %s11373_s23 }
  0x23   : > { %9988 = vmatmul.mubr.msk.bf16.vlgmr.msra.gmra.mrb[0].mxu0 %vm532_vm1, %v481_v15  ;;  %v491_v34 = vsel %vm476_vm0, %v488_v26, %v490_v27  ;;  %v837_v39 = vrot.slane %v835_v31, 2  ;;  %v838_v40 = vshll.u32 %v9145_v25, 16  ;;  %v498_v41 = vrot.slane %v11603_v33, 3  ;;  %p11369_p11 = scmp.ne.s32.totalorder %s15310_s17, %s11368_s28  ;;  %p11376_p1 = scmp.lt.s32.totalorder %s11374_s29, %s11368_s28 }
  0x24   : > { %10036 = vmatpush3.bf16.msra.mxu0 %v11213_v1  ;;  %9991 = vmatprep.mubr.msk.bf16.mxu0 %vm532_vm1, %v483_v17  ;;  %v493_v44 = vsel %vm476_vm0, %v490_v27, %v492_v35  ;;  %v495_v47 = vsel %vm476_vm0, %v492_v35, %v494_v36  ;;  %v500_v48 = vrot.slane %v11609_v37, 3  ;;  %v845_v49 = vrot.slane %v843_v42, 2 }
  0x25   : > { %10085 = vmatprep.subr.bf16.mxu0 %v11561_v11  ;;  %v840_v45 = vrot.slane %v838_v40, 3  ;;  %v848_v50 = vrot.slane %v846_v43, 3  ;;  %v497_v51 = vsel %vm476_vm0, %v494_v36, %v496_v38  ;;  %v854_v53 = vrot.slane %v852_v46, 2  ;;  %p11370_p12 = pnand %p11369_p11, %p11516_p5  ;;  %p11377_p2 = por %p11376_p1, %p11375_p0 }
  0x26   : > { %v855_v54 = vshll.u32 %v11550_v6, 16  ;;  %v499_v55 = vsel %vm476_vm0, %v496_v38, %v498_v41  ;;  %v861_v57 = vshrl.u32 %v11554_v8, 16  ;;  %v864_v58 = vshll.u32 %v11554_v8, 16 }
  0x27   : > { %v841_v52 = vor.u32 %v840_v45, %v837_v39  ;;  %v849_v56 = vor.u32 %v848_v50, %v845_v49  ;;  %v870_v60 = vshrl.u32 %v11565_v13, 16  ;;  %v873_v61 = vshll.u32 %v11565_v13, 16  ;;  %p11371_p13 = pneg %p11370_p12 }
  0x28   : > { %v857_v59 = vrot.slane %v855_v54, 3  ;;  %v15385_v62 = vshrl.u32 %v11570_v16, 16  ;;  %v863_v0 = vrot.slane %v861_v57, 2  ;;  %v866_v1 = vrot.slane %v864_v58, 3 }
  0x29   : > { %v11640_v63 = vsel %vm833_vm2, %v841_v52, %v849_v56  ;;  %v15384_v2 = vshll.u32 %v11570_v16, 16  ;;  %v872_v7 = vrot.slane %v870_v60, 2  ;;  %v875_v9 = vrot.slane %v873_v61, 3  ;;  %p11378_p3 = pnand %p11377_p2, %p11371_p13 }
  0x2a   : > { %v858_v3 = vor.u32 %v857_v59, %v854_v53  ;;  %v881_v10 = vrot.slane %v15385_v62, 2  ;;  %v867_v12 = vor.u32 %v866_v1, %v863_v0  ;;  %v15383_v15 = vshrl.u32 %v11582_v22, 16 }
  0x2b   : > { %9992 = vmatmul.mubr.msk.bf16.gmra.mrb[4].mxu0 %vm532_vm1, %v485_v21  ;;  %v884_v14 = vrot.slane %v15384_v2, 3  ;;  %v15382_v17 = vshll.u32 %v11582_v22, 16  ;;  %v876_v19 = vor.u32 %v875_v9, %v872_v7  ;;  %v15381_v20 = vshrl.u32 %v11586_v24, 16 }
  0x2c   : > { %9995 = vmatprep.mubr.msk.bf16.mxu0 %vm532_vm1, %v487_v23  ;;  %v11660_v18 = vsel %vm833_vm2, %v849_v56, %v858_v3  ;;  %v15380_v21 = vshll.u32 %v11586_v24, 16  ;;  %v11665_v23 = vsel %vm833_vm2, %v858_v3, %v867_v12  ;;  %v890_v26 = vrot.slane %v15383_v15, 2 }
  0x2d   : > { %v885_v25 = vor.u32 %v884_v14, %v881_v10  ;;  %v893_v27 = vrot.slane %v15382_v17, 3  ;;  %v11672_v31 = vsel %vm833_vm2, %v867_v12, %v876_v19  ;;  %v15379_v35 = vshrl.u32 %v11593_v28, 16 }
  0x2e   : > { %v15378_v39 = vshll.u32 %v11593_v28, 16  ;;  %v15377_v40 = vshrl.u32 %v11596_v29, 16  ;;  %v15376_v49 = vshll.u32 %v11596_v29, 16  ;;  %v15375_v50 = vshrl.u32 %v11599_v30, 16 }
  0x2f   : > { %v11680_v36 = vsel %vm833_vm2, %v876_v19, %v885_v25  ;;  %v894_v38 = vor.u32 %v893_v27, %v890_v26  ;;  %v15374_v59 = vshll.u32 %v11599_v30, 16  ;;  %v15373_v7 = vshrl.u32 %v11603_v33, 16 }
  0x30   : > { %v911_v53 = vrot.slane %v15378_v39, 3  ;;  %v917_v56 = vrot.slane %v15377_v40, 2  ;;  %v920_v1 = vrot.slane %v15376_v49, 3  ;;  %v926_v3 = vrot.slane %v15375_v50, 2 }
  0x31   : > { %v11692_v52 = vsel %vm833_vm2, %v885_v25, %v894_v38  ;;  %v929_v10 = vrot.slane %v15374_v59, 3  ;;  %v15371_v12 = vshrl.u32 %v11609_v37, 16  ;;  %v935_v25 = vrot.slane %v15373_v7, 2  ;;  %v11790_v59 = vld [vmem:[%s11540_s21 + $0xb8] sm:$0xff]  }
  0x32   : > { %v921_v19 = vor.u32 %v920_v1, %v917_v56  ;;  %v15370_v26 = vshll.u32 %v11609_v37, 16  ;;  %v1370_v40 = vshrl.u32 %v11547_v5, 16  ;;  %v1373_v39 = vshll.u32 %v11547_v5, 16 }
  0x33   : > { %9996 = vmatmul.mubr.msk.bf16.gmra.mrb[8].mxu0 %vm532_vm1, %v489_v32  ;;  %v899_v32 = vrot.slane %v15381_v20, 2  ;;  %v930_v27 = vor.u32 %v929_v10, %v926_v3  ;;  %v1382_v5 = vrot.slane %v855_v54, 4  ;;  %v1385_v6 = vrot.slane %v861_v57, 3 }
  0x34   : > { %9999 = vmatprep.mubr.msk.bf16.mxu0 %vm532_vm1, %v491_v34  ;;  %v902_v34 = vrot.slane %v15380_v21, 3  ;;  %v1381_v21 = vrot.slane %v852_v46, 3  ;;  %v1372_v20 = vrot.slane %v1370_v40, 3  ;;  %v1375_v17 = vrot.slane %v1373_v39, 4 }
  0x35   : > { %v11738_v56 = vsel %vm833_vm2, %v921_v19, %v930_v27  ;;  %v1386_v46 = vrot.slane %v864_v58, 4  ;;  %v1389_v54 = vrot.slane %v870_v60, 3  ;;  %v15514_v57 = vshrl.u32 %v11570_v16, 16 }
  0x36   : > { %v903_v45 = vor.u32 %v902_v34, %v899_v32  ;;  %v944_v34 = vrot.slane %v15371_v12, 2  ;;  %v11781_v12 = vld [vmem:[%s11540_s21 + $0xa8] sm:$0xff]   ;;  %v1383_v2 = vor.u32 %v1382_v5, %v1381_v21  ;;  %v15515_v13 = vshll.u32 %v11570_v16, 16 }
  0x37   : > { %v518_v49 = vrot.slane %v11781_v12, 3  ;;  %v1393_v58 = vrot.slane %v15514_v57, 3  ;;  %v15522_v57 = vshrl.u32 %v11596_v29, 16 }
  0x38   : > { %v11701_v0 = vsel %vm833_vm2, %v894_v38, %v903_v45  ;;  %v1394_v60 = vrot.slane %v15515_v13, 4  ;;  %v15523_v13 = vshll.u32 %v11596_v29, 16  ;;  %v11894_v29 = vld [vmem:[%s15363_s1 + $0x18] sm:$0xff]  }
  0x3b   : > { %10000 = vmatmul.mubr.msk.bf16.gmra.mrb[12].mxu0 %vm532_vm1, %v493_v44  ;;  %v11685_v44 = vld [vmem:[%s11540_s21 + $0x68] sm:$0xff]  }
  0x3c   : > { %10003 = vmatprep.mubr.msk.bf16.mxu0 %vm532_vm1, %v495_v47  ;;  %v908_v47 = vrot.slane %v15379_v35, 2  ;;  %v502_v14 = vrot.slane %v11685_v44, 3  ;;  %v1377_v35 = vrot.slane %v843_v42, 3 }
  0x3e   : > { %v912_v9 = vor.u32 %v911_v53, %v908_v47  ;;  %v947_v47 = vrot.slane %v15370_v26, 3  ;;  %v11735_v53 = vld [vmem:[%s11540_s21 + $0x70] sm:$0xff]   ;;  %v503_v3 = vsel %vm476_vm0, %v500_v48, %v502_v14 }
  0x40   : > { %v11725_v38 = vsel %vm833_vm2, %v912_v9, %v921_v19  ;;  %v11746_v10 = vor.u32 %v947_v47, %v944_v34  ;;  %v11765_v34 = vld [vmem:[%s11540_s21 + $0x88] sm:$0xff]   ;;  %v11769_v47 = vld [vmem:[%s11540_s21 + $0x90] sm:$0xff]  }
  0x43   : > { %10004 = vmatmul.mubr.msk.bf16.gmra.mrb[16].mxu0 %vm532_vm1, %v497_v51  ;;  %v15372_v51 = vshll.u32 %v11603_v33, 16 }
  0x44   : > { %10007 = vmatprep.mubr.msk.bf16.mxu0 %vm532_vm1, %v499_v55  ;;  %v11718_v55 = vsel %vm833_vm2, %v903_v45, %v912_v9  ;;  %v501_v45 = vsel %vm476_vm0, %v498_v41, %v500_v48  ;;  %v11744_v9 = vld [vmem:[%s11540_s21 + $0x78] sm:$0xff]   ;;  %v504_v48 = vrot.slane %v11735_v53, 3 }
  0x45   : > { %v938_v32 = vrot.slane %v15372_v51, 3  ;;  %v506_v19 = vrot.slane %v11744_v9, 3  ;;  %v11785_v51 = vld [vmem:[%s11540_s21 + $0xb0] sm:$0xff]  }
  0x47   : > { %v939_v1 = vor.u32 %v938_v32, %v935_v25  ;;  %v505_v25 = vsel %vm476_vm0, %v502_v14, %v504_v48  ;;  %v507_v32 = vsel %vm476_vm0, %v504_v48, %v506_v19  ;;  %v11778_v14 = vld [vmem:[%s11540_s21 + $0xa0] sm:$0xff]   ;;  %v512_v48 = vrot.slane %v11769_v47, 3 }
  0x48   : > { %v516_v50 = vrot.slane %v11778_v14, 3 }
  0x49   : > { %v11749_v26 = vsel %vm833_vm2, %v930_v27, %v939_v1  ;;  %v11754_v41 = vsel %vm833_vm2, %v939_v1, %v11746_v10  ;;  %v11761_v27 = vld [vmem:[%s11540_s21 + $0x80] sm:$0xff]   ;;  %v11774_v1 = vld [vmem:[%s11540_s21 + $0x98] sm:$0xff]  }
  0x4a   : > { %v514_v7 = vrot.slane %v11774_v1, 3  ;;  %v519_v8 = vsel %vm476_vm0, %v516_v50, %v518_v49 }
  0x4b   : > { %10008 = vmatmul.mubr.msk.bf16.gmra.mrb[20].mxu0 %vm532_vm1, %v501_v45  ;;  %v508_v45 = vrot.slane %v11761_v27, 3 }
  0x4c   : > { %10011 = vmatprep.mubr.msk.bf16.mxu0 %vm532_vm1, %v503_v3  ;;  %v510_v3 = vrot.slane %v11765_v34, 3  ;;  %v515_v42 = vsel %vm476_vm0, %v512_v48, %v514_v7  ;;  %v517_v21 = vsel %vm476_vm0, %v514_v7, %v516_v50  ;;  %v1395_v7 = vor.u32 %v1394_v60, %v1393_v58 }
  0x4d   : > { %v1409_v58 = vrot.slane %v15522_v57, 3  ;;  %v1410_v60 = vrot.slane %v15523_v13, 4 }
  0x4e   : > { %v513_v62 = vsel %vm476_vm0, %v510_v3, %v512_v48 }
  0x53   : > { %10012 = vmatmul.mubr.msk.bf16.gmra.mrb[24].mxu0 %vm532_vm1, %v505_v25  ;;  %v509_v25 = vsel %vm476_vm0, %v506_v19, %v508_v45  ;;  %v520_v19 = vrot.slane %v11785_v51, 3 }
  0x54   : > { %10015 = vmatprep.mubr.msk.bf16.mxu0 %vm532_vm1, %v507_v32  ;;  %v511_v32 = vsel %vm476_vm0, %v508_v45, %v510_v3  ;;  %v1378_v45 = vrot.slane %v846_v43, 4  ;;  %v11846_v3 = vld [vmem:[%s11540_s21 + $0xc0] ss:$0 sps:$4 sm:$0x77]  }
  0x56   : > { %v1379_v15 = vor.u32 %v1378_v45, %v1377_v35  ;;  %v521_v45 = vsel %vm476_vm0, %v518_v49, %v520_v19 }
  0x58   : > { %v11815_v43 = vsel %vm1368_vm3, %v1379_v15, %v1383_v2 }
  0x5b   : > { %10016 = vmatmul.mubr.msk.bf16.gmra.mrb[28].mxu0 %vm532_vm1, %v509_v25  ;;  %v522_v25 = vrot.slane %v11790_v59, 3 }
  0x5c   : > { %10019 = vmatprep.mubr.msk.bf16.mxu0 %vm532_vm1, %v511_v32  ;;  %v1376_v32 = vor.u32 %v1375_v17, %v1372_v20  ;;  %v1390_v17 = vrot.slane %v873_v61, 4  ;;  %v1387_v20 = vor.u32 %v1386_v46, %v1385_v6  ;;  %v15516_v61 = vshrl.u32 %v11582_v22, 16 }
  0x5d   : > { %v523_v5 = vsel %vm476_vm0, %v520_v19, %v522_v25  ;;  %v524_v46 = vrot.slane %v11846_v3, 3 }
  0x5e   : > { %v11812_v4 = vsel %vm1368_vm3, %v1376_v32, %v1379_v15  ;;  %v1391_v15 = vor.u32 %v1390_v17, %v1389_v54  ;;  %v1397_v39 = vrot.slane %v15516_v61, 3  ;;  %v15518_v32 = vshrl.u32 %v11586_v24, 16 }
  0x5f   : > { %v15520_v54 = vshrl.u32 %v11593_v28, 16  ;;  %v15521_v17 = vshll.u32 %v11593_v28, 16  ;;  %v15524_v28 = vshrl.u32 %v11599_v30, 16 }
  0x60   : > { %v11832_v35 = vsel %vm1368_vm3, %v1387_v20, %v1391_v15  ;;  %v11849_v48 = vsel %vm1368_vm3, %v1391_v15, %v1395_v7 }
  0x61   : > { %v1405_v49 = vrot.slane %v15520_v54, 3  ;;  %v1413_v61 = vrot.slane %v15524_v28, 3 }
  0x63   : > { %10020 = vmatmul.mubr.msk.bf16.gmra.mrb[32].mxu0 %vm532_vm1, %v513_v62  ;;  %v11829_v62 = vsel %vm1368_vm3, %v1383_v2, %v1387_v20  ;;  %v15517_v2 = vshll.u32 %v11582_v22, 16  ;;  %v1401_v22 = vrot.slane %v15518_v32, 3  ;;  %v1406_v20 = vrot.slane %v15521_v17, 4 }
  0x64   : > { %10023 = vmatprep.mubr.msk.bf16.mxu0 %vm532_vm1, %v515_v42  ;;  %v15519_v42 = vshll.u32 %v11586_v24, 16  ;;  %v15528_v32 = vshrl.u32 %v11609_v37, 16 }
  0x65   : > { %v1398_v40 = vrot.slane %v15517_v2, 4  ;;  %v1407_v19 = vor.u32 %v1406_v20, %v1405_v49  ;;  %v1411_v2 = vor.u32 %v1410_v60, %v1409_v58  ;;  %v987_v58 = vshrl.u32 %v11765_v34, 16 }
  0x66   : > { %v1402_v6 = vrot.slane %v15519_v42, 4  ;;  %v15529_v42 = vshll.u32 %v11609_v37, 16  ;;  %v954_v37 = vshll.u32 %v11685_v44, 16 }
  0x67   : > { %v1399_v50 = vor.u32 %v1398_v40, %v1397_v39  ;;  %v15525_v39 = vshll.u32 %v11599_v30, 16 }
  0x68   : > { %v1403_v15 = vor.u32 %v1402_v6, %v1401_v22  ;;  %v1421_v22 = vrot.slane %v15528_v32, 3  ;;  %v1422_v6 = vrot.slane %v15529_v42, 4 }
  0x69   : > { %v11853_v16 = vsel %vm1368_vm3, %v1395_v7, %v1399_v50  ;;  %v11886_v7 = vsel %vm1368_vm3, %v1407_v19, %v1411_v2 }
  0x6a   : > { %v11872_v24 = vsel %vm1368_vm3, %v1403_v15, %v1407_v19  ;;  %v978_v19 = vshrl.u32 %v11761_v27, 16 }
  0x6b   : > { %10024 = vmatmul.mubr.msk.bf16.gmra.mrb[36].mxu0 %vm532_vm1, %v517_v21  ;;  %v11868_v21 = vsel %vm1368_vm3, %v1399_v50, %v1403_v15 }
  0x6c   : > { %10027 = vmatprep.mubr.msk.bf16.mxu0 %vm532_vm1, %v519_v8  ;;  %v525_v8 = vsel %vm476_vm0, %v522_v25, %v524_v46  ;;  %v1414_v25 = vrot.slane %v15525_v39, 4  ;;  %v11910_v46 = vor.u32 %v1422_v6, %v1421_v22  ;;  %v980_v60 = vrot.slane %v978_v19, 2 }
  0x6e   : > { %v1415_v40 = vor.u32 %v1414_v25, %v1413_v61  ;;  %v989_v61 = vrot.slane %v987_v58, 2 }
  0x70   : > { %v11889_v50 = vsel %vm1368_vm3, %v1411_v2, %v1415_v40  ;;  %v996_v2 = vshrl.u32 %v11769_v47, 16 }
  0x72   : > { %v998_v32 = vrot.slane %v996_v2, 2 }
  0x73   : > { %10028 = vmatmul.mubr.msk.bf16.gmra.mrb[40].mxu0 %vm532_vm1, %v521_v45  ;;  %v15527_v45 = vshll.u32 %v11603_v33, 16 }
  0x74   : > { %10031 = vmatprep.mubr.msk.bf16.mxu0 %vm532_vm1, %v523_v5 }
  0x75   : > { %v1418_v5 = vrot.slane %v15527_v45, 4  ;;  %v1008_v45 = vshll.u32 %v11774_v1, 16 }
  0x7b   : > { %10032 = vmatmul.mubr.msk.bf16.gmra.mrb[44].mxu0 %vm532_vm1, %v525_v8  ;;  %v981_v8 = vshll.u32 %v11761_v27, 16  ;;  %v1445_v27 = vrot.slane %v996_v2, 3 }
  0x7c   : > { %10037 = vmatprep.mubr.msk.bf16.mxu0 %vm532_vm1, %v11640_v63  ;;  %v15526_v63 = vshrl.u32 %v11603_v33, 16  ;;  %v951_v33 = vshrl.u32 %v11685_v44, 16 }
  0x7e   : > { %v1417_v30 = vrot.slane %v15526_v63, 3 }
  0x83   : > { %10038 = vmatmul.mubr.msk.bf16.vlgmr.msra.gmra.mrb[0].mxu0 %vm532_vm1, %v11660_v18  ;;  %v1419_v18 = vor.u32 %v1418_v5, %v1417_v30  ;;  %v1005_v30 = vshrl.u32 %v11774_v1, 16 }
  0x84   : > { %10086 = vmatpush3.bf16.msra.mxu0 %v11561_v11  ;;  %10041 = vmatprep.mubr.msk.bf16.mxu0 %vm532_vm1, %v11665_v23  ;;  %v953_v23 = vrot.slane %v951_v33, 2 }
  0x85   : > { %10135 = vmatprep.subr.bf16.mxu0 %v11894_v29  ;;  %v11913_v54 = vsel %vm1368_vm3, %v1415_v40, %v1419_v18  ;;  %v11917_v11 = vsel %vm1368_vm3, %v1419_v18, %v11910_v46  ;;  %v999_v40 = vshll.u32 %v11769_v47, 16  ;;  %v1007_v6 = vrot.slane %v1005_v30, 2 }
  0x86   : > { %v1010_v18 = vrot.slane %v1008_v45, 3 }
  0x87   : > { %v1001_v22 = vrot.slane %v999_v40, 3 }
  0x8b   : > { %10042 = vmatmul.mubr.msk.bf16.gmra.mrb[4].mxu0 %vm532_vm1, %v11672_v31  ;;  %v956_v31 = vrot.slane %v954_v37, 3 }
  0x8c   : > { %10045 = vmatprep.mubr.msk.bf16.mxu0 %vm532_vm1, %v11680_v36  ;;  %v960_v36 = vshrl.u32 %v11735_v53, 16 }
  0x8e   : > { %v962_v49 = vrot.slane %v960_v36, 2 }
  0x93   : > { %10046 = vmatmul.mubr.msk.bf16.gmra.mrb[8].mxu0 %vm532_vm1, %v11692_v52  ;;  %v963_v52 = vshll.u32 %v11735_v53, 16  ;;  %v1437_v53 = vrot.slane %v978_v19, 3 }
  0x94   : > { %10049 = vmatprep.mubr.msk.bf16.mxu0 %vm532_vm1, %v11701_v0  ;;  %v957_v0 = vor.u32 %v956_v31, %v953_v23  ;;  %v11990_v23 = vld [vmem:[%s11540_s21 + $0x14] sm:$0xf]  ;;  %v11993_v31 = vld [vmem:[%s11540_s21 + $0x18] sm:$0xf] }
  0x95   : > { %v965_v17 = vrot.slane %v963_v52, 3 }
  0x97   : > { %v966_v15 = vor.u32 %v965_v17, %v962_v49  ;;  %v1014_v49 = vshrl.u32 %v11778_v14, 16  ;;  %v1017_v17 = vshll.u32 %v11778_v14, 16 }
  0x99   : > { %v967_v13 = vsel %vm833_vm2, %v957_v0, %v966_v15 }
  0x9b   : > { %10050 = vmatmul.mubr.msk.bf16.gmra.mrb[12].mxu0 %vm532_vm1, %v11718_v55  ;;  %v969_v55 = vshrl.u32 %v11744_v9, 16 }
  0x9c   : > { %10053 = vmatprep.mubr.msk.bf16.mxu0 %vm532_vm1, %v11725_v38  ;;  %v972_v38 = vshll.u32 %v11744_v9, 16  ;;  %v1441_v9 = vrot.slane %v987_v58, 3  ;;  %v1454_v58 = vrot.slane %v1017_v17, 4 }
  0x9d   : > { %v1433_v44 = vrot.slane %v969_v55, 3 }
  0x9e   : > { %v974_v20 = vrot.slane %v972_v38, 3 }
  0xa3   : > { %10054 = vmatmul.mubr.msk.bf16.gmra.mrb[16].mxu0 %vm532_vm1, %v11738_v56  ;;  %v958_v56 = vsel %vm833_vm2, %v11746_v10, %v957_v0  ;;  %v990_v10 = vshll.u32 %v11765_v34, 16  ;;  %v1002_v0 = vor.u32 %v1001_v22, %v998_v32  ;;  %v1041_v32 = vshrl.u32 %v11790_v59, 16 }
  0xa4   : > { %10057 = vmatprep.mubr.msk.bf16.mxu0 %vm532_vm1, %v11749_v26  ;;  %v971_v26 = vrot.slane %v969_v55, 2  ;;  %v15387_v22 = vshll.u32 %v11790_v59, 16  ;;  %v1449_v34 = vrot.slane %v1005_v30, 3  ;;  %v1450_v55 = vrot.slane %v1008_v45, 4  ;;  %v1829_v45 = vld [vmem:[%s11540_s21 + $0x8] sm:$0x8] }
  0xa5   : > { %v992_v39 = vrot.slane %v990_v10, 3 }
  0xa6   : > { %v975_v57 = vor.u32 %v974_v20, %v971_v26  ;;  %v1011_v26 = vor.u32 %v1010_v18, %v1007_v6  ;;  %v1023_v20 = vshrl.u32 %v11781_v12, 16  ;;  %v1451_v19 = vor.u32 %v1450_v55, %v1449_v34 }
  0xa7   : > { %v993_v63 = vor.u32 %v992_v39, %v989_v61 }
  0xa8   : > { %v976_v28 = vsel %vm833_vm2, %v966_v15, %v975_v57  ;;  %v1026_v15 = vshll.u32 %v11781_v12, 16  ;;  %v11239_v12 = vld [vmem:[%s11540_s21 + $0xc0] ss:$0 sps:$4 sm:$0xff]  }
  0xaa   : > { %v1028_v61 = vrot.slane %v1026_v15, 3  ;;  %v1458_v2 = vrot.slane %v1026_v15, 4 }
  0xab   : > { %10058 = vmatmul.mubr.msk.bf16.gmra.mrb[20].mxu0 %vm532_vm1, %v11754_v41  ;;  %v983_v41 = vrot.slane %v981_v8, 3 }
  0xac   : > { %10061 = vmatprep.mubr.msk.bf16.mxu0 %vm532_vm1, %v958_v56 }
  0xad   : > { %v984_v25 = vor.u32 %v983_v41, %v980_v60  ;;  %v1019_v60 = vrot.slane %v1017_v17, 3  ;;  %v1012_v41 = vsel %vm833_vm2, %v1002_v0, %v1011_v26  ;;  %v15530_v17 = vshll.u32 %v11785_v51, 16 }
  0xaf   : > { %v985_v5 = vsel %vm833_vm2, %v975_v57, %v984_v25  ;;  %v994_v42 = vsel %vm833_vm2, %v984_v25, %v993_v63  ;;  %v1003_v57 = vsel %vm833_vm2, %v993_v63, %v1002_v0  ;;  %v1032_v25 = vshrl.u32 %v11785_v51, 16 }
  0xb0   : > { %v15386_v63 = vshll.u32 %v11785_v51, 16 }
  0xb1   : > { %v1034_v6 = vrot.slane %v1032_v25, 2  ;;  %v1461_v14 = vrot.slane %v1032_v25, 3 }
  0xb2   : > { %v1037_v18 = vrot.slane %v15386_v63, 3 }
  0xb3   : > { %10062 = vmatmul.mubr.msk.bf16.gmra.mrb[24].mxu0 %vm532_vm1, %v967_v13  ;;  %v1016_v13 = vrot.slane %v1014_v49, 2 }
  0xb4   : > { %10065 = vmatprep.mubr.msk.bf16.mxu0 %vm532_vm1, %v976_v28  ;;  %v1025_v28 = vrot.slane %v1023_v20, 2 }
  0xb5   : > { %v1020_v39 = vor.u32 %v1019_v60, %v1016_v13  ;;  %v1046_v13 = vrot.slane %v15387_v22, 3  ;;  %v1038_v60 = vor.u32 %v1037_v18, %v1034_v6 }
  0xbb   : > { %10066 = vmatmul.mubr.msk.bf16.gmra.mrb[28].mxu0 %vm532_vm1, %v985_v5  ;;  %v1029_v5 = vor.u32 %v1028_v61, %v1025_v28 }
  0xbc   : > { %10069 = vmatprep.mubr.msk.bf16.mxu0 %vm532_vm1, %v994_v42  ;;  %v1021_v42 = vsel %vm833_vm2, %v1011_v26, %v1020_v39  ;;  %v1050_v26 = vshrl.u32 %v11846_v3, 16 }
  0xbd   : > { %v1030_v0 = vsel %vm833_vm2, %v1020_v39, %v1029_v5  ;;  %v1039_v61 = vsel %vm833_vm2, %v1029_v5, %v1038_v60  ;;  %v15531_v5 = vshll.u32 %v11790_v59, 16  ;;  %v12144_v59 = vld [vmem:[%s11540_s21 + $0x1c] sm:$0xf] }
  0xbe   : > { %v1052_v56 = vrot.slane %v1050_v26, 2 }
  0xc3   : > { %10070 = vmatmul.mubr.msk.bf16.gmra.mrb[32].mxu0 %vm532_vm1, %v1003_v57  ;;  %v1043_v57 = vrot.slane %v1041_v32, 2 }
  0xc4   : > { %10073 = vmatprep.mubr.msk.bf16.mxu0 %vm532_vm1, %v1012_v41  ;;  %v1053_v41 = vshll.u32 %v11846_v3, 16  ;;  %v12043_v3 = vld [vmem:[%s15363_s1 + $0x20] sm:$0xff]  }
  0xc5   : > { %v1047_v28 = vor.u32 %v1046_v13, %v1043_v57 }
  0xc6   : > { %v1055_v39 = vrot.slane %v1053_v41, 3 }
  0xc7   : > { %v1048_v63 = vsel %vm833_vm2, %v1038_v60, %v1047_v28 }
  0xc8   : > { %v1056_v22 = vor.u32 %v1055_v39, %v1052_v56  ;;  %v12122_v56 = vld [vmem:[%s11540_s21 + $0xc] sm:$0xf] }
  0xc9   : > { %v9201_v6 = vcombine.low %v1829_v45, %v12122_v56  ;;  %v12184_v45 = vld [vmem:[%s11540_s21 + $0x3c] sm:$0xf] }
  0xcb   : > { %10074 = vmatmul.mubr.msk.bf16.gmra.mrb[36].mxu0 %vm532_vm1, %v1021_v42  ;;  %v1057_v42 = vsel %vm833_vm2, %v1047_v28, %v1056_v22  ;;  %v1466_v22 = vrot.slane %v15531_v5, 4  ;;  %v2005_v13 = vshrl.u32 %v9201_v6, 16  ;;  %v2008_v60 = vshll.u32 %v9201_v6, 16  ;;  %v12147_v28 = vld [vmem:[%s11540_s21 + $0x20] sm:$0xf] }
  0xcc   : > { %10077 = vmatprep.mubr.msk.bf16.mxu0 %vm532_vm1, %v1030_v0  ;;  %v1470_v0 = vshrl.u32 %v11239_v12, 16 }
  0xd3   : > { %10078 = vmatmul.mubr.msk.bf16.gmra.mrb[40].mxu0 %vm532_vm1, %v1039_v61  ;;  %v12150_v61 = vld [vmem:[%s11540_s21 + $0x24] sm:$0xf] }
  0xd4   : > { %10081 = vmatprep.mubr.msk.bf16.mxu0 %vm532_vm1, %v1048_v63  ;;  %v1465_v63 = vrot.slane %v1041_v32, 3  ;;  %v1473_v32 = vshll.u32 %v11239_v12, 16 }
  0xd6   : > { %v1467_v57 = vor.u32 %v1466_v22, %v1465_v63 }
  0xdb   : > { %10082 = vmatmul.mubr.msk.bf16.gmra.mrb[44].mxu0 %vm532_vm1, %v1057_v42  ;;  %v1472_v42 = vrot.slane %v1470_v0, 3 }
  0xdc   : > { %10087 = vmatprep.mubr.msk.bf16.mxu0 %vm532_vm1, %v11812_v4  ;;  %v1425_v4 = vrot.slane %v951_v33, 3 }
  0xe3   : > { %10088 = vmatmul.mubr.msk.bf16.vlgmr.msra.gmra.mrb[0].mxu0 %vm532_vm1, %v11815_v43  ;;  %v1426_v43 = vrot.slane %v954_v37, 4 }
  0xe4   : > { %10136 = vmatpush3.bf16.msra.mxu0 %v11894_v29  ;;  %10091 = vmatprep.mubr.msk.bf16.mxu0 %vm532_vm1, %v11829_v62  ;;  %v1438_v29 = vrot.slane %v981_v8, 4  ;;  %v1453_v8 = vrot.slane %v1014_v49, 3  ;;  %v12125_v49 = vld [vmem:[%s11540_s21 + $0x10] sm:$0xf] }
  0xe5   : > { %10185 = vmatprep.subr.bf16.mxu0 %v12043_v3  ;;  %v1427_v62 = vor.u32 %v1426_v43, %v1425_v4  ;;  %v9202_v51 = vcombine.low %v12125_v49, %v11990_v23  ;;  %v1475_v43 = vrot.slane %v1473_v32, 4 }
  0xe7   : > { %v2013_v26 = vshrl.u32 %v9202_v51, 16  ;;  %v2016_v41 = vshll.u32 %v9202_v51, 16  ;;  %v12201_v51 = vld [vmem:[%s15363_s1 + $0x28] sm:$0xff]  }
  0xeb   : > { %10092 = vmatmul.mubr.msk.bf16.gmra.mrb[4].mxu0 %vm532_vm1, %v11832_v35  ;;  %v1429_v35 = vrot.slane %v960_v36, 3  ;;  %v1446_v36 = vrot.slane %v999_v40, 4  ;;  %v1455_v40 = vor.u32 %v1454_v58, %v1453_v8 }
  0xec   : > { %10095 = vmatprep.mubr.msk.bf16.mxu0 %vm532_vm1, %v11849_v48  ;;  %v1430_v48 = vrot.slane %v963_v52, 4 }
  0xed   : > { %v1456_v15 = vsel %vm1368_vm3, %v1451_v19, %v1455_v40 }
  0xf3   : > { %10096 = vmatmul.mubr.msk.bf16.gmra.mrb[8].mxu0 %vm532_vm1, %v11853_v16  ;;  %v1428_v16 = vsel %vm1368_vm3, %v11910_v46, %v1427_v62 }
  0xf4   : > { %10099 = vmatprep.mubr.msk.bf16.mxu0 %vm532_vm1, %v11868_v21  ;;  %v1434_v21 = vrot.slane %v972_v38, 4  ;;  %v1447_v38 = vor.u32 %v1446_v36, %v1445_v27 }
  0xf6   : > { %v1452_v1 = vsel %vm1368_vm3, %v1447_v38, %v1451_v19 }
  0xfb   : > { %10100 = vmatmul.mubr.msk.bf16.gmra.mrb[12].mxu0 %vm532_vm1, %v11872_v24  ;;  %v1431_v24 = vor.u32 %v1430_v48, %v1429_v35  ;;  %v2007_v35 = vrot.slane %v2005_v13, 3  ;;  %v2010_v48 = vrot.slane %v2008_v60, 4 }
  0xfc   : > { %10103 = vmatprep.mubr.msk.bf16.mxu0 %vm532_vm1, %v11886_v7  ;;  %v1435_v7 = vor.u32 %v1434_v21, %v1433_v44  ;;  %v2018_v44 = vrot.slane %v2016_v41, 4  ;;  %v9204_v21 = vcombine.low %v12147_v28, %v12150_v61  ;;  %v12210_v41 = vld [vmem:[%s11540_s21 + $0x4c] sm:$0xf] }
  0xfe   : > { %v1436_v46 = vsel %vm1368_vm3, %v1431_v24, %v1435_v7 }
 0x103   : > { %10104 = vmatmul.mubr.msk.bf16.gmra.mrb[16].mxu0 %vm532_vm1, %v11889_v50  ;;  %v1432_v50 = vsel %vm1368_vm3, %v1427_v62, %v1431_v24  ;;  %v9203_v62 = vcombine.low %v11993_v31, %v12144_v59  ;;  %v1476_v24 = vor.u32 %v1475_v43, %v1472_v42  ;;  %v12217_v42 = vld [vmem:[%s11540_s21 + $0x54] sm:$0xf] }
 0x104   : > { %10107 = vmatprep.mubr.msk.bf16.mxu0 %vm532_vm1, %v11913_v54  ;;  %v1442_v54 = vrot.slane %v990_v10, 4  ;;  %v1457_v10 = vrot.slane %v1023_v20, 3  ;;  %v1462_v20 = vrot.slane %v15530_v17, 4  ;;  %v12190_v17 = vld [vmem:[%s11540_s21 + $0x44] sm:$0xf] }
 0x105   : > { %v1477_v27 = vsel %vm1368_vm3, %v1467_v57, %v1476_v24 }
 0x106   : > { %v1443_v33 = vor.u32 %v1442_v54, %v1441_v9  ;;  %v1459_v30 = vor.u32 %v1458_v2, %v1457_v10  ;;  %v1463_v25 = vor.u32 %v1462_v20, %v1461_v14  ;;  %v2034_v9 = vshll.u32 %v9204_v21, 16  ;;  %v12161_v54 = vld [vmem:[%s11540_s21 + $0x28] sm:$0xf]  ;;  %v12187_v14 = vld [vmem:[%s11540_s21 + $0x40] sm:$0xf] }
 0x108   : > { %v1448_v47 = vsel %vm1368_vm3, %v1443_v33, %v1447_v38  ;;  %v1460_v18 = vsel %vm1368_vm3, %v1455_v40, %v1459_v30  ;;  %v1464_v39 = vsel %vm1368_vm3, %v1459_v30, %v1463_v25  ;;  %v1468_v4 = vsel %vm1368_vm3, %v1463_v25, %v1467_v57  ;;  %v12181_v30 = vld [vmem:[%s11540_s21 + $0x38] sm:$0xf] }
 0x109   : > { %v2036_v19 = vrot.slane %v2034_v9, 4  ;;  %v9207_v63 = vcombine.low %v12181_v30, %v12184_v45  ;;  %v12231_v9 = vld [vmem:[%s11540_s21 + $0x5c] sm:$0xf] }
 0x10b   : > { %10108 = vmatmul.mubr.msk.bf16.gmra.mrb[20].mxu0 %vm532_vm1, %v11917_v11  ;;  %v1439_v11 = vor.u32 %v1438_v29, %v1437_v53  ;;  %v2011_v53 = vor.u32 %v2010_v48, %v2007_v35  ;;  %v2058_v0 = vshrl.u32 %v9207_v63, 16  ;;  %v2061_v57 = vshll.u32 %v9207_v63, 16  ;;  %v12251_v63 = vld [vmem:[%s11540_s21 + $0x6c] sm:$0xf] }
 0x10c   : > { %10111 = vmatprep.mubr.msk.bf16.mxu0 %vm532_vm1, %v1428_v16  ;;  %v2015_v16 = vrot.slane %v2013_v26, 3  ;;  %v12207_v26 = vld [vmem:[%s11540_s21 + $0x48] sm:$0xf] }
 0x10d   : > { %v1440_v37 = vsel %vm1368_vm3, %v1435_v7, %v1439_v11  ;;  %v1444_v52 = vsel %vm1368_vm3, %v1439_v11, %v1443_v33  ;;  %v2022_v7 = vshrl.u32 %v9203_v62, 16  ;;  %v12164_v11 = vld [vmem:[%s11540_s21 + $0x2c] sm:$0xf]  ;;  %v12167_v33 = vld [vmem:[%s11540_s21 + $0x30] sm:$0xf]  ;;  %v2063_v43 = vrot.slane %v2061_v57, 4 }
 0x10e   : > { %v2019_v29 = vor.u32 %v2018_v44, %v2015_v16  ;;  %v9205_v34 = vcombine.low %v12161_v54, %v12164_v11 }
 0x10f   : > { %v2024_v36 = vrot.slane %v2022_v7, 3 }
 0x110   : > { %v2020_v55 = vsel %vm1368_vm3, %v2011_v53, %v2019_v29  ;;  %v2040_v58 = vshrl.u32 %v9205_v34, 16 }
 0x112   : > { %v2042_v12 = vrot.slane %v2040_v58, 3 }
 0x113   : > { %10112 = vmatmul.mubr.msk.bf16.gmra.mrb[24].mxu0 %vm532_vm1, %v1432_v50  ;;  %v2025_v50 = vshll.u32 %v9203_v62, 16  ;;  %v9209_v62 = vcombine.low %v12207_v26, %v12210_v41 }
 0x114   : > { %10115 = vmatprep.mubr.msk.bf16.mxu0 %vm532_vm1, %v1436_v46  ;;  %v2031_v46 = vshrl.u32 %v9204_v21, 16 }
 0x115   : > { %v2076_v24 = vshrl.u32 %v9209_v62, 16  ;;  %v2079_v7 = vshll.u32 %v9209_v62, 16 }
 0x116   : > { %v2033_v38 = vrot.slane %v2031_v46, 3  ;;  %v12228_v46 = vld [vmem:[%s11540_s21 + $0x58] sm:$0xf] }
 0x118   : > { %v2037_v10 = vor.u32 %v2036_v19, %v2033_v38  ;;  %v9211_v38 = vcombine.low %v12228_v46, %v12231_v9 }
 0x11b   : > { %10116 = vmatmul.mubr.msk.bf16.gmra.mrb[28].mxu0 %vm532_vm1, %v1440_v37  ;;  %v12170_v37 = vld [vmem:[%s11540_s21 + $0x34] sm:$0xf] }
 0x11c   : > { %10119 = vmatprep.mubr.msk.bf16.mxu0 %vm532_vm1, %v1444_v52  ;;  %v2027_v52 = vrot.slane %v2025_v50, 4 }
 0x11e   : > { %v2028_v8 = vor.u32 %v2027_v52, %v2024_v36  ;;  %v12237_v36 = vld [vmem:[%s11540_s21 + $0x64] sm:$0xf] }
 0x120   : > { %v2029_v20 = vsel %vm1368_vm3, %v2019_v29, %v2028_v8  ;;  %v2038_v5 = vsel %vm1368_vm3, %v2028_v8, %v2037_v10 }
 0x123   : > { %10120 = vmatmul.mubr.msk.bf16.gmra.mrb[32].mxu0 %vm532_vm1, %v1448_v47  ;;  %v9206_v47 = vcombine.low %v12167_v33, %v12170_v37 }
 0x124   : > { %10123 = vmatprep.mubr.msk.bf16.mxu0 %vm532_vm1, %v1452_v1  ;;  %v2043_v1 = vshll.u32 %v9205_v34, 16  ;;  %v2078_v34 = vrot.slane %v2076_v24, 3  ;;  %v12277_v24 = vld [vmem:[%s11540_s21 + $0x84] sm:$0xf] }
 0x125   : > { %v2049_v2 = vshrl.u32 %v9206_v47, 16  ;;  %v2052_v40 = vshll.u32 %v9206_v47, 16 }
 0x127   : > { %v2051_v22 = vrot.slane %v2049_v2, 3  ;;  %v2054_v6 = vrot.slane %v2052_v40, 4  ;;  %v2097_v2 = vshll.u32 %v9211_v38, 16 }
 0x129   : > { %v2055_v32 = vor.u32 %v2054_v6, %v2051_v22  ;;  %v12257_v22 = vld [vmem:[%s11540_s21 + $0x74] sm:$0xf] }
 0x12b   : > { %10124 = vmatmul.mubr.msk.bf16.gmra.mrb[36].mxu0 %vm532_vm1, %v1456_v15  ;;  %v2045_v15 = vrot.slane %v2043_v1, 4 }
 0x12c   : > { %10127 = vmatprep.mubr.msk.bf16.mxu0 %vm532_vm1, %v1460_v18  ;;  %v9208_v18 = vcombine.low %v12187_v14, %v12190_v17 }
 0x12d   : > { %v2046_v25 = vor.u32 %v2045_v15, %v2042_v12  ;;  %v12248_v15 = vld [vmem:[%s11540_s21 + $0x68] sm:$0xf] }
 0x12e   : > { %v2067_v13 = vshrl.u32 %v9208_v18, 16  ;;  %v2070_v60 = vshll.u32 %v9208_v18, 16 }
 0x12f   : > { %v2056_v35 = vsel %vm1368_vm3, %v2046_v25, %v2055_v32 }
 0x130   : > { %v2069_v48 = vrot.slane %v2067_v13, 3  ;;  %v2072_v16 = vrot.slane %v2070_v60, 4 }
 0x132   : > { %v2073_v50 = vor.u32 %v2072_v16, %v2069_v48  ;;  %v12268_v16 = vld [vmem:[%s11540_s21 + $0x78] sm:$0xf] }
 0x133   : > { %10128 = vmatmul.mubr.msk.bf16.gmra.mrb[40].mxu0 %vm532_vm1, %v1464_v39  ;;  %v12214_v39 = vld [vmem:[%s11540_s21 + $0x50] sm:$0xf] }
 0x134   : > { %10131 = vmatprep.mubr.msk.bf16.mxu0 %vm532_vm1, %v1468_v4  ;;  %v2060_v4 = vrot.slane %v2058_v0, 3  ;;  %v9210_v44 = vcombine.low %v12214_v39, %v12217_v42  ;;  %v9213_v0 = vcombine.low %v12248_v15, %v12251_v63 }
 0x136   : > { %v2064_v21 = vor.u32 %v2063_v43, %v2060_v4  ;;  %v2085_v53 = vshrl.u32 %v9210_v44, 16  ;;  %v2088_v29 = vshll.u32 %v9210_v44, 16  ;;  %v2112_v4 = vshrl.u32 %v9213_v0, 16  ;;  %v12271_v44 = vld [vmem:[%s11540_s21 + $0x7c] sm:$0xf] }
 0x137   : > { %v2115_v43 = vshll.u32 %v9213_v0, 16 }
 0x138   : > { %v2065_v52 = vsel %vm1368_vm3, %v2055_v32, %v2064_v21  ;;  %v2074_v19 = vsel %vm1368_vm3, %v2064_v21, %v2073_v50  ;;  %v2087_v47 = vrot.slane %v2085_v53, 3  ;;  %v2090_v8 = vrot.slane %v2088_v29, 4  ;;  %v12274_v21 = vld [vmem:[%s11540_s21 + $0x80] sm:$0xf] }
 0x139   : > { %v2117_v53 = vrot.slane %v2115_v43, 4  ;;  %v9215_v29 = vcombine.low %v12268_v16, %v12271_v44 }
 0x13a   : > { %v2091_v40 = vor.u32 %v2090_v8, %v2087_v47 }
 0x13b   : > { %10132 = vmatmul.mubr.msk.bf16.gmra.mrb[44].mxu0 %vm532_vm1, %v1477_v27  ;;  %v12234_v27 = vld [vmem:[%s11540_s21 + $0x60] sm:$0xf]  ;;  %v2130_v47 = vshrl.u32 %v9215_v29, 16  ;;  %v2133_v8 = vshll.u32 %v9215_v29, 16  ;;  %v12317_v29 = vld [vmem:[%s11540_s21 + $0xa4] sm:$0xf] }
 0x13c   : > { %10137 = vmatprep.mubr.msk.bf16.mxu0 %vm532_vm1, %v2020_v55  ;;  %v2081_v55 = vrot.slane %v2079_v7, 4  ;;  %v9212_v58 = vcombine.low %v12234_v27, %v12237_v36 }
 0x13e   : > { %v2082_v1 = vor.u32 %v2081_v55, %v2078_v34  ;;  %v2106_v12 = vshll.u32 %v9212_v58, 16 }
 0x140   : > { %v2083_v6 = vsel %vm1368_vm3, %v2073_v50, %v2082_v1  ;;  %v2092_v57 = vsel %vm1368_vm3, %v2082_v1, %v2091_v40  ;;  %v2108_v13 = vrot.slane %v2106_v12, 4  ;;  %v2114_v50 = vrot.slane %v2112_v4, 3  ;;  %v12297_v12 = vld [vmem:[%s11540_s21 + $0x94] sm:$0xf] }
 0x143   : > { %10138 = vmatmul.mubr.msk.bf16.vlgmr.msra.gmra.mrb[0].mxu0 %vm532_vm1, %v2029_v20  ;;  %v2103_v20 = vshrl.u32 %v9212_v58, 16 }
 0x144   : > { %10186 = vmatpush3.bf16.msra.mxu0 %v12043_v3  ;;  %10141 = vmatprep.mubr.msk.bf16.mxu0 %vm532_vm1, %v2038_v5  ;;  %v2047_v3 = vsel %vm1368_vm3, %v2037_v10, %v2046_v25  ;;  %v2094_v10 = vshrl.u32 %v9211_v38, 16  ;;  %v12254_v5 = vld [vmem:[%s11540_s21 + $0x70] sm:$0xf]  ;;  %v2099_v25 = vrot.slane %v2097_v2, 4  ;;  %v9216_v38 = vcombine.low %v12274_v21, %v12277_v24  ;;  %v12288_v2 = vld [vmem:[%s11540_s21 + $0x88] sm:$0xf] }
 0x145   : > { %10235 = vmatprep.subr.bf16.mxu0 %v12201_v51  ;;  %v2105_v32 = vrot.slane %v2103_v20, 3  ;;  %v9214_v60 = vcombine.low %v12254_v5, %v12257_v22  ;;  %v12294_v20 = vld [vmem:[%s11540_s21 + $0x90] sm:$0xf] }
 0x146   : > { %v2096_v18 = vrot.slane %v2094_v10, 3  ;;  %v2139_v1 = vshrl.u32 %v9216_v38, 16  ;;  %v2142_v10 = vshll.u32 %v9216_v38, 16 }
 0x147   : > { %v2109_v62 = vor.u32 %v2108_v13, %v2105_v32  ;;  %v2124_v48 = vshll.u32 %v9214_v60, 16 }
 0x148   : > { %v2141_v32 = vrot.slane %v2139_v1, 3  ;;  %v2144_v13 = vrot.slane %v2142_v10, 4 }
 0x149   : > { %v2126_v55 = vrot.slane %v2124_v48, 4 }
 0x14b   : > { %10142 = vmatmul.mubr.msk.bf16.gmra.mrb[4].mxu0 %vm532_vm1, %v2047_v3  ;;  %v2100_v3 = vor.u32 %v2099_v25, %v2096_v18  ;;  %v2132_v18 = vrot.slane %v2130_v47, 3  ;;  %v2135_v25 = vrot.slane %v2133_v8, 4 }
 0x14c   : > { %10145 = vmatprep.mubr.msk.bf16.mxu0 %vm532_vm1, %v2056_v35  ;;  %v2121_v35 = vshrl.u32 %v9214_v60, 16  ;;  %v9218_v60 = vcombine.low %v12294_v20, %v12297_v12 }
 0x14d   : > { %v2101_v7 = vsel %vm1368_vm3, %v2091_v40, %v2100_v3  ;;  %v12291_v40 = vld [vmem:[%s11540_s21 + $0x8c] sm:$0xf] }
 0x14e   : > { %v2123_v34 = vrot.slane %v2121_v35, 3  ;;  %v9217_v0 = vcombine.low %v12288_v2, %v12291_v40  ;;  %v2157_v35 = vshrl.u32 %v9218_v60, 16  ;;  %v2160_v48 = vshll.u32 %v9218_v60, 16  ;;  %v12337_v60 = vld [vmem:[%s11540_s21 + $0xb4] sm:$0xf] }
 0x14f   : > { %15534 = vst [vmem:[#allocation8_spill] sm:$0xff] %v12337_v60 }
 0x150   : > { %v2127_v58 = vor.u32 %v2126_v55, %v2123_v34  ;;  %v2148_v4 = vshrl.u32 %v9217_v0, 16  ;;  %v2151_v43 = vshll.u32 %v9217_v0, 16  ;;  %v2159_v47 = vrot.slane %v2157_v35, 3 }
 0x151   : > { %v2162_v8 = vrot.slane %v2160_v48, 4 }
 0x152   : > { %v2150_v34 = vrot.slane %v2148_v4, 3  ;;  %v2153_v55 = vrot.slane %v2151_v43, 4 }
 0x153   : > { %10146 = vmatmul.mubr.msk.bf16.gmra.mrb[8].mxu0 %vm532_vm1, %v2065_v52  ;;  %v2110_v52 = vsel %vm1368_vm3, %v2100_v3, %v2109_v62  ;;  %v2136_v3 = vor.u32 %v2135_v25, %v2132_v18  ;;  %v2163_v18 = vor.u32 %v2162_v8, %v2159_v47 }
 0x154   : > { %10149 = vmatprep.mubr.msk.bf16.mxu0 %vm532_vm1, %v2074_v19  ;;  %v2118_v19 = vor.u32 %v2117_v53, %v2114_v50  ;;  %v12311_v50 = vld [vmem:[%s11540_s21 + $0x9c] sm:$0xf]  ;;  %v12314_v53 = vld [vmem:[%s11540_s21 + $0xa0] sm:$0xf] }
 0x155   : > { %v9220_v1 = vcombine.low %v12314_v53, %v12317_v29 }
 0x157   : > { %v2175_v25 = vshrl.u32 %v9220_v1, 16  ;;  %v2178_v0 = vshll.u32 %v9220_v1, 16 }
 0x15b   : > { %10150 = vmatmul.mubr.msk.bf16.gmra.mrb[12].mxu0 %vm532_vm1, %v2083_v6  ;;  %v2119_v6 = vsel %vm1368_vm3, %v2109_v62, %v2118_v19  ;;  %v2145_v62 = vor.u32 %v2144_v13, %v2141_v32  ;;  %v12331_v32 = vld [vmem:[%s11540_s21 + $0xac] sm:$0xf]  ;;  %v12334_v13 = vld [vmem:[%s11540_s21 + $0xb0] sm:$0xf] }
 0x15c   : > { %10153 = vmatprep.mubr.msk.bf16.mxu0 %vm532_vm1, %v2092_v57  ;;  %v2128_v57 = vsel %vm1368_vm3, %v2118_v19, %v2127_v58  ;;  %15532 = vst [vmem:[#allocation6_spill] sm:$0xff] %v12331_v32  ;;  %15533 = vst [vmem:[#allocation7_spill] sm:$0xff] %v12334_v13 }
 0x15d   : > { %v2146_v19 = vsel %vm1368_vm3, %v2136_v3, %v2145_v62 }
 0x163   : > { %10154 = vmatmul.mubr.msk.bf16.gmra.mrb[16].mxu0 %vm532_vm1, %v2101_v7  ;;  %v12308_v7 = vld [vmem:[%s11540_s21 + $0x98] sm:$0xf] }
 0x164   : > { %10157 = vmatprep.mubr.msk.bf16.mxu0 %vm532_vm1, %v2110_v52  ;;  %v2137_v52 = vsel %vm1368_vm3, %v2127_v58, %v2136_v3  ;;  %v9219_v38 = vcombine.low %v12308_v7, %v12311_v50  ;;  %v2154_v58 = vor.u32 %v2153_v55, %v2150_v34  ;;  %v2180_v34 = vrot.slane %v2178_v0, 4 }
 0x165   : > { %v9222_v55 = vcombine.low %v12334_v13, %v12337_v60  ;;  %v12368_v13 = vld [vmem:[%s11540_s21 + $0xc8] sm:$0xf] }
 0x166   : > { %v2166_v10 = vshrl.u32 %v9219_v38, 16  ;;  %v2155_v3 = vsel %vm1368_vm3, %v2145_v62, %v2154_v58  ;;  %v2164_v48 = vsel %vm1368_vm3, %v2154_v58, %v2163_v18  ;;  %v12354_v58 = vld [vmem:[%s11540_s21 + $0xc0] sm:$0xf] }
 0x167   : > { %v2193_v8 = vshrl.u32 %v9222_v55, 16  ;;  %v2196_v1 = vshll.u32 %v9222_v55, 16  ;;  %15536 = vst [vmem:[#allocation10_spill] sm:$0xff] %v12354_v58 }
 0x168   : > { %v2168_v4 = vrot.slane %v2166_v10, 3  ;;  %v12348_v10 = vld [vmem:[%s11540_s21 + $0xb8] sm:$0xf] }
 0x16b   : > { %10158 = vmatmul.mubr.msk.bf16.gmra.mrb[20].mxu0 %vm532_vm1, %v2119_v6  ;;  %v2169_v6 = vshll.u32 %v9219_v38, 16 }
 0x16c   : > { %10161 = vmatprep.mubr.msk.bf16.mxu0 %vm532_vm1, %v2128_v57  ;;  %v12328_v57 = vld [vmem:[%s11540_s21 + $0xa8] sm:$0xf] }
 0x16d   : > { %v2171_v43 = vrot.slane %v2169_v6, 4  ;;  %v9221_v35 = vcombine.low %v12328_v57, %v12331_v32  ;;  %v12351_v6 = vld [vmem:[%s11540_s21 + $0xbc] sm:$0xf] }
 0x16e   : > { %15535 = vst [vmem:[#allocation9_spill] sm:$0xff] %v12351_v6 }
 0x16f   : > { %v2172_v62 = vor.u32 %v2171_v43, %v2168_v4  ;;  %v2184_v38 = vshrl.u32 %v9221_v35, 16  ;;  %v9223_v4 = vcombine.low %v12348_v10, %v12351_v6 }
 0x171   : > { %v2173_v0 = vsel %vm1368_vm3, %v2163_v18, %v2172_v62  ;;  %v2202_v55 = vshrl.u32 %v9223_v4, 16  ;;  %v2205_v18 = vshll.u32 %v9223_v4, 16 }
 0x173   : > { %10162 = vmatmul.mubr.msk.bf16.gmra.mrb[24].mxu0 %vm532_vm1, %v2137_v52  ;;  %v2177_v52 = vrot.slane %v2175_v25, 3  ;;  %v12357_v25 = vld [vmem:[%s11540_s21 + $0xc4] sm:$0xf] }
 0x174   : > { %10165 = vmatprep.mubr.msk.bf16.mxu0 %vm532_vm1, %v2146_v19  ;;  %v2187_v19 = vshll.u32 %v9221_v35, 16  ;;  %15537 = vst [vmem:[#allocation11_spill] sm:$0xff] %v12357_v25  ;;  %v2195_v35 = vrot.slane %v2193_v8, 3  ;;  %v2207_v8 = vrot.slane %v2205_v18, 4 }
 0x175   : > { %v2181_v47 = vor.u32 %v2180_v34, %v2177_v52  ;;  %v9224_v52 = vcombine.low %v12354_v58, %v12357_v25 }
 0x176   : > { %v2189_v60 = vrot.slane %v2187_v19, 4 }
 0x177   : > { %v2182_v43 = vsel %vm1368_vm3, %v2172_v62, %v2181_v47  ;;  %v2214_v19 = vshll.u32 %v9224_v52, 16  ;;  %v2204_v62 = vrot.slane %v2202_v55, 3 }
 0x179   : > { %v2216_v58 = vrot.slane %v2214_v19, 4 }
 0x17b   : > { %10166 = vmatmul.mubr.msk.bf16.gmra.mrb[28].mxu0 %vm532_vm1, %v2155_v3  ;;  %v2186_v3 = vrot.slane %v2184_v38, 3  ;;  %v2211_v38 = vshrl.u32 %v9224_v52, 16 }
 0x17c   : > { %10169 = vmatprep.mubr.msk.bf16.mxu0 %vm532_vm1, %v2164_v48  ;;  %v2198_v48 = vrot.slane %v2196_v1, 4  ;;  %v9225_v1 = vcombine.low %v12368_v13, %v12368_v13 }
 0x17d   : > { %v2190_v34 = vor.u32 %v2189_v60, %v2186_v3  ;;  %v2208_v60 = vor.u32 %v2207_v8, %v2204_v62 }
 0x17e   : > { %v2199_v32 = vor.u32 %v2198_v48, %v2195_v35  ;;  %v2220_v3 = vshrl.u32 %v9225_v1, 16  ;;  %v2223_v4 = vshll.u32 %v9225_v1, 16  ;;  %v11297_v1 = vld [vmem:[%s11540_s21 + $0x34] sm:$0xff]  }
 0x17f   : > { %v2191_v6 = vsel %vm1368_vm3, %v2181_v47, %v2190_v34 }
 0x180   : > { %v2200_v25 = vsel %vm1368_vm3, %v2190_v34, %v2199_v32  ;;  %v2209_v35 = vsel %vm1368_vm3, %v2199_v32, %v2208_v60  ;;  %v2222_v47 = vrot.slane %v2220_v3, 3  ;;  %v2225_v48 = vrot.slane %v2223_v4, 4 }
 0x181   : > { %v9255_v32 = vcombine.low %v12144_v59, %v12147_v28  ;;  %v9260_v59 = vcombine.low %v12190_v17, %v12207_v26  ;;  %v9261_v28 = vcombine.low %v12210_v41, %v12214_v39  ;;  %v9270_v17 = vcombine.low %v12297_v12, %v12308_v7  ;;  %v15539_v41 = vld [vmem:[#allocation7_spill] sm:$0xff]  ;;  %v15540_v39 = vld [vmem:[#allocation6_spill] sm:$0xff] }
 0x182   : > { %v2226_v34 = vor.u32 %v2225_v48, %v2222_v47  ;;  %v9272_v26 = vcombine.low %v12317_v29, %v12328_v57  ;;  %v15544_v12 = vld [vmem:[#allocation11_spill] sm:$0xff]  ;;  %v11298_v48 = vld [vmem:[%s11540_s21 + $0x3c] sm:$0xff]  }
 0x183   : > { %10170 = vmatmul.mubr.msk.bf16.gmra.mrb[32].mxu0 %vm532_vm1, %v2173_v0  ;;  %v2213_v0 = vrot.slane %v2211_v38, 3  ;;  %v9276_v7 = vcombine.low %v15544_v12, %v12368_v13  ;;  %v11296_v38 = vld [vmem:[%s11540_s21 + $0x2c] sm:$0xff]  }
 0x184   : > { %10173 = vmatprep.mubr.msk.bf16.mxu0 %vm532_vm1, %v2182_v43  ;;  %v3169_v4 = vshrl.u32 %v11296_v38, 16 }
 0x185   : > { %v2217_v43 = vor.u32 %v2216_v58, %v2213_v0  ;;  %v12390_v58 = vld [vmem:[%s15363_s1 + $0x30] sm:$0xff]   ;;  %v3165_v0 = vshll.u32 %v11296_v38, 16 }
 0x187   : > { %v2218_v52 = vsel %vm1368_vm3, %v2208_v60, %v2217_v43  ;;  %v2227_v55 = vsel %vm1368_vm3, %v2217_v43, %v2226_v34  ;;  %v3173_v43 = vshll.u32 %v11297_v1, 16  ;;  %v3167_v47 = vrot.slane %v3165_v0, 1 }
 0x189   : > { %v3171_v34 = vor.u32 %v3169_v4, %v3167_v47  ;;  %v11308_v4 = vld [vmem:[%s11540_s21 + $0x8c] sm:$0xff]  }
 0x18b   : > { %10174 = vmatmul.mubr.msk.bf16.gmra.mrb[36].mxu0 %vm532_vm1, %v2191_v6  ;;  %v9253_v6 = vcombine.low %v12122_v56, %v12125_v49  ;;  %v9256_v56 = vcombine.low %v12150_v61, %v12161_v54  ;;  %v9257_v49 = vcombine.low %v12164_v11, %v12167_v33  ;;  %v9262_v61 = vcombine.low %v12217_v42, %v12228_v46  ;;  %v11291_v46 = vld [vmem:[%s11540_s21 + $0xc] sm:$0xff]  }
 0x18c   : > { %10177 = vmatprep.mubr.msk.bf16.mxu0 %vm532_vm1, %v2200_v25  ;;  %v15538_v25 = vcombine.low %v11990_v23, %v11993_v31  ;;  %v9258_v23 = vcombine.low %v12170_v37, %v12181_v30  ;;  %v9259_v31 = vcombine.low %v12184_v45, %v12187_v14  ;;  %v9263_v54 = vcombine.low %v12231_v9, %v12234_v27  ;;  %v11292_v9 = vld [vmem:[%s11540_s21 + $0x14] sm:$0xff]  }
 0x18d   : > { %v9264_v11 = vcombine.low %v12237_v36, %v12248_v15  ;;  %v9265_v33 = vcombine.low %v12251_v63, %v12254_v5  ;;  %v9266_v37 = vcombine.low %v12257_v22, %v12268_v16  ;;  %v9267_v30 = vcombine.low %v12271_v44, %v12274_v21  ;;  %v15541_v36 = vld [vmem:[#allocation8_spill] sm:$0xff]  ;;  %v15542_v63 = vld [vmem:[#allocation10_spill] sm:$0xff]  ;;  %v15543_v5 = vld [vmem:[#allocation9_spill] sm:$0xff] }
 0x18e   : > { %v9268_v45 = vcombine.low %v12277_v24, %v12288_v2  ;;  %v9269_v14 = vcombine.low %v12291_v40, %v12294_v20  ;;  %v9273_v42 = vcombine.low %v15540_v39, %v15539_v41  ;;  %v3136_v27 = vshll.u32 %v11291_v46, 16  ;;  %v11294_v24 = vld [vmem:[%s11540_s21 + $0x1c] sm:$0xff]   ;;  %v11295_v20 = vld [vmem:[%s11540_s21 + $0x24] sm:$0xff]  }
 0x18f   : > { %v9274_v15 = vcombine.low %v15541_v36, %v12348_v10  ;;  %v9275_v22 = vcombine.low %v15543_v5, %v15542_v63  ;;  %v3134_v16 = vshrl.u32 %v11291_v46, 16  ;;  %v3141_v21 = vshll.u32 %v11292_v9, 16  ;;  %v11303_v46 = vld [vmem:[%s11540_s21 + $0x64] sm:$0xff]  }
 0x190   : > { %v3138_v44 = vrot.slane %v3136_v27, 1  ;;  %v3153_v57 = vshrl.u32 %v11294_v24, 16  ;;  %v3157_v10 = vshll.u32 %v11295_v20, 16  ;;  %v3161_v60 = vshrl.u32 %v11295_v20, 16 }
 0x191   : > { %v3143_v40 = vrot.slane %v3141_v21, 1  ;;  %v3221_v5 = vshll.u32 %v11303_v46, 16  ;;  %v3225_v12 = vshrl.u32 %v11303_v46, 16 }
 0x192   : > { %v3139_v2 = vor.u32 %v3138_v44, %v3134_v16  ;;  %v3159_v8 = vrot.slane %v3157_v10, 1  ;;  %v11304_v16 = vld [vmem:[%s11540_s21 + $0x6c] sm:$0xff]  }
 0x193   : > { %10178 = vmatmul.mubr.msk.bf16.gmra.mrb[40].mxu0 %vm532_vm1, %v2209_v35  ;;  %v12475_v35 = vld [vmem:[%s15363_s1 + $0x38] sm:$0xff]  }
 0x194   : > { %10181 = vmatprep.mubr.msk.bf16.mxu0 %vm532_vm1, %v2218_v52  ;;  %v3144_v29 = vsel %vm3132_vm4, %v3139_v2, %v3143_v40  ;;  %v3163_v52 = vor.u32 %v3161_v60, %v3159_v8  ;;  %v11305_v2 = vld [vmem:[%s11540_s21 + $0x74] sm:$0xff]  }
 0x19b   : > { %10182 = vmatmul.mubr.msk.bf16.gmra.mrb[44].mxu0 %vm532_vm1, %v2227_v55  ;;  %v3175_v55 = vrot.slane %v3173_v43, 1 }
 0x19c   : > { %10187 = vmatprep.mubr.msk.bf16.mxu0 %vm532_vm1, %v9253_v6  ;;  %v11299_v6 = vld [vmem:[%s11540_s21 + $0x44] sm:$0xff]  }
 0x1a3   : > { %10188 = vmatmul.mubr.msk.bf16.vlgmr.msra.gmra.mrb[0].mxu0 %vm532_vm1, %v15538_v25  ;;  %v3168_v25 = vsel %vm3132_vm4, %v3163_v52, %v3167_v47  ;;  %v11309_v52 = vld [vmem:[%s11540_s21 + $0x94] sm:$0xff]  }
 0x1a4   : > { %10236 = vmatpush3.bf16.msra.mxu0 %v12201_v51  ;;  %10191 = vmatprep.mubr.msk.bf16.mxu0 %vm532_vm1, %v9255_v32  ;;  %v9271_v51 = vcombine.low %v12311_v50, %v12314_v53  ;;  %v3149_v50 = vshll.u32 %v11294_v24, 16  ;;  %v3145_v53 = vshrl.u32 %v11292_v9, 16  ;;  %v3181_v32 = vshll.u32 %v11298_v48, 16 }
 0x1a5   : > { %10285 = vmatprep.subr.bf16.mxu0 %v12390_v58  ;;  %v3223_v24 = vrot.slane %v3221_v5, 1  ;;  %v11314_v5 = vld [vmem:[%s11540_s21 + $0xbc] sm:$0xff]  }
 0x1a6   : > { %v3151_v18 = vrot.slane %v3149_v50, 1  ;;  %v3147_v19 = vor.u32 %v3145_v53, %v3143_v40  ;;  %v3229_v40 = vshll.u32 %v11304_v16, 16  ;;  %v3233_v50 = vshrl.u32 %v11304_v16, 16 }
 0x1a7   : > { %v3237_v53 = vshll.u32 %v11305_v2, 16  ;;  %v3227_v10 = vor.u32 %v3225_v12, %v3223_v24 }
 0x1a8   : > { %v3155_v62 = vor.u32 %v3153_v57, %v3151_v18  ;;  %v3152_v13 = vsel %vm3132_vm4, %v3147_v19, %v3151_v18  ;;  %v11306_v57 = vld [vmem:[%s11540_s21 + $0x7c] sm:$0xff]   ;;  %v11307_v19 = vld [vmem:[%s11540_s21 + $0x84] sm:$0xff]  }
 0x1a9   : > { %v3239_v38 = vrot.slane %v3237_v53, 1  ;;  %v3253_v60 = vshll.u32 %v11307_v19, 16 }
 0x1aa   : > { %v3160_v3 = vsel %vm3132_vm4, %v3155_v62, %v3159_v8  ;;  %v3245_v62 = vshll.u32 %v11306_v57, 16 }
 0x1ab   : > { %10192 = vmatmul.mubr.msk.bf16.gmra.mrb[4].mxu0 %vm532_vm1, %v9256_v56  ;;  %v3177_v56 = vshrl.u32 %v11297_v1, 16  ;;  %v3241_v1 = vshrl.u32 %v11305_v2, 16  ;;  %v12540_v2 = vld [vmem:[%s11540_s21 + $0x18] sm:$0xf] }
 0x1ac   : > { %10195 = vmatprep.mubr.msk.bf16.mxu0 %vm532_vm1, %v9257_v49  ;;  %v3176_v49 = vsel %vm3132_vm4, %v3171_v34, %v3175_v55  ;;  %v3261_v34 = vshll.u32 %v11308_v4, 16 }
 0x1ad   : > { %v3243_v43 = vor.u32 %v3241_v1, %v3239_v38 }
 0x1b3   : > { %10196 = vmatmul.mubr.msk.bf16.gmra.mrb[8].mxu0 %vm532_vm1, %v9258_v23  ;;  %v3185_v23 = vshrl.u32 %v11298_v48, 16  ;;  %v3255_v48 = vrot.slane %v3253_v60, 1 }
 0x1b4   : > { %10199 = vmatprep.mubr.msk.bf16.mxu0 %vm532_vm1, %v9259_v31  ;;  %v3189_v31 = vshll.u32 %v11299_v6, 16 }
 0x1bb   : > { %10200 = vmatmul.mubr.msk.bf16.gmra.mrb[12].mxu0 %vm532_vm1, %v9260_v59  ;;  %v11300_v59 = vld [vmem:[%s11540_s21 + $0x4c] sm:$0xff]  }
 0x1bc   : > { %10203 = vmatprep.mubr.msk.bf16.mxu0 %vm532_vm1, %v9261_v28  ;;  %v3179_v28 = vor.u32 %v3177_v56, %v3175_v55  ;;  %v3269_v56 = vshll.u32 %v11309_v52, 16 }
 0x1c3   : > { %10204 = vmatmul.mubr.msk.bf16.gmra.mrb[16].mxu0 %vm532_vm1, %v9262_v61 }
 0x1c4   : > { %10207 = vmatprep.mubr.msk.bf16.mxu0 %vm532_vm1, %v9263_v54  ;;  %v3191_v54 = vrot.slane %v3189_v31, 1 }
 0x1cb   : > { %10208 = vmatmul.mubr.msk.bf16.gmra.mrb[20].mxu0 %vm532_vm1, %v9264_v11  ;;  %v11301_v11 = vld [vmem:[%s11540_s21 + $0x54] sm:$0xff]  }
 0x1cc   : > { %10211 = vmatprep.mubr.msk.bf16.mxu0 %vm532_vm1, %v9265_v33  ;;  %v3197_v33 = vshll.u32 %v11300_v59, 16  ;;  %v3209_v36 = vshrl.u32 %v11301_v11, 16 }
 0x1d3   : > { %10212 = vmatmul.mubr.msk.bf16.gmra.mrb[24].mxu0 %vm532_vm1, %v9266_v37 }
 0x1d4   : > { %10215 = vmatprep.mubr.msk.bf16.mxu0 %vm532_vm1, %v9267_v30  ;;  %v3193_v30 = vshrl.u32 %v11299_v6, 16  ;;  %v3257_v6 = vshrl.u32 %v11307_v19, 16 }
 0x1d6   : > { %v3195_v41 = vor.u32 %v3193_v30, %v3191_v54  ;;  %v3259_v31 = vor.u32 %v3257_v6, %v3255_v48  ;;  %v12562_v6 = vld [vmem:[%s11540_s21 + $0x2c] sm:$0xff]  }
 0x1db   : > { %10216 = vmatmul.mubr.msk.bf16.gmra.mrb[28].mxu0 %vm532_vm1, %v9268_v45 }
 0x1dc   : > { %10219 = vmatprep.mubr.msk.bf16.mxu0 %vm532_vm1, %v9269_v14  ;;  %v3201_v14 = vshrl.u32 %v11300_v59, 16  ;;  %v3271_v59 = vrot.slane %v3269_v56, 1 }
 0x1e3   : > { %10220 = vmatmul.mubr.msk.bf16.gmra.mrb[32].mxu0 %vm532_vm1, %v9270_v17  ;;  %v3205_v17 = vshll.u32 %v11301_v11, 16  ;;  %v3273_v11 = vshrl.u32 %v11309_v52, 16 }
 0x1e4   : > { %10223 = vmatprep.mubr.msk.bf16.mxu0 %vm532_vm1, %v9271_v51  ;;  %v3199_v51 = vrot.slane %v3197_v33, 1 }
 0x1e6   : > { %v3203_v39 = vor.u32 %v3201_v14, %v3199_v51  ;;  %v3200_v27 = vsel %vm3132_vm4, %v3195_v41, %v3199_v51  ;;  %v11312_v14 = vld [vmem:[%s11540_s21 + $0xac] sm:$0xff]   ;;  %v12527_v51 = vld [vmem:[%s15363_s1 + $0x40] sm:$0xff]  }
 0x1e7   : > { %10615 = vmatprep.subr.bf16.mxu1 %v12527_v51 }
 0x1e8   : > { %10616 = vmatpush3.bf16.msra.mxu1 %v12527_v51 }
 0x1eb   : > { %10224 = vmatmul.mubr.msk.bf16.gmra.mrb[36].mxu0 %vm532_vm1, %v9272_v26  ;;  %v11302_v26 = vld [vmem:[%s11540_s21 + $0x5c] sm:$0xff]  }
 0x1ec   : > { %10227 = vmatprep.mubr.msk.bf16.mxu0 %vm532_vm1, %v9273_v42  ;;  %v3207_v42 = vrot.slane %v3205_v17, 1  ;;  %v3213_v9 = vshll.u32 %v11302_v26, 16  ;;  %v3217_v63 = vshrl.u32 %v11302_v26, 16  ;;  %v3275_v17 = vor.u32 %v3273_v11, %v3271_v59  ;;  %v12584_v11 = vld [vmem:[%s11540_s21 + $0x3c] sm:$0xff]  }
 0x1ee   : > { %v3211_v44 = vor.u32 %v3209_v36, %v3207_v42  ;;  %v3297_v36 = vshrl.u32 %v11312_v14, 16 }
 0x1f3   : > { %10228 = vmatmul.mubr.msk.bf16.gmra.mrb[40].mxu0 %vm532_vm1, %v9274_v15  ;;  %v3208_v15 = vsel %vm3132_vm4, %v3203_v39, %v3207_v42  ;;  %v11313_v39 = vld [vmem:[%s11540_s21 + $0xb4] sm:$0xff]   ;;  %v3293_v42 = vshll.u32 %v11312_v14, 16 }
 0x1f4   : > { %10231 = vmatprep.mubr.msk.bf16.mxu0 %vm532_vm1, %v9275_v22  ;;  %v3215_v22 = vrot.slane %v3213_v9, 1  ;;  %v3305_v12 = vshrl.u32 %v11313_v39, 16 }
 0x1f6   : > { %v3219_v21 = vor.u32 %v3217_v63, %v3215_v22  ;;  %v3216_v20 = vsel %vm3132_vm4, %v3211_v44, %v3215_v22  ;;  %v3295_v63 = vrot.slane %v3293_v42, 1 }
 0x1f8   : > { %v3299_v16 = vor.u32 %v3297_v36, %v3295_v63  ;;  %v15412_v36 = vshrl.u32 %v12584_v11, 16 }
 0x1fb   : > { %10232 = vmatmul.mubr.msk.bf16.gmra.mrb[44].mxu0 %vm532_vm1, %v9276_v7  ;;  %v3224_v7 = vsel %vm3132_vm4, %v3219_v21, %v3223_v24  ;;  %v11315_v21 = vld [vmem:[%s11540_s21 + $0xc4] sm:$0xff]   ;;  %v3680_v24 = vld [vmem:[%s11540_s21 + $0x14] sm:$0xf] }
 0x1fc   : > { %10237 = vmatprep.mubr.msk.bf16.mxu0 %vm532_vm1, %v3144_v29  ;;  %v3231_v29 = vrot.slane %v3229_v40, 1  ;;  %v3309_v40 = vshll.u32 %v11314_v5, 16  ;;  %v3317_v53 = vshll.u32 %v11315_v21, 16 }
 0x1fe   : > { %v3235_v18 = vor.u32 %v3233_v50, %v3231_v29  ;;  %v3232_v8 = vsel %vm3132_vm4, %v3227_v10, %v3231_v29  ;;  %v3313_v50 = vshrl.u32 %v11314_v5, 16  ;;  %v9356_v29 = vcombine.low %v3680_v24, %v12540_v2 }
 0x1ff   : > { %v3319_v19 = vrot.slane %v3317_v53, 1 }
 0x200   : > { %v3240_v0 = vsel %vm3132_vm4, %v3235_v18, %v3239_v38  ;;  %v11316_v18 = vld [vmem:[%s11540_s21 + $0xcc] ss:$0 sps:$4 sm:$0x11]  }
 0x203   : > { %10238 = vmatmul.mubr.msk.bf16.vlgmr.msra.gmra.mrb[0].mxu0 %vm532_vm1, %v3152_v13  ;;  %v3249_v13 = vshrl.u32 %v11306_v57, 16  ;;  %v3311_v57 = vrot.slane %v3309_v40, 1  ;;  %v12630_v40 = vld [vmem:[%s11540_s21 + $0x5c] sm:$0xff]  }
 0x204   : > { %10286 = vmatpush3.bf16.msra.mxu0 %v12390_v58  ;;  %10241 = vmatprep.mubr.msk.bf16.mxu0 %vm532_vm1, %v3160_v3  ;;  %v3183_v58 = vrot.slane %v3181_v32, 1  ;;  %v3247_v3 = vrot.slane %v3245_v62, 1  ;;  %v12549_v62 = vld [vmem:[%s11540_s21 + $0x1c] sm:$0xff]  }
 0x205   : > { %10335 = vmatprep.subr.bf16.mxu0 %v12475_v35  ;;  %v3315_v38 = vor.u32 %v3313_v50, %v3311_v57  ;;  %v3867_v56 = vshrl.u32 %v12549_v62, 16 }
 0x206   : > { %v3187_v61 = vor.u32 %v3185_v23, %v3183_v58  ;;  %v3184_v37 = vsel %vm3132_vm4, %v3179_v28, %v3183_v58  ;;  %v3251_v47 = vor.u32 %v3249_v13, %v3247_v3  ;;  %v3248_v55 = vsel %vm3132_vm4, %v3243_v43, %v3247_v3  ;;  %v11310_v23 = vld [vmem:[%s11540_s21 + $0x9c] sm:$0xff]   ;;  %v11311_v28 = vld [vmem:[%s11540_s21 + $0xa4] sm:$0xff]  }
 0x207   : > { %v3285_v30 = vshll.u32 %v11311_v28, 16  ;;  %v3289_v9 = vshrl.u32 %v11311_v28, 16  ;;  %v3325_v13 = vshll.u32 %v11316_v18, 16  ;;  %v3320_v60 = vsel %vm3132_vm4, %v3315_v38, %v3319_v19 }
 0x208   : > { %v3192_v45 = vsel %vm3132_vm4, %v3187_v61, %v3191_v54  ;;  %v3256_v32 = vsel %vm3132_vm4, %v3251_v47, %v3255_v48  ;;  %v3277_v61 = vshll.u32 %v11310_v23, 16  ;;  %v3856_v3 = vshrl.u32 %v9356_v29, 16  ;;  %v12556_v47 = vld [vmem:[%s11540_s21 + $0x24] sm:$0xff]  }
 0x209   : > { %v3287_v41 = vrot.slane %v3285_v30, 1  ;;  %v3863_v43 = vshll.u32 %v12549_v62, 16  ;;  %v3327_v52 = vrot.slane %v3325_v13, 1  ;;  %v3883_v30 = vshrl.u32 %v12562_v6, 16 }
 0x20b   : > { %10242 = vmatmul.mubr.msk.bf16.gmra.mrb[4].mxu0 %vm532_vm1, %v3168_v25  ;;  %v3265_v25 = vshrl.u32 %v11308_v4, 16  ;;  %v3291_v22 = vor.u32 %v3289_v9, %v3287_v41  ;;  %v12607_v9 = vld [vmem:[%s11540_s21 + $0x4c] sm:$0xff]  }
 0x20c   : > { %10245 = vmatprep.mubr.msk.bf16.mxu0 %vm532_vm1, %v3176_v49  ;;  %v3263_v49 = vrot.slane %v3261_v34, 1  ;;  %v15405_v5 = vshll.u32 %v12607_v9, 16 }
 0x20e   : > { %v3267_v58 = vor.u32 %v3265_v25, %v3263_v49  ;;  %v3264_v54 = vsel %vm3132_vm4, %v3259_v31, %v3263_v49  ;;  %v3879_v31 = vshll.u32 %v12562_v6, 16  ;;  %v3913_v24 = vrot.slane %v15405_v5, 1 }
 0x210   : > { %v3272_v33 = vsel %vm3132_vm4, %v3267_v58, %v3271_v59  ;;  %v12574_v59 = vld [vmem:[%s11540_s21 + $0x34] sm:$0xff]  }
 0x211   : > { %v15417_v14 = vshrl.u32 %v12574_v59, 16 }
 0x213   : > { %10246 = vmatmul.mubr.msk.bf16.gmra.mrb[8].mxu0 %vm532_vm1, %v3184_v37  ;;  %v3281_v37 = vshrl.u32 %v11310_v23, 16  ;;  %v3875_v23 = vshrl.u32 %v12556_v47, 16 }
 0x214   : > { %10249 = vmatprep.mubr.msk.bf16.mxu0 %vm532_vm1, %v3192_v45  ;;  %v3279_v45 = vrot.slane %v3277_v61, 1 }
 0x216   : > { %v3283_v26 = vor.u32 %v3281_v37, %v3279_v45  ;;  %v3280_v46 = vsel %vm3132_vm4, %v3275_v17, %v3279_v45  ;;  %v15411_v17 = vshll.u32 %v12584_v11, 16 }
 0x21b   : > { %10250 = vmatmul.mubr.msk.bf16.gmra.mrb[12].mxu0 %vm532_vm1, %v3200_v27  ;;  %v3288_v27 = vsel %vm3132_vm4, %v3283_v26, %v3287_v41  ;;  %v12596_v41 = vld [vmem:[%s11540_s21 + $0x44] sm:$0xff]  }
 0x21c   : > { %10253 = vmatprep.mubr.msk.bf16.mxu0 %vm532_vm1, %v3208_v15  ;;  %v3301_v15 = vshll.u32 %v11313_v39, 16 }
 0x21e   : > { %v3303_v44 = vrot.slane %v3301_v15, 1 }
 0x220   : > { %v3307_v10 = vor.u32 %v3305_v12, %v3303_v44 }
 0x222   : > { %v3312_v1 = vsel %vm3132_vm4, %v3307_v10, %v3311_v57  ;;  %v12642_v10 = vld [vmem:[%s11540_s21 + $0x64] sm:$0xff]  }
 0x223   : > { %10254 = vmatmul.mubr.msk.bf16.gmra.mrb[16].mxu0 %vm532_vm1, %v3216_v20  ;;  %v3296_v20 = vsel %vm3132_vm4, %v3291_v22, %v3295_v63  ;;  %v15410_v63 = vshrl.u32 %v12596_v41, 16  ;;  %v15395_v13 = vshll.u32 %v12642_v10, 16 }
 0x224   : > { %10257 = vmatprep.mubr.msk.bf16.mxu0 %vm532_vm1, %v3224_v7  ;;  %v3304_v7 = vsel %vm3132_vm4, %v3299_v16, %v3303_v44  ;;  %v12620_v16 = vld [vmem:[%s11540_s21 + $0x54] sm:$0xff]  }
 0x225   : > { %v15404_v53 = vshrl.u32 %v12620_v16, 16 }
 0x22b   : > { %10258 = vmatmul.mubr.msk.bf16.gmra.mrb[20].mxu0 %vm532_vm1, %v3232_v8  ;;  %v3858_v8 = vshll.u32 %v9356_v29, 16  ;;  %v15399_v29 = vshll.u32 %v12630_v40, 16 }
 0x22c   : > { %10261 = vmatprep.mubr.msk.bf16.mxu0 %vm532_vm1, %v3240_v0  ;;  %v3321_v0 = vshrl.u32 %v11315_v21, 16 }
 0x22d   : > { %v3860_v4 = vrot.slane %v3858_v8, 1  ;;  %v12652_v8 = vld [vmem:[%s11540_s21 + $0x6c] sm:$0xff]  }
 0x22e   : > { %v3323_v48 = vor.u32 %v3321_v0, %v3319_v19  ;;  %v3929_v19 = vrot.slane %v15399_v29, 1  ;;  %v15400_v0 = vshrl.u32 %v12630_v40, 16 }
 0x22f   : > { %v3861_v34 = vor.u32 %v3860_v4, %v3856_v3  ;;  %v12663_v3 = vld [vmem:[%s11540_s21 + $0xa4] sm:$0xff]  }
 0x230   : > { %v3328_v25 = vsel %vm3132_vm4, %v3323_v48, %v3327_v52  ;;  %v15396_v52 = vshrl.u32 %v12642_v10, 16 }
 0x233   : > { %10262 = vmatmul.mubr.msk.bf16.gmra.mrb[24].mxu0 %vm532_vm1, %v3248_v55  ;;  %v3865_v55 = vrot.slane %v3863_v43, 1 }
 0x234   : > { %10265 = vmatprep.mubr.msk.bf16.mxu0 %vm532_vm1, %v3256_v32  ;;  %v3871_v32 = vshll.u32 %v12556_v47, 16 }
 0x235   : > { %v3866_v49 = vsel %vm3132_vm4, %v3861_v34, %v3865_v55  ;;  %v3869_v28 = vor.u32 %v3867_v56, %v3865_v55  ;;  %v15394_v34 = vshll.u32 %v12652_v8, 16 }
 0x236   : > { %v3873_v58 = vrot.slane %v3871_v32, 1 }
 0x238   : > { %v3877_v61 = vor.u32 %v3875_v23, %v3873_v58  ;;  %v3874_v37 = vsel %vm3132_vm4, %v3869_v28, %v3873_v58  ;;  %v3933_v58 = vor.u32 %v15400_v0, %v3929_v19  ;;  %v3937_v28 = vrot.slane %v15395_v13, 1 }
 0x23b   : > { %10266 = vmatmul.mubr.msk.bf16.gmra.mrb[28].mxu0 %vm532_vm1, %v3264_v54  ;;  %v3881_v54 = vrot.slane %v3879_v31, 1 }
 0x23c   : > { %10269 = vmatprep.mubr.msk.bf16.mxu0 %vm532_vm1, %v3272_v33  ;;  %v15415_v33 = vshll.u32 %v12574_v59, 16 }
 0x23d   : > { %v3882_v45 = vsel %vm3132_vm4, %v3877_v61, %v3881_v54  ;;  %v3885_v39 = vor.u32 %v3883_v30, %v3881_v54  ;;  %v12678_v61 = vld [vmem:[%s11540_s21 + $0x74] sm:$0xff]  }
 0x23e   : > { %v3889_v26 = vrot.slane %v15415_v33, 1  ;;  %v11345_v33 = vld [vmem:[%s11540_s21 + $0xd4] ss:$0 sps:$4 sm:$0x33]  }
 0x240   : > { %v3893_v42 = vor.u32 %v15417_v14, %v3889_v26 }
 0x243   : > { %10270 = vmatmul.mubr.msk.bf16.gmra.mrb[32].mxu0 %vm532_vm1, %v3280_v46  ;;  %v3897_v46 = vrot.slane %v15411_v17, 1 }
 0x244   : > { %10273 = vmatprep.mubr.msk.bf16.mxu0 %vm532_vm1, %v3288_v27  ;;  %v15407_v27 = vshll.u32 %v12596_v41, 16 }
 0x245   : > { %v3898_v15 = vsel %vm3132_vm4, %v3893_v42, %v3897_v46  ;;  %v3901_v44 = vor.u32 %v15412_v36, %v3897_v46  ;;  %v3941_v46 = vor.u32 %v15396_v52, %v3937_v28 }
 0x246   : > { %v3905_v22 = vrot.slane %v15407_v27, 1 }
 0x248   : > { %v3909_v21 = vor.u32 %v15410_v63, %v3905_v22  ;;  %v3906_v12 = vsel %vm3132_vm4, %v3901_v44, %v3905_v22  ;;  %v12700_v44 = vld [vmem:[%s11540_s21 + $0xac] sm:$0xff]  }
 0x249   : > { %v4007_v13 = vshll.u32 %v12700_v44, 16  ;;  %v4011_v52 = vshrl.u32 %v12700_v44, 16 }
 0x24a   : > { %v3914_v50 = vsel %vm3132_vm4, %v3909_v21, %v3913_v24 }
 0x24b   : > { %10274 = vmatmul.mubr.msk.bf16.gmra.mrb[36].mxu0 %vm532_vm1, %v3296_v20  ;;  %v15402_v20 = vshll.u32 %v12620_v16, 16 }
 0x24c   : > { %10277 = vmatprep.mubr.msk.bf16.mxu0 %vm532_vm1, %v3304_v7  ;;  %v15406_v7 = vshrl.u32 %v12607_v9, 16 }
 0x24d   : > { %v3921_v57 = vrot.slane %v15402_v20, 1  ;;  %v12757_v20 = vld [vmem:[%s11540_s21 + $0xc4] sm:$0xff]  }
 0x24e   : > { %v3917_v18 = vor.u32 %v15406_v7, %v3913_v24 }
 0x24f   : > { %v3925_v38 = vor.u32 %v15404_v53, %v3921_v57 }
 0x250   : > { %v3922_v4 = vsel %vm3132_vm4, %v3917_v18, %v3921_v57  ;;  %v15397_v57 = vshll.u32 %v12678_v61, 16 }
 0x251   : > { %v3930_v48 = vsel %vm3132_vm4, %v3925_v38, %v3929_v19  ;;  %v3938_v38 = vsel %vm3132_vm4, %v3933_v58, %v3937_v28  ;;  %v12712_v19 = vld [vmem:[%s11540_s21 + $0xb4] sm:$0xff]  }
 0x253   : > { %10278 = vmatmul.mubr.msk.bf16.gmra.mrb[40].mxu0 %vm532_vm1, %v3312_v1  ;;  %v12655_v1 = vld [vmem:[%s11540_s21 + $0x94] sm:$0xff]  }
 0x254   : > { %10281 = vmatprep.mubr.msk.bf16.mxu0 %vm532_vm1, %v3320_v60  ;;  %v12660_v60 = vld [vmem:[%s11540_s21 + $0x9c] sm:$0xff]   ;;  %v3983_v55 = vshll.u32 %v12655_v1, 16 }
 0x255   : > { %v3991_v54 = vshll.u32 %v12660_v60, 16 }
 0x257   : > { %v4891_v22 = vrot.slane %v3991_v54, 2 }
 0x25b   : > { %10282 = vmatmul.mubr.msk.bf16.gmra.mrb[44].mxu0 %vm532_vm1, %v3328_v25  ;;  %v3987_v25 = vshrl.u32 %v12655_v1, 16 }
 0x25c   : > { %10287 = vmatprep.mubr.msk.bf16.mxu0 %vm532_vm1, %v3866_v49  ;;  %v3995_v49 = vshrl.u32 %v12660_v60, 16 }
 0x25e   : > { %v4890_v42 = vrot.slane %v3995_v49, 1 }
 0x260   : > { %v4892_v18 = vor.u32 %v4891_v22, %v4890_v42  ;;  %v3953_v42 = vrot.slane %v15397_v57, 1  ;;  %v4015_v22 = vshll.u32 %v12712_v19, 16 }
 0x263   : > { %10288 = vmatmul.mubr.msk.bf16.vlgmr.msra.gmra.mrb[0].mxu0 %vm532_vm1, %v3874_v37  ;;  %v3999_v37 = vshll.u32 %v12663_v3, 16 }
 0x264   : > { %10336 = vmatpush3.bf16.msra.mxu0 %v12475_v35  ;;  %10291 = vmatprep.mubr.msk.bf16.mxu0 %vm532_vm1, %v3882_v45  ;;  %v3890_v35 = vsel %vm3132_vm4, %v3885_v39, %v3889_v26  ;;  %v4003_v45 = vshrl.u32 %v12663_v3, 16  ;;  %v4886_v26 = vrot.slane %v3987_v25, 1  ;;  %v4887_v39 = vrot.slane %v3983_v55, 2 }
 0x265   : > { %10385 = vmatprep.subr.bf16.mxu0 %v12527_v51 }
 0x266   : > { %v12702_v21 = vor.u32 %v4887_v39, %v4886_v26  ;;  %v4894_v24 = vrot.slane %v4003_v45, 1  ;;  %v15401_v26 = vshrl.u32 %v12678_v61, 16 }
 0x26b   : > { %10292 = vmatmul.mubr.msk.bf16.gmra.mrb[4].mxu0 %vm532_vm1, %v3890_v35  ;;  %v3945_v35 = vrot.slane %v15394_v34, 1  ;;  %v4893_v34 = vsel %vm4817_vm5, %v12702_v21, %v4892_v18 }
 0x26c   : > { %10295 = vmatprep.mubr.msk.bf16.mxu0 %vm532_vm1, %v3898_v15  ;;  %v12695_v15 = vld [vmem:[%s11540_s21 + $0x7c] sm:$0xff]   ;;  %10419 = vmatprep.mubr.msk.bf16.mxu1 %vm532_vm1, %v4893_v34  ;;  %v4019_v34 = vshrl.u32 %v12712_v19, 16 }
 0x26d   : > { %v15403_v39 = vshll.u32 %v12695_v15, 16  ;;  %v15409_v29 = vshrl.u32 %v12695_v15, 16 }
 0x26e   : > { %v4902_v57 = vrot.slane %v4019_v34, 1 }
 0x273   : > { %10296 = vmatmul.mubr.msk.bf16.gmra.mrb[8].mxu0 %vm532_vm1, %v3906_v12  ;;  %v4895_v12 = vrot.slane %v3999_v37, 2 }
 0x274   : > { %10299 = vmatprep.mubr.msk.bf16.mxu0 %vm532_vm1, %v3914_v50  ;;  %v15398_v50 = vshrl.u32 %v12652_v8, 16 }
 0x276   : > { %v3949_v28 = vor.u32 %v15398_v50, %v3945_v35  ;;  %v4903_v50 = vrot.slane %v4015_v22, 2 }
 0x278   : > { %v4904_v53 = vor.u32 %v4903_v50, %v4902_v57 }
 0x27b   : > { %10300 = vmatmul.mubr.msk.bf16.gmra.mrb[12].mxu0 %vm532_vm1, %v3922_v4  ;;  %v4896_v4 = vor.u32 %v4895_v12, %v4894_v24  ;;  %v4898_v24 = vrot.slane %v4011_v52, 1  ;;  %v3957_v12 = vor.u32 %v15401_v26, %v3953_v42  ;;  %v3954_v26 = vsel %vm3132_vm4, %v3949_v28, %v3953_v42 }
 0x27c   : > { %10303 = vmatprep.mubr.msk.bf16.mxu0 %vm532_vm1, %v3930_v48  ;;  %v3946_v48 = vsel %vm3132_vm4, %v3941_v46, %v3945_v35  ;;  %v12729_v46 = vld [vmem:[%s11540_s21 + $0x84] sm:$0xff]   ;;  %v4899_v35 = vrot.slane %v4007_v13, 2 }
 0x27d   : > { %v4897_v58 = vsel %vm4817_vm5, %v4892_v18, %v4896_v4  ;;  %v3961_v18 = vrot.slane %v15403_v39, 1  ;;  %v15408_v0 = vshll.u32 %v12729_v46, 16 }
 0x27e   : > { %10420 = vmatmul.mubr.msk.bf16.vlgmr.msra.gmra.mrb[0].mxu1 %vm532_vm1, %v4897_v58  ;;  %v12747_v58 = vld [vmem:[%s11540_s21 + $0xbc] sm:$0xff]  }
 0x27f   : > { %v3962_v5 = vsel %vm3132_vm4, %v3957_v12, %v3961_v18  ;;  %v4023_v7 = vshll.u32 %v12747_v58, 16  ;;  %v4027_v27 = vshrl.u32 %v12747_v58, 16  ;;  %v3965_v50 = vor.u32 %v15409_v29, %v3961_v18 }
 0x280   : > { %v3969_v57 = vrot.slane %v15408_v0, 1 }
 0x281   : > { %v4906_v42 = vrot.slane %v4027_v27, 1 }
 0x282   : > { %v3970_v29 = vsel %vm3132_vm4, %v3965_v50, %v3969_v57  ;;  %v3985_v50 = vrot.slane %v3983_v55, 1  ;;  %v3993_v55 = vrot.slane %v3991_v54, 1 }
 0x283   : > { %10304 = vmatmul.mubr.msk.bf16.gmra.mrb[16].mxu0 %vm532_vm1, %v3938_v38  ;;  %v12744_v38 = vld [vmem:[%s11540_s21 + $0x8c] sm:$0xff]  }
 0x284   : > { %10307 = vmatprep.mubr.msk.bf16.mxu0 %vm532_vm1, %v3946_v48  ;;  %v4900_v48 = vor.u32 %v4899_v35, %v4898_v24  ;;  %v15413_v24 = vshrl.u32 %v12729_v46, 16  ;;  %v15414_v35 = vshll.u32 %v12744_v38, 16  ;;  %v15416_v63 = vshrl.u32 %v12744_v38, 16 }
 0x286   : > { %v4901_v39 = vsel %vm4817_vm5, %v4896_v4, %v4900_v48  ;;  %v4905_v28 = vsel %vm4817_vm5, %v4900_v48, %v4904_v53  ;;  %v4031_v4 = vshll.u32 %v12757_v20, 16  ;;  %v3973_v12 = vor.u32 %v15413_v24, %v3969_v57  ;;  %v12785_v48 = vld [vmem:[%s11540_s21 + $0xcc] sm:$0xff]  }
 0x287   : > { %10423 = vmatprep.mubr.msk.bf16.mxu1 %vm532_vm1, %v4901_v39  ;;  %v4035_v39 = vshrl.u32 %v12757_v20, 16  ;;  %v3977_v18 = vrot.slane %v15414_v35, 1  ;;  %v4039_v35 = vshll.u32 %v12785_v48, 16  ;;  %v4919_v57 = vshrl.u32 %v11345_v33, 16 }
 0x288   : > { %10424 = vmatmul.mubr.msk.bf16.gmra.mrb[4].mxu1 %vm532_vm1, %v4905_v28  ;;  %v4911_v0 = vrot.slane %v4031_v4, 2 }
 0x289   : > { %v4910_v28 = vrot.slane %v4035_v39, 1  ;;  %v3978_v24 = vsel %vm3132_vm4, %v3973_v12, %v3977_v18  ;;  %v4922_v12 = vshll.u32 %v11345_v33, 16  ;;  %v5586_v33 = vld [vmem:[%s15367_s5 + $0x60] sm:$0xff] }
 0x28b   : > { %10308 = vmatmul.mubr.msk.bf16.gmra.mrb[20].mxu0 %vm532_vm1, %v3954_v26  ;;  %v4907_v26 = vrot.slane %v4023_v7, 2  ;;  %v4912_v36 = vor.u32 %v4911_v0, %v4910_v28  ;;  %v4915_v0 = vrot.slane %v4039_v35, 2  ;;  %v4921_v28 = vrot.slane %v4919_v57, 1 }
 0x28c   : > { %10311 = vmatprep.mubr.msk.bf16.mxu0 %vm532_vm1, %v3962_v5 }
 0x28d   : > { %v4908_v5 = vor.u32 %v4907_v26, %v4906_v42  ;;  %v4043_v42 = vshrl.u32 %v12785_v48, 16 }
 0x28f   : > { %v4909_v17 = vsel %vm4817_vm5, %v4904_v53, %v4908_v5  ;;  %v4913_v26 = vsel %vm4817_vm5, %v4908_v5, %v4912_v36  ;;  %v3981_v53 = vor.u32 %v15416_v63, %v3977_v18 }
 0x290   : > { %10427 = vmatprep.mubr.msk.bf16.mxu1 %vm532_vm1, %v4909_v17  ;;  %v4914_v17 = vrot.slane %v4043_v42, 1 }
 0x291   : > { %10428 = vmatmul.mubr.msk.bf16.gmra.mrb[8].mxu1 %vm532_vm1, %v4913_v26  ;;  %v3986_v26 = vsel %vm3132_vm4, %v3981_v53, %v3985_v50 }
 0x292   : > { %v4916_v5 = vor.u32 %v4915_v0, %v4914_v17  ;;  %v4017_v17 = vrot.slane %v4015_v22, 1  ;;  %v4025_v22 = vrot.slane %v4023_v7, 1  ;;  %v4033_v7 = vrot.slane %v4031_v4, 1 }
 0x293   : > { %10312 = vmatmul.mubr.msk.bf16.gmra.mrb[24].mxu0 %vm532_vm1, %v3970_v29  ;;  %v3989_v29 = vor.u32 %v3987_v25, %v3985_v50  ;;  %v4001_v25 = vrot.slane %v3999_v37, 1  ;;  %v11432_v50 = vmov 0   ;;  %v4041_v4 = vrot.slane %v4039_v35, 1  ;;  %v5592_v35 = vld [vmem:[%s15367_s5 + $0x90] sm:$0xff] }
 0x294   : > { %10315 = vmatprep.mubr.msk.bf16.mxu0 %vm532_vm1, %v3978_v24  ;;  %v4924_v24 = vrot.slane %v4922_v12, 2  ;;  %v4917_v18 = vsel %vm4817_vm5, %v4912_v36, %v4916_v5  ;;  %v3997_v36 = vor.u32 %v3995_v49, %v3993_v55  ;;  %5910 = vst.msk [vmem:[#allocation2] sm:$0xff] %vm532_vm1, %v11432_v50  ;;  %5915 = vst.msk [vmem:[#allocation2 + $0xd0] sm:$0xff] %vm532_vm1, %v11432_v50  ;;  %11207 = vset.pattern.permute.xlu0 %v11432_v50 }
 0x295   : > { %v3994_v63 = vsel %vm3132_vm4, %v3989_v29, %v3993_v55  ;;  %10431 = vmatprep.mubr.msk.bf16.mxu1 %vm532_vm1, %v4917_v18  ;;  %v4005_v37 = vor.u32 %v4003_v45, %v4001_v25  ;;  %11208 = vset.pattern.permute.xlu1 %v11432_v50  ;;  %v5587_v45 = vld [vmem:[%s15367_s5 + $0x68] sm:$0xff]  ;;  %v4021_v57 = vor.u32 %v4019_v34, %v4017_v17  ;;  %v5590_v29 = vld [vmem:[%s15367_s5 + $0x80] sm:$0xff]  ;;  %v5576_v18 = vld [vmem:[%s15367_s5 + $0x10] sm:$0xff] }
 0x296   : > { %v4925_v14 = vor.u32 %v4924_v24, %v4921_v28  ;;  %5684 = vperm.xlu0 %11207, %v5586_v33   ;;  %v4002_v49 = vsel %vm3132_vm4, %v3997_v36, %v4001_v25  ;;  %v5591_v55 = vld [vmem:[%s15367_s5 + $0x88] sm:$0xff]  ;;  %v5574_v34 = vld [vmem:[%s15367_s5] sm:$0xff]  ;;  %v4029_v28 = vor.u32 %v4027_v27, %v4025_v22  ;;  %v12882_v24 = vld [vmem:[%s11540_s21 + $0xd4] ss:$0 sps:$4 sm:$0x11]  }
 0x297   : > { %v4402_v25 = vld [vmem:[%s11540_s21 + $0x14] sm:$0xe]  ;;  %v4047_v33 = vshll.u32 %v12882_v24, 16  ;;  %5914 = vst.msk [vmem:[#allocation2 + $0xc8] sm:$0xf0] %vm5913_vm7, %v11432_v50  ;;  %s15321_s21 = scalar_lea.sflag [#allocation4], %s284_s15 }
 0x298   : > { %v4926_v54 = vsel %vm4817_vm5, %v4916_v5, %v4925_v14  ;;  %v5588_v14 = vld [vmem:[%s15367_s5 + $0x70] sm:$0xff]  ;;  %v5575_v5 = vld [vmem:[%s15367_s5 + $0x8] sm:$0xff]  ;;  %v4034_v27 = vsel %vm3132_vm4, %v4029_v28, %v4033_v7  ;;  %v12899_v36 = vcombine.low %v4402_v25, %v12540_v2  ;;  %v4419_v28 = vrot.slane %v12584_v11, 1  ;;  %v5598_v25 = vld [vmem:[%s15367_s5 + $0xc0] sm:$0xff]  ;;  %5912 = vst.msk [vmem:[#allocation2 + $0x8] sm:$0xf] %vm5911_vm8, %v11432_v50 }
 0x299   : > { %10432 = vmatmul.mubr.msk.bf16.gmra.mrb[12].mxu1 %vm532_vm1, %v4926_v54  ;;  %5694 = vperm.xlu1 %11208, %v5588_v14   ;;  %v5577_v54 = vld [vmem:[%s15367_s5 + $0x18] sm:$0xff] }
 0x29a   : > { %5689 = vperm.xlu0 %11207, %v5587_v45   ;;  %v5593_v14 = vld [vmem:[%s15367_s5 + $0x98] sm:$0xff]  ;;  %v4410_v2 = vrot.slane %v12899_v36, 1 }
 0x29b   : > { %10316 = vmatmul.mubr.msk.bf16.gmra.mrb[28].mxu0 %vm532_vm1, %v3986_v26  ;;  %v4037_v26 = vor.u32 %v4035_v39, %v4033_v7  ;;  %v5596_v7 = vld [vmem:[%s15367_s5 + $0xb0] sm:$0xff] }
 0x29c   : > { %10319 = vmatprep.mubr.msk.bf16.mxu0 %vm532_vm1, %v3994_v63  ;;  %v4009_v63 = vrot.slane %v4007_v13, 1  ;;  %v5589_v13 = vld [vmem:[%s15367_s5 + $0x78] sm:$0xff] }
 0x29d   : > { %5699 = vperm.xlu1 %11208, %v5589_v13   ;;  %v4042_v39 = vsel %vm3132_vm4, %v4037_v26, %v4041_v4  ;;  %v5594_v13 = vld [vmem:[%s15367_s5 + $0xa0] sm:$0xff] }
 0x29e   : > { %v4010_v53 = vsel %vm3132_vm4, %v4005_v37, %v4009_v63  ;;  %v4013_v0 = vor.u32 %v4011_v52, %v4009_v63  ;;  %5704 = vperm.xlu0 %11207, %v5590_v29   ;;  %v4026_v52 = vsel %vm3132_vm4, %v4021_v57, %v4025_v22  ;;  %v4045_v37 = vor.u32 %v4043_v42, %v4041_v4  ;;  %v5580_v29 = vld [vmem:[%s15367_s5 + $0x30] sm:$0xff]  ;;  %v5582_v26 = vld [vmem:[%s15367_s5 + $0x40] sm:$0xff]  ;;  %v5583_v4 = vld [vmem:[%s15367_s5 + $0x48] sm:$0xff] }
 0x29f   : > { %v4049_v63 = vrot.slane %v4047_v33, 1  ;;  %v4413_v57 = vrot.slane %v12556_v47, 1  ;;  %v4415_v22 = vrot.slane %v12562_v6, 1  ;;  %v4423_v33 = vrot.slane %v12607_v9, 1 }
 0x2a0   : > { %v4018_v12 = vsel %vm3132_vm4, %v4013_v0, %v4017_v17  ;;  %v5579_v17 = vld [vmem:[%s15367_s5 + $0x28] sm:$0xff] }
 0x2a1   : > { %5709 = vperm.xlu1 %11208, %v5591_v55   ;;  %v4050_v45 = vsel %vm3132_vm4, %v4045_v37, %v4049_v63  ;;  %v5595_v0 = vld [vmem:[%s15367_s5 + $0xa8] sm:$0xff]  ;;  %v5581_v55 = vld [vmem:[%s15367_s5 + $0x38] sm:$0xff]  ;;  %v5600_v63 = vld [vmem:[%s15367_s5 + $0xd0] sm:$0xff] }
 0x2a2   : > { %5624 = vperm.xlu0 %11207, %v5574_v34   ;;  %v5597_v34 = vld [vmem:[%s15367_s5 + $0xb8] sm:$0xff] }
 0x2a3   : > { %10320 = vmatmul.mubr.msk.bf16.gmra.mrb[32].mxu0 %vm532_vm1, %v4002_v49  ;;  %v4411_v49 = vrot.slane %v12549_v62, 1  ;;  %v4834_v62 = vrot.slane %v3883_v30, 1  ;;  %v15547_v30 = vshrl.u32 %v12584_v11, 16 }
 0x2a4   : > { %10323 = vmatprep.mubr.msk.bf16.mxu0 %vm532_vm1, %v4010_v53  ;;  %v5578_v53 = vld [vmem:[%s15367_s5 + $0x20] sm:$0xff] }
 0x2a5   : > { %5629 = vperm.xlu1 %11208, %v5575_v5   ;;  %v4412_v42 = vsel %vm4409_vm6, %v4410_v2, %v4411_v49  ;;  %v4417_v5 = vrot.slane %v12574_v59, 1  ;;  %v5601_v2 = vld [vmem:[%s15367_s5 + $0xd8] sm:$0xff]  ;;  %v4842_v6 = vrot.slane %v15547_v30, 1 }
 0x2a6   : > { %5634 = vperm.xlu0 %11207, %v5576_v18  }
 0x2a7   : > { %v4418_v18 = vsel %vm4409_vm6, %v4415_v22, %v4417_v5 }
 0x2a9   : > { %5639 = vperm.xlu1 %11208, %v5577_v54   ;;  %v5599_v54 = vld [vmem:[%s15367_s5 + $0xc8] sm:$0xff] }
 0x2aa   : > { %5714 = vperm.xlu0 %11207, %v5592_v35   ;;  %v5585_v35 = vld [vmem:[%s15367_s5 + $0x58] sm:$0xff] }
 0x2ab   : > { %10324 = vmatmul.mubr.msk.bf16.gmra.mrb[36].mxu0 %vm532_vm1, %v4018_v12  ;;  %v4414_v12 = vsel %vm4409_vm6, %v4411_v49, %v4413_v57  ;;  %v4425_v49 = vrot.slane %v12620_v16, 1 }
 0x2ac   : > { %10327 = vmatprep.mubr.msk.bf16.mxu0 %vm532_vm1, %v4026_v52  ;;  %v4416_v52 = vsel %vm4409_vm6, %v4413_v57, %v4415_v22  ;;  %v5605_v57 = vld [vmem:[%s15367_s5 + $0xf8] sm:$0xff]  ;;  %v4429_v22 = vrot.slane %v12642_v10, 1 }
 0x2ad   : > { %5719 = vperm.xlu1 %11208, %v5593_v14  }
 0x2ae   : > { %5644 = vperm.xlu0 %11207, %v5578_v53   ;;  %v4427_v53 = vrot.slane %v12630_v40, 1 }
 0x2b1   : > { %5649 = vperm.xlu1 %11208, %v5579_v17   ;;  %v5602_v17 = vld [vmem:[%s15367_s5 + $0xe0] sm:$0xff] }
 0x2b2   : > { %5724 = vperm.xlu0 %11207, %v5594_v13   ;;  %v4428_v13 = vsel %vm4409_vm6, %v4425_v49, %v4427_v53 }
 0x2b3   : > { %10328 = vmatmul.mubr.msk.bf16.gmra.mrb[40].mxu0 %vm532_vm1, %v4034_v27  ;;  %v4421_v27 = vrot.slane %v12596_v41, 1 }
 0x2b4   : > { %10331 = vmatprep.mubr.msk.bf16.mxu0 %vm532_vm1, %v4042_v39  ;;  %v5584_v39 = vld [vmem:[%s15367_s5 + $0x50] sm:$0xff] }
 0x2b5   : > { %5729 = vperm.xlu1 %11208, %v5595_v0   ;;  %v4422_v14 = vsel %vm4409_vm6, %v4419_v28, %v4421_v27  ;;  %v4424_v37 = vsel %vm4409_vm6, %v4421_v27, %v4423_v33  ;;  %v5604_v0 = vld [vmem:[%s15367_s5 + $0xf0] sm:$0xff]  ;;  %v5613_v27 = vld [vmem:[%s15367_s5 + $0x138] sm:$0xff] }
 0x2b6   : > { %5654 = vperm.xlu0 %11207, %v5580_v29   ;;  %v4431_v29 = vrot.slane %v12652_v8, 1 }
 0x2b9   : > { %5659 = vperm.xlu1 %11208, %v5581_v55   ;;  %v5606_v55 = vld [vmem:[%s15367_s5 + $0x100] sm:$0xff] }
 0x2ba   : > { %5734 = vperm.xlu0 %11207, %v5596_v7   ;;  %v4432_v7 = vsel %vm4409_vm6, %v4429_v22, %v4431_v29 }
 0x2bb   : > { %10332 = vmatmul.mubr.msk.bf16.gmra.mrb[44].mxu0 %vm532_vm1, %v4050_v45  ;;  %v5603_v45 = vld [vmem:[%s15367_s5 + $0xe8] sm:$0xff] }
 0x2bc   : > { %10337 = vmatprep.mubr.msk.bf16.mxu0 %vm532_vm1, %v4412_v42  ;;  %v4426_v42 = vsel %vm4409_vm6, %v4423_v33, %v4425_v49  ;;  %v4437_v33 = vrot.slane %v12729_v46, 1  ;;  %v5617_v49 = vld [vmem:[%s15367_s5 + $0x158] sm:$0xff] }
 0x2bd   : > { %5739 = vperm.xlu1 %11208, %v5597_v34   ;;  %v5608_v34 = vld [vmem:[%s15367_s5 + $0x110] sm:$0xff] }
 0x2be   : > { %5664 = vperm.xlu0 %11207, %v5582_v26   ;;  %v4435_v26 = vrot.slane %v12695_v15, 1 }
 0x2c1   : > { %5669 = vperm.xlu1 %11208, %v5583_v4   ;;  %v5610_v4 = vld [vmem:[%s15367_s5 + $0x120] sm:$0xff] }
 0x2c2   : > { %5744 = vperm.xlu0 %11207, %v5598_v25  }
 0x2c3   : > { %10338 = vmatmul.mubr.msk.bf16.vlgmr.msra.gmra.mrb[0].mxu0 %vm532_vm1, %v4414_v12  ;;  %v5607_v12 = vld [vmem:[%s15367_s5 + $0x108] sm:$0xff] }
 0x2c4   : > { %10386 = vmatpush3.bf16.msra.mxu0 %v12527_v51  ;;  %10341 = vmatprep.mubr.msk.bf16.mxu0 %vm532_vm1, %v4416_v52  ;;  %v4420_v51 = vsel %vm4409_vm6, %v4417_v5, %v4419_v28  ;;  %v4430_v52 = vsel %vm4409_vm6, %v4427_v53, %v4429_v22  ;;  %v5609_v5 = vld [vmem:[%s15367_s5 + $0x118] sm:$0xff]  ;;  %v4433_v28 = vrot.slane %v12678_v61, 1  ;;  %v4441_v53 = vrot.slane %v12655_v1, 1  ;;  %v5620_v1 = vld [vmem:[%s15367_s5 + $0x170] sm:$0xff] }
 0x2c5   : > { %5749 = vperm.xlu1 %11208, %v5599_v54   ;;  %v5612_v54 = vld [vmem:[%s15367_s5 + $0x130] sm:$0xff]  ;;  %v4447_v22 = vrot.slane %v12700_v44, 1  ;;  %v4451_v44 = vrot.slane %v12747_v58, 1 }
 0x2c6   : > { %5674 = vperm.xlu0 %11207, %v5584_v39   ;;  %v4436_v25 = vsel %vm4409_vm6, %v4433_v28, %v4435_v26  ;;  %v4439_v39 = vrot.slane %v12744_v38, 1 }
 0x2c9   : > { %5679 = vperm.xlu1 %11208, %v5585_v35   ;;  %v5614_v35 = vld [vmem:[%s15367_s5 + $0x140] sm:$0xff] }
 0x2ca   : > { %5754 = vperm.xlu0 %11207, %v5600_v63   ;;  %v4440_v63 = vsel %vm4409_vm6, %v4437_v33, %v4439_v39 }
 0x2cb   : > { %10342 = vmatmul.mubr.msk.bf16.gmra.mrb[4].mxu0 %vm532_vm1, %v4418_v18  ;;  %v5611_v18 = vld [vmem:[%s15367_s5 + $0x128] sm:$0xff] }
 0x2cc   : > { %10345 = vmatprep.mubr.msk.bf16.mxu0 %vm532_vm1, %v4420_v51  ;;  %v4434_v51 = vsel %vm4409_vm6, %v4431_v29, %v4433_v28  ;;  %v8912_v29 = vld [vmem:[%s15366_s4 + $0x8] sm:$0xff]  ;;  %v4455_v28 = vrot.slane %v12785_v48, 1 }
 0x2cd   : > { %5759 = vperm.xlu1 %11208, %v5601_v2   ;;  %v5616_v2 = vld [vmem:[%s15367_s5 + $0x150] sm:$0xff] }
 0x2ce   : > { %5764 = vperm.xlu0 %11207, %v5602_v17   ;;  %v4443_v17 = vrot.slane %v12660_v60, 1  ;;  %v5621_v60 = vld [vmem:[%s15367_s5 + $0x178] sm:$0xff] }
 0x2d1   : > { %5769 = vperm.xlu1 %11208, %v5603_v45   ;;  %v5618_v45 = vld [vmem:[%s15367_s5 + $0x160] sm:$0xff] }
 0x2d2   : > { %5774 = vperm.xlu0 %11207, %v5604_v0   ;;  %v4444_v0 = vsel %vm4409_vm6, %v4441_v53, %v4443_v17 }
 0x2d3   : > { %10346 = vmatmul.mubr.msk.bf16.gmra.mrb[8].mxu0 %vm532_vm1, %v4422_v14  ;;  %v5615_v14 = vld [vmem:[%s15367_s5 + $0x148] sm:$0xff] }
 0x2d4   : > { %10349 = vmatprep.mubr.msk.bf16.mxu0 %vm532_vm1, %v4424_v37  ;;  %v4438_v37 = vsel %vm4409_vm6, %v4435_v26, %v4437_v33  ;;  %v4819_v26 = vshrl.u32 %v12899_v36, 16 }
 0x2d5   : > { %5779 = vperm.xlu1 %11208, %v5605_v57   ;;  %v4445_v57 = vrot.slane %v12663_v3, 1  ;;  %v4449_v3 = vrot.slane %v12712_v19, 1 }
 0x2d6   : > { %5784 = vperm.xlu0 %11207, %v5606_v55   ;;  %v8911_v55 = vld [vmem:[%s15366_s4] sm:$0xff] }
 0x2d9   : > { %5789 = vperm.xlu1 %11208, %v5607_v12   ;;  %v4446_v12 = vsel %vm4409_vm6, %v4443_v17, %v4445_v57 }
 0x2da   : > { %5794 = vperm.xlu0 %11207, %v5608_v34   ;;  %v4452_v34 = vsel %vm4409_vm6, %v4449_v3, %v4451_v44 }
 0x2db   : > { %10350 = vmatmul.mubr.msk.bf16.gmra.mrb[12].mxu0 %vm532_vm1, %v4426_v42  ;;  %v5619_v42 = vld [vmem:[%s15367_s5 + $0x168] sm:$0xff] }
 0x2dc   : > { %10353 = vmatprep.mubr.msk.bf16.mxu0 %vm532_vm1, %v4428_v13  ;;  %v4442_v13 = vsel %vm4409_vm6, %v4439_v39, %v4441_v53  ;;  %v4831_v39 = vrot.slane %v3871_v32, 2  ;;  %v15546_v32 = vshll.u32 %v12574_v59, 16 }
 0x2dd   : > { %5799 = vperm.xlu1 %11208, %v5609_v5   ;;  %v4453_v5 = vrot.slane %v12757_v20, 1  ;;  %v4457_v20 = vrot.slane %v12882_v24, 1 }
 0x2de   : > { %5804 = vperm.xlu0 %11207, %v5610_v4   ;;  %v4822_v4 = vshll.u32 %v12899_v36, 16 }
 0x2df   : > { %v4454_v19 = vsel %vm4409_vm6, %v4451_v44, %v4453_v5  ;;  %v4456_v58 = vsel %vm4409_vm6, %v4453_v5, %v4455_v28  ;;  %v4458_v33 = vsel %vm4409_vm6, %v4455_v28, %v4457_v20 }
 0x2e1   : > { %5809 = vperm.xlu1 %11208, %v5611_v18   ;;  %v4821_v18 = vrot.slane %v4819_v26, 1 }
 0x2e2   : > { %5814 = vperm.xlu0 %11207, %v5612_v54   ;;  %v4827_v54 = vrot.slane %v3863_v43, 2  ;;  %v4835_v43 = vrot.slane %v3879_v31, 2  ;;  %v15548_v31 = vshll.u32 %v12584_v11, 16 }
 0x2e3   : > { %10354 = vmatmul.mubr.msk.bf16.gmra.mrb[16].mxu0 %vm532_vm1, %v4430_v52  ;;  %v4448_v52 = vsel %vm4409_vm6, %v4445_v57, %v4447_v22 }
 0x2e4   : > { %10357 = vmatprep.mubr.msk.bf16.mxu0 %vm532_vm1, %v4432_v7  ;;  %v4450_v7 = vsel %vm4409_vm6, %v4447_v22, %v4449_v3 }
 0x2e5   : > { %5819 = vperm.xlu1 %11208, %v5613_v27   ;;  %v4830_v27 = vrot.slane %v3875_v23, 1 }
 0x2e6   : > { %5824 = vperm.xlu0 %11207, %v5614_v35   ;;  %v4836_v35 = vor.u32 %v4835_v43, %v4834_v62  ;;  %v15563_v43 = vshrl.u32 %v12695_v15, 16 }
 0x2e7   : > { %v4832_v24 = vor.u32 %v4831_v39, %v4830_v27  ;;  %v15562_v39 = vshll.u32 %v12678_v61, 16 }
 0x2e9   : > { %5829 = vperm.xlu1 %11208, %v5615_v14   ;;  %v15545_v14 = vshrl.u32 %v12574_v59, 16 }
 0x2ea   : > { %5834 = vperm.xlu0 %11207, %v5616_v2   ;;  %v4843_v2 = vrot.slane %v15548_v31, 2  ;;  %v15568_v31 = vshll.u32 %v12744_v38, 16 }
 0x2eb   : > { %10358 = vmatmul.mubr.msk.bf16.gmra.mrb[20].mxu0 %vm532_vm1, %v4434_v51  ;;  %v4824_v51 = vrot.slane %v4822_v4, 2  ;;  %v4838_v47 = vrot.slane %v15545_v14, 1 }
 0x2ec   : > { %10361 = vmatprep.mubr.msk.bf16.mxu0 %vm532_vm1, %v4436_v25  ;;  %v4826_v25 = vrot.slane %v3867_v56, 1  ;;  %v4844_v53 = vor.u32 %v4843_v2, %v4842_v6  ;;  %v15567_v6 = vshrl.u32 %v12744_v38, 16  ;;  %v4883_v2 = vrot.slane %v15568_v31, 2 }
 0x2ed   : > { %5839 = vperm.xlu1 %11208, %v5617_v49   ;;  %v4825_v48 = vor.u32 %v4824_v51, %v4821_v18 }
 0x2ee   : > { %5844 = vperm.xlu0 %11207, %v5618_v45   ;;  %v4828_v36 = vor.u32 %v4827_v54, %v4826_v25  ;;  %v15549_v45 = vshrl.u32 %v12596_v41, 16  ;;  %v15559_v25 = vshrl.u32 %v12652_v8, 16  ;;  %v15560_v54 = vshll.u32 %v12652_v8, 16 }
 0x2ef   : > { %v4874_v8 = vrot.slane %v15563_v43, 1 }
 0x2f0   : > { %v4829_v56 = vsel %vm4817_vm5, %v4825_v48, %v4828_v36  ;;  %v4833_v23 = vsel %vm4817_vm5, %v4828_v36, %v4832_v24  ;;  %v4846_v59 = vrot.slane %v15549_v45, 1  ;;  %v4867_v20 = vrot.slane %v15560_v54, 2 }
 0x2f1   : > { %5849 = vperm.xlu1 %11208, %v5619_v42   ;;  %v15550_v42 = vshll.u32 %v12596_v41, 16 }
 0x2f2   : > { %5854 = vperm.xlu0 %11207, %v5620_v1   ;;  %v15551_v1 = vshrl.u32 %v12607_v9, 16 }
 0x2f3   : > { %10362 = vmatmul.mubr.msk.bf16.gmra.mrb[24].mxu0 %vm532_vm1, %v4438_v37  ;;  %v4839_v37 = vrot.slane %v15546_v32, 2  ;;  %v15565_v32 = vshrl.u32 %v12729_v46, 16 }
 0x2f4   : > { %10365 = vmatprep.mubr.msk.bf16.mxu0 %vm532_vm1, %v4440_v63  ;;  %v4837_v63 = vsel %vm4817_vm5, %v4832_v24, %v4836_v35  ;;  %v4850_v11 = vrot.slane %v15551_v1, 1  ;;  %v15564_v24 = vshll.u32 %v12695_v15, 16  ;;  %v4882_v15 = vrot.slane %v15567_v6, 1 }
 0x2f5   : > { %5859 = vperm.xlu1 %11208, %v5621_v60   ;;  %v4840_v49 = vor.u32 %v4839_v37, %v4838_v47  ;;  %v15552_v60 = vshll.u32 %v12607_v9, 16  ;;  %v15566_v37 = vshll.u32 %v12729_v46, 16 }
 0x2f6   : > { %8915 = vperm.xlu0 %11207, %v8911_v55  }
 0x2f7   : > { %v4841_v17 = vsel %vm4817_vm5, %v4836_v35, %v4840_v49  ;;  %v4851_v57 = vrot.slane %v15552_v60, 2  ;;  %v4875_v35 = vrot.slane %v15564_v24, 2 }
 0x2f9   : > { %8920 = vperm.xlu1 %11208, %v8912_v29   ;;  %v4852_v29 = vor.u32 %v4851_v57, %v4850_v11  ;;  %v4876_v14 = vor.u32 %v4875_v35, %v4874_v8 }
 0x2fb   : > { %10366 = vmatmul.mubr.msk.bf16.gmra.mrb[28].mxu0 %vm532_vm1, %v4442_v13  ;;  %v4847_v13 = vrot.slane %v15550_v42, 2 }
 0x2fc   : > { %10369 = vmatprep.mubr.msk.bf16.mxu0 %vm532_vm1, %v4444_v0  ;;  %v4845_v0 = vsel %vm4817_vm5, %v4840_v49, %v4844_v53 }
 0x2fd   : > { %v4848_v22 = vor.u32 %v4847_v13, %v4846_v59 }
 0x2ff   : > { %v4849_v55 = vsel %vm4817_vm5, %v4844_v53, %v4848_v22  ;;  %v4853_v44 = vsel %vm4817_vm5, %v4848_v22, %v4852_v29  ;;  %v4884_v53 = vor.u32 %v4883_v2, %v4882_v15 }
 0x301   : > { %v4889_v38 = vsel %vm4817_vm5, %v4884_v53, %v12702_v21 }
 0x303   : > { %10370 = vmatmul.mubr.msk.bf16.gmra.mrb[32].mxu0 %vm532_vm1, %v4446_v12  ;;  %v15553_v12 = vshrl.u32 %v12620_v16, 16 }
 0x304   : > { %10373 = vmatprep.mubr.msk.bf16.mxu0 %vm532_vm1, %v4448_v52  ;;  %v15554_v52 = vshll.u32 %v12620_v16, 16 }
 0x305   : > { %v4854_v41 = vrot.slane %v15553_v12, 1 }
 0x306   : > { %v4855_v3 = vrot.slane %v15554_v52, 2 }
 0x308   : > { %v4856_v28 = vor.u32 %v4855_v3, %v4854_v41 }
 0x30a   : > { %v4857_v4 = vsel %vm4817_vm5, %v4852_v29, %v4856_v28 }
 0x30b   : > { %10374 = vmatmul.mubr.msk.bf16.gmra.mrb[36].mxu0 %vm532_vm1, %v4450_v7  ;;  %v15555_v7 = vshrl.u32 %v12630_v40, 16 }
 0x30c   : > { %10377 = vmatprep.mubr.msk.bf16.mxu0 %vm532_vm1, %v4452_v34  ;;  %v15556_v34 = vshll.u32 %v12630_v40, 16  ;;  %v4866_v40 = vrot.slane %v15559_v25, 1 }
 0x30d   : > { %v4858_v9 = vrot.slane %v15555_v7, 1 }
 0x30e   : > { %v4859_v5 = vrot.slane %v15556_v34, 2  ;;  %v4868_v36 = vor.u32 %v4867_v20, %v4866_v40 }
 0x310   : > { %v4860_v26 = vor.u32 %v4859_v5, %v4858_v9 }
 0x312   : > { %v4861_v51 = vsel %vm4817_vm5, %v4856_v28, %v4860_v26 }
 0x313   : > { %10378 = vmatmul.mubr.msk.bf16.gmra.mrb[40].mxu0 %vm532_vm1, %v4454_v19  ;;  %v15557_v19 = vshrl.u32 %v12642_v10, 16 }
 0x314   : > { %10381 = vmatprep.mubr.msk.bf16.mxu0 %vm532_vm1, %v4456_v58  ;;  %v15558_v58 = vshll.u32 %v12642_v10, 16 }
 0x315   : > { %v4862_v16 = vrot.slane %v15557_v19, 1  ;;  %v13222_v3 = vpop.permute.xlu0 %5684 }
 0x316   : > { %v4863_v18 = vrot.slane %v15558_v58, 2 }
 0x318   : > { %v4864_v48 = vor.u32 %v4863_v18, %v4862_v16 }
 0x319   : > { %v13226_v7 = vpop.permute.xlu0 %5689 }
 0x31a   : > { %v4865_v27 = vsel %vm4817_vm5, %v4860_v26, %v4864_v48  ;;  %v4869_v62 = vsel %vm4817_vm5, %v4864_v48, %v4868_v36 }
 0x31b   : > { %10382 = vmatmul.mubr.msk.bf16.gmra.mrb[44].mxu0 %vm532_vm1, %v4458_v33  ;;  %v15561_v33 = vshrl.u32 %v12678_v61, 16  ;;  %v4878_v61 = vrot.slane %v15565_v32, 1  ;;  %v13294_v32 = vld [vmem:[%s15364_s2] ss:$0 sm:$0xff] }
 0x31c   : > { %10387 = vmatprep.mubr.msk.bf16.mxu0 %vm532_vm1, %v4829_v56  ;;  %v4871_v56 = vrot.slane %v15562_v39, 2 }
 0x31d   : > { %v4870_v10 = vrot.slane %v15561_v33, 1  ;;  %v13230_v34 = vpop.permute.xlu0 %5704 }
 0x321   : > { %v13234_v28 = vpop.permute.xlu0 %5624 }
 0x323   : > { %10388 = vmatmul.mubr.msk.bf16.vlgmr.msra.gmra.mrb[0].mxu0 %vm532_vm1, %v4833_v23  ;;  %v4872_v23 = vor.u32 %v4871_v56, %v4870_v10 }
 0x324   : > { %10391 = vmatprep.mubr.msk.bf16.mxu0 %vm532_vm1, %v4837_v63  ;;  %v4879_v63 = vrot.slane %v15566_v37, 2 }
 0x325   : > { %v4873_v47 = vsel %vm4817_vm5, %v4868_v36, %v4872_v23  ;;  %v4877_v30 = vsel %vm4817_vm5, %v4872_v23, %v4876_v14  ;;  %v13243_v19 = vpop.permute.xlu0 %5634 }
 0x326   : > { %v4880_v49 = vor.u32 %v4879_v63, %v4878_v61 }
 0x328   : > { %v4885_v45 = vsel %vm4817_vm5, %v4880_v49, %v4884_v53 }
 0x329   : > { %v13247_v58 = vpop.permute.xlu0 %5714 }
 0x32b   : > { %10392 = vmatmul.mubr.msk.bf16.gmra.mrb[4].mxu0 %vm532_vm1, %v4841_v17  ;;  %v4881_v17 = vsel %vm4817_vm5, %v4876_v14, %v4880_v49 }
 0x32c   : > { %10395 = vmatprep.mubr.msk.bf16.mxu0 %vm532_vm1, %v4845_v0 }
 0x333   : > { %10396 = vmatmul.mubr.msk.bf16.gmra.mrb[8].mxu0 %vm532_vm1, %v4849_v55 }
 0x334   : > { %10399 = vmatprep.mubr.msk.bf16.mxu0 %vm532_vm1, %v4853_v44  ;;  %v13224_v44 = vpop.permute.xlu1 %5694 }
 0x338   : > { %v13228_v9 = vpop.permute.xlu1 %5699 }
 0x33b   : > { %10400 = vmatmul.mubr.msk.bf16.gmra.mrb[12].mxu0 %vm532_vm1, %v4857_v4  ;;  %v15418_v4 = vmov 0.0  }
 0x33c   : > { %10403 = vmatprep.mubr.msk.bf16.mxu0 %vm532_vm1, %v4861_v51  ;;  %v13232_v5 = vpop.permute.xlu1 %5709  ;;  %10555 = vmatprep.subr.bf16.mxu0 %v15418_v4  ;;  %v13251_v51 = vpop.permute.xlu0 %5644 }
 0x340   : > { %v13238_v26 = vpop.permute.xlu1 %5629  ;;  %v13255_v40 = vpop.permute.xlu0 %5724 }
 0x341   : > { %15569 = vst [vmem:[#allocation7_spill] sm:$0xff] %v13255_v40 }
 0x343   : > { %10404 = vmatmul.mubr.msk.bf16.gmra.mrb[16].mxu0 %vm532_vm1, %v4865_v27 }
 0x344   : > { %10407 = vmatprep.mubr.msk.bf16.mxu0 %vm532_vm1, %v4869_v62  ;;  %v13245_v16 = vpop.permute.xlu1 %5639  ;;  %v13259_v50 = vpop.permute.xlu0 %5654 }
 0x348   : > { %v13249_v18 = vpop.permute.xlu1 %5719  ;;  %v13263_v48 = vpop.permute.xlu0 %5734 }
 0x34b   : > { %10408 = vmatmul.mubr.msk.bf16.gmra.mrb[20].mxu0 %vm532_vm1, %v4873_v47 }
 0x34c   : > { %10411 = vmatprep.mubr.msk.bf16.mxu0 %vm532_vm1, %v4877_v30  ;;  %v13253_v25 = vpop.permute.xlu1 %5649  ;;  %v13267_v27 = vpop.permute.xlu0 %5664 }
 0x350   : > { %v13257_v54 = vpop.permute.xlu1 %5729  ;;  %v13271_v10 = vpop.permute.xlu0 %5744 }
 0x351   : > { %v10421_v46 = vpop.f32.mrb[0].mxu1  ;;  %15570 = vst [vmem:[#allocation6_spill] sm:$0xff] %v13257_v54  ;;  %15571 = vst [vmem:[#allocation8_spill] sm:$0xff] %v13271_v10 }
 0x352   : > { %v5167_v59 = vpop.f32.mrb[1].mxu1 }
 0x353   : > { %10412 = vmatmul.mubr.msk.bf16.gmra.mrb[24].mxu0 %vm532_vm1, %v4881_v17  ;;  %v10422_v42 = vpop.f32.mrb[2].mxu1 }
 0x354   : > { %10415 = vmatprep.mubr.msk.bf16.mxu0 %vm532_vm1, %v4885_v45  ;;  %v13195_v13 = vpop.f32.mrb[3].mxu1  ;;  %v13261_v20 = vpop.permute.xlu1 %5659 }
 0x355   : > { %v13275_v56 = vpop.permute.xlu0 %5674 }
 0x358   : > { %v13265_v36 = vpop.permute.xlu1 %5739 }
 0x359   : > { %v13279_v43 = vpop.permute.xlu0 %5754 }
 0x35a   : > { %15573 = vst [vmem:[#allocation9_spill] sm:$0xff] %v13279_v43 }
 0x35b   : > { %10416 = vmatmul.mubr.msk.bf16.gmra.mrb[28].mxu0 %vm532_vm1, %v4889_v38  ;;  %v13198_v0 = vpop.f32.mrb[4].mxu1 }
 0x35c   : > { %v13200_v1 = vpop.f32.mrb[5].mxu1  ;;  %v13269_v33 = vpop.permute.xlu1 %5669 }
 0x35d   : > { %v13202_v11 = vpop.f32.mrb[6].mxu1  ;;  %v13283_v24 = vpop.permute.xlu0 %5764 }
 0x35e   : > { %v13204_v60 = vpop.f32.mrb[7].mxu1  ;;  %15575 = vst [vmem:[#allocation12_spill] sm:$0xff] %v13283_v24 }
 0x360   : > { %v13273_v39 = vpop.permute.xlu1 %5749 }
 0x361   : > { %15572 = vst [vmem:[#allocation10_spill] sm:$0xff] %v13273_v39  ;;  %v13287_v23 = vpop.permute.xlu0 %5774 }
 0x362   : > { %15577 = vst [vmem:[#allocation14_spill] sm:$0xff] %v13287_v23 }
 0x364   : > { %v13206_v57 = vpop.f32.mrb[8].mxu1  ;;  %v13277_v62 = vpop.permute.xlu1 %5679 }
 0x365   : > { %v13208_v22 = vpop.f32.mrb[9].mxu1  ;;  %v5785_v2 = vpop.permute.xlu0 %5784 }
 0x366   : > { %v13210_v29 = vpop.f32.mrb[10].mxu1 }
 0x367   : > { %v13212_v21 = vpop.f32.mrb[11].mxu1 }
 0x368   : > { %v13281_v8 = vpop.permute.xlu1 %5759 }
 0x369   : > { %15574 = vst [vmem:[#allocation11_spill] sm:$0xff] %v13281_v8  ;;  %v5795_v24 = vpop.permute.xlu0 %5794 }
 0x36c   : > { %v13214_v55 = vpop.f32.mrb[12].mxu1  ;;  %v13285_v35 = vpop.permute.xlu1 %5769 }
 0x36d   : > { %v13216_v12 = vpop.f32.mrb[13].mxu1  ;;  %15576 = vst [vmem:[#allocation13_spill] sm:$0xff] %v13285_v35 }
 0x36e   : > { %v13218_v41 = vpop.f32.mrb[14].mxu1 }
 0x36f   : > { %v13220_v52 = vpop.f32.mrb[15].mxu1 }
 0x370   : > { %v13289_v14 = vpop.permute.xlu1 %5779 }
 0x371   : > { %15578 = vst [vmem:[#allocation15_spill] sm:$0xff] %v13289_v14 }
 0x374   : > { %v5790_v17 = vpop.permute.xlu1 %5789 }
 0x3d6   : > { %v10371_v47 = vpop.f32.mrb[32].mxu0 }
 0x3d7   : > { %v10617_v61 = vadd.f32 %v10421_v46, %v10371_v47  ;;  %v4699_v37 = vpop.f32.mrb[33].mxu0  ;;  %v13301_v46 = vld [vmem:[#allocation2 + $0xd0] sm:$0x1f] }
 0x3d8   : > { %v10618_v63 = vadd.f32 %v5167_v59, %v4699_v37  ;;  %v10372_v30 = vpop.f32.mrb[34].mxu0 }
 0x3d9   : > { %v5319_v6 = vadd.f32 %v10617_v61, %v13294_v32  ;;  %v10619_v15 = vadd.f32 %v10422_v42, %v10372_v30  ;;  %v4702_v31 = vpop.f32.mrb[35].mxu0 }
 0x3da   : > { %v5317_v49 = vadd.f32 %v10618_v63, %v13294_v32  ;;  %v10620_v53 = vadd.f32 %v13195_v13, %v4702_v31 }
 0x3db   : > { %v5367_v45 = vmax.f32 %v5319_v6, 0.0  ;;  %v5320_v38 = vadd.f32 %v10619_v15, %v13294_v32  ;;  %v15579_v15 = vmov 0.0  }
 0x3dc   : > { %v5365_v4 = vmax.f32 %v5317_v49, 0.0  ;;  %v5318_v35 = vadd.f32 %v10620_v53, %v13294_v32  ;;  %10571 = vmatprep.mubr.msk.bf16.mxu0 %vm11434_vm9, %v15579_v15 }
 0x3dd   : > { %v5415_v59 = vmin.f32 %v5367_v45, 1.0  ;;  %v5368_v47 = vmax.f32 %v5320_v38, 0.0 }
 0x3de   : > { %v5413_v37 = vmin.f32 %v5365_v4, 1.0  ;;  %v5366_v61 = vmax.f32 %v5318_v35, 0.0  ;;  %v10375_v42 = vpop.f32.mrb[36].mxu0  ;;  %v5800_v4 = vpop.permute.xlu1 %5799 }
 0x3df   : > { %v5416_v30 = vmin.f32 %v5368_v47, 1.0  ;;  %v10621_v14 = vadd.f32 %v13198_v0, %v10375_v42  ;;  %v4715_v63 = vpop.f32.mrb[37].mxu0  ;;  %v5463_v13 = vmul.f32 15.0, %v5415_v59 }
 0x3e0   : > { %v5414_v31 = vmin.f32 %v5366_v61, 1.0  ;;  %v10622_v49 = vadd.f32 %v13200_v1, %v4715_v63  ;;  %v5461_v53 = vmul.f32 15.0, %v5413_v37  ;;  %v10376_v45 = vpop.f32.mrb[38].mxu0 }
 0x3e1   : > { %v5323_v38 = vadd.f32 %v10621_v14, %v13294_v32  ;;  %v10623_v0 = vadd.f32 %v13202_v11, %v10376_v45  ;;  %v4718_v47 = vpop.f32.mrb[39].mxu0  ;;  %v11142_v59 = vround.rtne.f32 %v5463_v13  ;;  %v5464_v42 = vmul.f32 15.0, %v5416_v30 }
 0x3e2   : > { %v5321_v6 = vadd.f32 %v10622_v49, %v13294_v32  ;;  %v11140_v23 = vround.rtne.f32 %v5461_v53  ;;  %v10624_v39 = vadd.f32 %v13204_v60, %v4718_v47  ;;  %v5462_v61 = vmul.f32 15.0, %v5414_v31  ;;  %v5805_v49 = vpop.permute.xlu0 %5804  ;;  %v5810_v47 = vpop.permute.xlu1 %5809 }
 0x3e3   : > { %v5371_v10 = vmax.f32 %v5323_v38, 0.0  ;;  %v5324_v1 = vadd.f32 %v10623_v0, %v13294_v32  ;;  %v5560_v37 = vmul.f32 0.06666667, %v11142_v59  ;;  %v11143_v63 = vround.rtne.f32 %v5464_v42 }
 0x3e4   : > { %v5369_v35 = vmax.f32 %v5321_v6, 0.0  ;;  %v5558_v8 = vmul.f32 0.06666667, %v11140_v23  ;;  %v5322_v14 = vadd.f32 %v10624_v39, %v13294_v32  ;;  %v11141_v11 = vround.rtne.f32 %v5462_v61 }
 0x3e5   : > { %v5419_v45 = vmin.f32 %v5371_v10, 1.0  ;;  %v5372_v13 = vmax.f32 %v5324_v1, 0.0  ;;  %v5896_v30 = vmul.f32 %v5795_v24, %v5560_v37  ;;  %v5561_v43 = vmul.f32 0.06666667, %v11143_v63 }
 0x3e6   : > { %v5417_v53 = vmin.f32 %v5369_v35, 1.0  ;;  %v5894_v54 = vmul.f32 %v5785_v2, %v5558_v8  ;;  %v5370_v60 = vmax.f32 %v5322_v14, 0.0  ;;  %v5559_v31 = vmul.f32 0.06666667, %v11141_v11  ;;  %v10379_v38 = vpop.f32.mrb[40].mxu0 }
 0x3e7   : > { %v5420_v0 = vmin.f32 %v5372_v13, 1.0  ;;  %v5897_v59 = vmul.f32 %v5800_v4, %v5561_v43  ;;  %v10625_v42 = vadd.f32 %v13206_v57, %v10379_v38  ;;  %v4731_v6 = vpop.f32.mrb[41].mxu0  ;;  %v5467_v23 = vmul.f32 15.0, %v5419_v45  ;;  %v5815_v45 = vpop.permute.xlu0 %5814 }
 0x3e8   : > { %v5418_v40 = vmin.f32 %v5370_v60, 1.0  ;;  %v5895_v39 = vmul.f32 %v5790_v17, %v5559_v31  ;;  %v10626_v10 = vadd.f32 %v13208_v22, %v4731_v6  ;;  %v5465_v61 = vmul.f32 15.0, %v5417_v53  ;;  %v10380_v24 = vpop.f32.mrb[42].mxu0  ;;  %v5820_v60 = vpop.permute.xlu1 %5819 }
 0x3e9   : > { %v5933_v1 = vpack.c.bf16 %v5897_v59, %v5896_v30  ;;  %v5327_v35 = vadd.f32 %v10625_v42, %v13294_v32  ;;  %v10627_v8 = vadd.f32 %v13210_v29, %v10380_v24  ;;  %v4734_v2 = vpop.f32.mrb[43].mxu0  ;;  %v11146_v37 = vround.rtne.f32 %v5467_v23 }
 0x3ea   : > { %v5932_v63 = vpack.c.bf16 %v5895_v39, %v5894_v54  ;;  %v5325_v43 = vadd.f32 %v10626_v10, %v13294_v32  ;;  %v11144_v4 = vround.rtne.f32 %v5465_v61  ;;  %v10628_v57 = vadd.f32 %v13212_v21, %v4734_v2 }
 0x3eb   : > { %v5998_v14 = vrot.slane %v5933_v1, 4  ;;  %v5375_v11 = vmax.f32 %v5327_v35, 0.0  ;;  %v5328_v17 = vadd.f32 %v10627_v8, %v13294_v32  ;;  %v5466_v22 = vmul.f32 15.0, %v5418_v40 }
 0x3ec   : > { %v13322_v13 = vrot.slane %v5932_v63, 4  ;;  %v5373_v30 = vmax.f32 %v5325_v43, 0.0  ;;  %v5562_v53 = vmul.f32 0.06666667, %v11144_v4  ;;  %v5326_v29 = vadd.f32 %v10628_v57, %v13294_v32  ;;  %v5825_v57 = vpop.permute.xlu0 %5824 }
 0x3ed   : > { %v5423_v31 = vmin.f32 %v5375_v11, 1.0  ;;  %v5376_v54 = vmax.f32 %v5328_v17, 0.0  ;;  %v11145_v38 = vround.rtne.f32 %v5466_v22  ;;  %v5564_v59 = vmul.f32 0.06666667, %v11146_v37 }
 0x3ee   : > { %v5999_v21 = vsel %vm5964_vm10, %v13322_v13, %v5998_v14  ;;  %v5421_v42 = vmin.f32 %v5373_v30, 1.0  ;;  %v5898_v6 = vmul.f32 %v5805_v49, %v5562_v53  ;;  %v5374_v23 = vmax.f32 %v5326_v29, 0.0  ;;  %v10383_v39 = vpop.f32.mrb[44].mxu0  ;;  %v5830_v53 = vpop.permute.xlu1 %5829 }
 0x3ef   : > { %6054 = vst.msk [vmem:[#allocation2 + $0x90] sm:$0xff] %vm532_vm1, %v5999_v21  ;;  %v5424_v40 = vmin.f32 %v5376_v54, 1.0  ;;  %v5563_v10 = vmul.f32 0.06666667, %v11145_v38  ;;  %v5900_v61 = vmul.f32 %v5815_v45, %v5564_v59  ;;  %v5468_v24 = vmul.f32 15.0, %v5420_v0  ;;  %v4747_v1 = vpop.f32.mrb[45].mxu0 }
 0x3f0   : > { %v5422_v35 = vmin.f32 %v5374_v23, 1.0  ;;  %v10629_v8 = vadd.f32 %v13214_v55, %v10383_v39  ;;  %v10630_v2 = vadd.f32 %v13216_v12, %v4747_v1  ;;  %v5469_v37 = vmul.f32 15.0, %v5421_v42  ;;  %v10384_v63 = vpop.f32.mrb[46].mxu0 }
 0x3f1   : > { %v5899_v43 = vmul.f32 %v5810_v47, %v5563_v10  ;;  %v11147_v4 = vround.rtne.f32 %v5468_v24  ;;  %v10631_v49 = vadd.f32 %v13218_v41, %v10384_v63  ;;  %v4750_v11 = vpop.f32.mrb[47].mxu0  ;;  %v5471_v17 = vmul.f32 15.0, %v5423_v31 }
 0x3f2   : > { %v5331_v22 = vadd.f32 %v10629_v8, %v13294_v32  ;;  %v5329_v45 = vadd.f32 %v10630_v2, %v13294_v32  ;;  %v11148_v0 = vround.rtne.f32 %v5469_v37  ;;  %v10632_v30 = vadd.f32 %v13220_v52, %v4750_v11 }
 0x3f3   : > { %v5934_v55 = vpack.c.bf16 %v5899_v43, %v5898_v6  ;;  %v5565_v29 = vmul.f32 0.06666667, %v11147_v4  ;;  %v5332_v12 = vadd.f32 %v10631_v49, %v13294_v32  ;;  %v5470_v54 = vmul.f32 15.0, %v5422_v35  ;;  %v5835_v35 = vpop.permute.xlu0 %5834  ;;  %v5840_v49 = vpop.permute.xlu1 %5839 }
 0x3f4   : > { %v5379_v47 = vmax.f32 %v5331_v22, 0.0  ;;  %v5377_v38 = vmax.f32 %v5329_v45, 0.0  ;;  %v5566_v59 = vmul.f32 0.06666667, %v11148_v0  ;;  %v5330_v41 = vadd.f32 %v10632_v30, %v13294_v32 }
 0x3f5   : > { %v6000_v21 = vrot.slane %v5934_v55, 4  ;;  %v5901_v31 = vmul.f32 %v5820_v60, %v5565_v29  ;;  %v5380_v42 = vmax.f32 %v5332_v12, 0.0  ;;  %v11149_v23 = vround.rtne.f32 %v5470_v54 }
 0x3f6   : > { %v5427_v39 = vmin.f32 %v5379_v47, 1.0  ;;  %v5425_v10 = vmin.f32 %v5377_v38, 1.0  ;;  %v5902_v24 = vmul.f32 %v5825_v57, %v5566_v59  ;;  %v5378_v1 = vmax.f32 %v5330_v41, 0.0  ;;  %v10389_v52 = vpop.f32.mrb[0].mxu0 }
 0x3f7   : > { %v6001_v6 = vsel %vm5964_vm10, %v5998_v14, %v6000_v21  ;;  %v5935_v8 = vpack.c.bf16 %v5901_v31, %v5900_v61  ;;  %v5428_v2 = vmin.f32 %v5380_v42, 1.0  ;;  %v5567_v37 = vmul.f32 0.06666667, %v11149_v23  ;;  %v5039_v63 = vpop.f32.mrb[1].mxu0  ;;  %v5845_v23 = vpop.permute.xlu0 %5844 }
 0x3f8   : > { %6055 = vst.msk [vmem:[#allocation2 + $0x98] sm:$0xff] %vm532_vm1, %v6001_v6  ;;  %v5426_v43 = vmin.f32 %v5378_v1, 1.0  ;;  %v11150_v4 = vround.rtne.f32 %v5471_v17  ;;  %v5472_v60 = vmul.f32 15.0, %v5424_v40  ;;  %v5287_v11 = vadd.f32 %v10389_v52, %v13294_v32  ;;  %v10390_v22 = vpop.f32.mrb[2].mxu0 }
 0x3f9   : > { %v6002_v45 = vrot.slane %v5935_v8, 4  ;;  %v5903_v57 = vmul.f32 %v5830_v53, %v5567_v37  ;;  %v5285_v0 = vadd.f32 %v13294_v32, %v5039_v63  ;;  %v5473_v30 = vmul.f32 15.0, %v5425_v10  ;;  %v5042_v14 = vpop.f32.mrb[3].mxu0  ;;  %v5850_v37 = vpop.permute.xlu1 %5849 }
 0x3fa   : > { %v5568_v61 = vmul.f32 0.06666667, %v11150_v4  ;;  %v11151_v55 = vround.rtne.f32 %v5472_v60  ;;  %v5335_v29 = vmax.f32 %v5287_v11, 0.0  ;;  %v5288_v12 = vadd.f32 %v10390_v22, %v13294_v32 }
 0x3fb   : > { %v6003_v54 = vsel %vm5964_vm10, %v6000_v21, %v6002_v45  ;;  %v5936_v47 = vpack.c.bf16 %v5903_v57, %v5902_v24  ;;  %v5333_v17 = vmax.f32 %v5285_v0, 0.0  ;;  %v11152_v38 = vround.rtne.f32 %v5473_v30 }
 0x3fc   : > { %6056 = vst.msk [vmem:[#allocation2 + $0xa0] sm:$0xff] %vm532_vm1, %v6003_v54  ;;  %v5904_v40 = vmul.f32 %v5835_v35, %v5568_v61  ;;  %v5569_v59 = vmul.f32 0.06666667, %v11151_v55  ;;  %v5383_v41 = vmin.f32 %v5335_v29, 1.0  ;;  %v5336_v53 = vmax.f32 %v5288_v12, 0.0 }
 0x3fd   : > { %v6004_v31 = vrot.slane %v5936_v47, 4  ;;  %v5381_v42 = vmin.f32 %v5333_v17, 1.0  ;;  %v5570_v10 = vmul.f32 0.06666667, %v11152_v38  ;;  %v5286_v1 = vadd.f32 %v13294_v32, %v5042_v14 }
 0x3fe   : > { %v5905_v52 = vmul.f32 %v5840_v49, %v5569_v59  ;;  %v5431_v6 = vmul.f32 15.0, %v5383_v41  ;;  %v5384_v8 = vmin.f32 %v5336_v53, 1.0  ;;  %v5474_v21 = vmul.f32 15.0, %v5426_v43  ;;  %v10393_v24 = vpop.f32.mrb[4].mxu0 }
 0x3ff   : > { %v6005_v63 = vsel %vm5964_vm10, %v6002_v45, %v6004_v31  ;;  %v5429_v4 = vmul.f32 15.0, %v5381_v42  ;;  %v5906_v60 = vmul.f32 %v5845_v23, %v5570_v10  ;;  %v5334_v35 = vmax.f32 %v5286_v1, 0.0  ;;  %v5055_v11 = vpop.f32.mrb[5].mxu0  ;;  %v5855_v10 = vpop.permute.xlu0 %5854 }
 0x400   : > { %6057 = vst.msk [vmem:[#allocation2 + $0xa8] sm:$0xff] %vm532_vm1, %v6005_v63  ;;  %v5937_v22 = vpack.c.bf16 %v5905_v52, %v5904_v40  ;;  %v11110_v57 = vround.rtne.f32 %v5431_v6  ;;  %v5432_v0 = vmul.f32 15.0, %v5384_v8  ;;  %v11153_v30 = vround.rtne.f32 %v5474_v21  ;;  %v10394_v61 = vpop.f32.mrb[6].mxu0  ;;  %v5860_v1 = vpop.permute.xlu1 %5859 }
 0x401   : > { %v11108_v14 = vround.rtne.f32 %v5429_v4  ;;  %v5382_v49 = vmin.f32 %v5334_v35, 1.0  ;;  %v5475_v55 = vmul.f32 15.0, %v5427_v39  ;;  %v5476_v29 = vmul.f32 15.0, %v5428_v2  ;;  %v5058_v12 = vpop.f32.mrb[7].mxu0 }
 0x402   : > { %v6006_v43 = vrot.slane %v5937_v22, 4  ;;  %v5528_v54 = vmul.f32 0.06666667, %v11110_v57  ;;  %v11111_v47 = vround.rtne.f32 %v5432_v0  ;;  %v5571_v45 = vmul.f32 0.06666667, %v11153_v30 }
 0x403   : > { %v5526_v17 = vmul.f32 0.06666667, %v11108_v14  ;;  %v5430_v38 = vmul.f32 15.0, %v5382_v49  ;;  %v11154_v59 = vround.rtne.f32 %v5475_v55  ;;  %v11155_v41 = vround.rtne.f32 %v5476_v29 }
 0x404   : > { %v6007_v53 = vsel %vm5964_vm10, %v6004_v31, %v6006_v43  ;;  %v5864_v40 = vmul.f32 %v13243_v19, %v5528_v54  ;;  %v5529_v42 = vmul.f32 0.06666667, %v11111_v47  ;;  %v5907_v23 = vmul.f32 %v5850_v37, %v5571_v45 }
 0x405   : > { %6058 = vst.msk [vmem:[#allocation2 + $0xb0] sm:$0xff] %vm532_vm1, %v6007_v53  ;;  %v5862_v39 = vmul.f32 %v13234_v28, %v5526_v17  ;;  %v11109_v2 = vround.rtne.f32 %v5430_v38  ;;  %v5572_v52 = vmul.f32 0.06666667, %v11154_v59  ;;  %v5573_v6 = vmul.f32 0.06666667, %v11155_v41 }
 0x406   : > { %v5865_v8 = vmul.f32 %v13245_v16, %v5529_v42  ;;  %v5938_v21 = vpack.c.bf16 %v5907_v23, %v5906_v60  ;;  %v5291_v63 = vadd.f32 %v10393_v24, %v13294_v32  ;;  %v5289_v31 = vadd.f32 %v13294_v32, %v5055_v11  ;;  %v10397_v4 = vpop.f32.mrb[8].mxu0 }
 0x407   : > { %v5527_v19 = vmul.f32 0.06666667, %v11109_v2  ;;  %v5908_v35 = vmul.f32 %v5855_v10, %v5572_v52  ;;  %v5909_v37 = vmul.f32 %v5860_v1, %v5573_v6  ;;  %v5292_v22 = vadd.f32 %v10394_v61, %v13294_v32  ;;  %v5071_v57 = vpop.f32.mrb[9].mxu0 }
 0x408   : > { %v5917_v0 = vpack.c.bf16 %v5865_v8, %v5864_v40  ;;  %v6008_v30 = vrot.slane %v5938_v21, 4  ;;  %v5339_v28 = vmax.f32 %v5291_v63, 0.0  ;;  %v5337_v14 = vmax.f32 %v5289_v31, 0.0  ;;  %v10398_v49 = vpop.f32.mrb[10].mxu0  ;;  %v13364_v40 = vld [vmem:[#allocation2 + $0x90] sm:$0xff]  ;;  %v13372_v31 = vld [vmem:[#allocation2 + $0x98] sm:$0xff] }
 0x409   : > { %v5863_v55 = vmul.f32 %v13238_v26, %v5527_v19  ;;  %v5939_v16 = vpack.c.bf16 %v5909_v37, %v5908_v35  ;;  %v5340_v60 = vmax.f32 %v5292_v22, 0.0  ;;  %v5290_v24 = vadd.f32 %v13294_v32, %v5058_v12  ;;  %v13356_v29 = vpop.f32.mrb[11].mxu0  ;;  %15580 = vst [vmem:[#allocation16_spill] sm:$0xff] %v13364_v40 }
 0x40a   : > { %v13358_v11 = vrot.slane %v5917_v0, 4  ;;  %v6009_v54 = vsel %vm5964_vm10, %v6006_v43, %v6008_v30  ;;  %v5387_v47 = vmin.f32 %v5339_v28, 1.0  ;;  %v5385_v61 = vmin.f32 %v5337_v14, 1.0 }
 0x40b   : > { %v5916_v45 = vpack.c.bf16 %v5863_v55, %v5862_v39  ;;  %6059 = vst.msk [vmem:[#allocation2 + $0xb8] sm:$0xff] %vm532_vm1, %v6009_v54  ;;  %v6010_v17 = vrot.slane %v5939_v16, 4  ;;  %v5388_v38 = vmin.f32 %v5340_v60, 1.0  ;;  %v5338_v59 = vmax.f32 %v5290_v24, 0.0 }
 0x40c   : > { %v5435_v41 = vmul.f32 15.0, %v5387_v47  ;;  %v5433_v26 = vmul.f32 15.0, %v5385_v61  ;;  %v5295_v53 = vadd.f32 %v10397_v4, %v13294_v32  ;;  %v5293_v12 = vadd.f32 %v13294_v32, %v5071_v57 }
 0x40d   : > { %v5965_v42 = vrot.slane %v5916_v45, 4  ;;  %v6011_v23 = vsel %vm5964_vm10, %v6008_v30, %v6010_v17  ;;  %6061 = vst.msk [vmem:[#allocation2 + $0xc8] sm:$0xf] %vm5911_vm8, %v6010_v17  ;;  %v5436_v43 = vmul.f32 15.0, %v5388_v38  ;;  %v5386_v10 = vmin.f32 %v5338_v59, 1.0 }
 0x40e   : > { %6060 = vst.msk [vmem:[#allocation2 + $0xc0] sm:$0xff] %vm532_vm1, %v6011_v23  ;;  %v11114_v1 = vround.rtne.f32 %v5435_v41  ;;  %v11112_v39 = vround.rtne.f32 %v5433_v26  ;;  %v5343_v2 = vmax.f32 %v5295_v53, 0.0  ;;  %v5341_v52 = vmax.f32 %v5293_v12, 0.0  ;;  %v10401_v6 = vpop.f32.mrb[12].mxu0 }
 0x40f   : > { %v5967_v8 = vsel %vm5964_vm10, %v5965_v42, %v13358_v11  ;;  %6037 = vst.msk [vmem:[#allocation2 + $0x8] sm:$0xf0] %vm5913_vm7, %v5965_v42  ;;  %v11115_v21 = vround.rtne.f32 %v5436_v43  ;;  %v5434_v63 = vmul.f32 15.0, %v5386_v10  ;;  %v15431_v4 = vshrl.u32 %v13364_v40, 16  ;;  %v5087_v19 = vpop.f32.mrb[13].mxu0 }
 0x410   : > { %6038 = vst.msk [vmem:[#allocation2 + $0x10] sm:$0xff] %vm532_vm1, %v5967_v8  ;;  %v5532_v35 = vmul.f32 0.06666667, %v11114_v1  ;;  %v5530_v37 = vmul.f32 0.06666667, %v11112_v39  ;;  %v5391_v22 = vmin.f32 %v5343_v2, 1.0  ;;  %v5296_v53 = vadd.f32 %v10398_v49, %v13294_v32 }
 0x411   : > { %v5389_v57 = vmin.f32 %v5341_v52, 1.0  ;;  %v5533_v0 = vmul.f32 0.06666667, %v11115_v21  ;;  %v11113_v30 = vround.rtne.f32 %v5434_v63  ;;  %v8135_v28 = vrot.slane %v15431_v4, 4  ;;  %v10402_v55 = vpop.f32.mrb[14].mxu0  ;;  %v11347_v8 = vld [vmem:[%s15365_s3 + $0x8] sm:$0xff]  }
 0x412   : > { %v15426_v14 = vshll.u32 %v13364_v40, 16  ;;  %v5868_v16 = vmul.f32 %v13259_v50, %v5532_v35  ;;  %v5866_v60 = vmul.f32 %v13251_v51, %v5530_v37  ;;  %v5439_v24 = vmul.f32 15.0, %v5391_v22  ;;  %v5090_v47 = vpop.f32.mrb[15].mxu0  ;;  %9758 = vmatprep.mubr.msk.bf16.mxu1 %vm532_vm1, %v11347_v8 }
 0x413   : > { %v5437_v54 = vmul.f32 15.0, %v5389_v57  ;;  %v5869_v61 = vmul.f32 %v13261_v20, %v5533_v0  ;;  %v5531_v45 = vmul.f32 0.06666667, %v11113_v30  ;;  %v15449_v38 = vshrl.u32 %v13372_v31, 16 }
 0x414   : > { %v8138_v17 = vrot.slane %v15426_v14, 5  ;;  %v11118_v59 = vround.rtne.f32 %v5439_v24  ;;  %v15446_v26 = vshll.u32 %v13372_v31, 16  ;;  %v5344_v10 = vmax.f32 %v5296_v53, 0.0 }
 0x415   : > { %v11116_v41 = vround.rtne.f32 %v5437_v54  ;;  %v5919_v50 = vpack.c.bf16 %v5869_v61, %v5868_v16  ;;  %v5867_v51 = vmul.f32 %v13253_v25, %v5531_v45  ;;  %v8144_v20 = vrot.slane %v15449_v38, 4  ;;  %v13399_v25 = vld [vmem:[#allocation2 + $0xa0] sm:$0xff] }
 0x416   : > { %v13388_v12 = vor.u32 %v8138_v17, %v8135_v28  ;;  %v5536_v42 = vmul.f32 0.06666667, %v11118_v59  ;;  %v8147_v43 = vrot.slane %v15446_v26, 5  ;;  %v5294_v49 = vadd.f32 %v13294_v32, %v13356_v29  ;;  %v10405_v52 = vpop.f32.mrb[16].mxu0 }
 0x417   : > { %v5534_v23 = vmul.f32 0.06666667, %v11116_v41  ;;  %v13394_v1 = vrot.slane %v5919_v50, 4  ;;  %v5918_v39 = vpack.c.bf16 %v5867_v51, %v5866_v60  ;;  %v5299_v2 = vadd.f32 %v10401_v6, %v13294_v32  ;;  %v5103_v22 = vpop.f32.mrb[17].mxu0 }
 0x418   : > { %15581 = vst [vmem:[#allocation17_spill] sm:$0xff] %v13388_v12  ;;  %v5872_v21 = vmul.f32 %v13275_v56, %v5536_v42  ;;  %v8148_v35 = vor.u32 %v8147_v43, %v8144_v20  ;;  %v5392_v37 = vmin.f32 %v5344_v10, 1.0  ;;  %v5342_v0 = vmax.f32 %v5294_v49, 0.0  ;;  %v13409_v30 = vpop.f32.mrb[18].mxu0 }
 0x419   : > { %v13406_v63 = vmul.f32 %v13267_v27, %v5534_v23  ;;  %v5968_v57 = vrot.slane %v5918_v39, 4  ;;  %v5347_v29 = vmax.f32 %v5299_v2, 0.0  ;;  %v5297_v6 = vadd.f32 %v13294_v32, %v5087_v19  ;;  %v13416_v60 = vpop.f32.mrb[19].mxu0 }
 0x41a   : > { %v8149_v28 = vsel %vm7681_vm11, %v13388_v12, %v8148_v35  ;;  %v5440_v16 = vmul.f32 15.0, %v5392_v37  ;;  %v15433_v56 = vshrl.u32 %v13399_v25, 16  ;;  %v15432_v27 = vshll.u32 %v13399_v25, 16 }
 0x41b   : > { %v5969_v24 = vsel %vm5964_vm10, %v13358_v11, %v5968_v57  ;;  %v5971_v19 = vsel %vm5964_vm10, %v5968_v57, %v13394_v1  ;;  %v8265_v54 = vsel %vm532_vm1, %v8149_v28, 0  ;;  %v5390_v61 = vmin.f32 %v5342_v0, 1.0 }
 0x41c   : > { %6039 = vst.msk [vmem:[#allocation2 + $0x18] sm:$0xff] %vm532_vm1, %v5969_v24  ;;  %6040 = vst.msk [vmem:[#allocation2 + $0x20] sm:$0xff] %vm532_vm1, %v5971_v19  ;;  %10556 = vmatpush3.bf16.xpose.msra.mxu0 %v8265_v54  ;;  %v11119_v45 = vround.rtne.f32 %v5440_v16  ;;  %v5395_v17 = vmin.f32 %v5347_v29, 1.0  ;;  %v5345_v59 = vmax.f32 %v5297_v6, 0.0  ;;  %v8153_v41 = vrot.slane %v15433_v56, 4 }
 0x41d   : > { %v5438_v53 = vmul.f32 15.0, %v5390_v61  ;;  %10557 = vmatprep.subr.bf16.mxu0 %v15579_v15  ;;  %v8156_v11 = vrot.slane %v15432_v27, 5  ;;  %v5300_v50 = vadd.f32 %v10402_v55, %v13294_v32  ;;  %v5298_v51 = vadd.f32 %v13294_v32, %v5090_v47 }
 0x41e   : > { %v5537_v20 = vmul.f32 0.06666667, %v11119_v45  ;;  %v5443_v42 = vmul.f32 15.0, %v5395_v17  ;;  %v5393_v23 = vmin.f32 %v5345_v59, 1.0  ;;  %v5303_v43 = vadd.f32 %v10405_v52, %v13294_v32  ;;  %v13433_v10 = vpop.f32.mrb[20].mxu0 }
 0x41f   : > { %v11117_v39 = vround.rtne.f32 %v5438_v53  ;;  %v13435_v49 = vor.u32 %v8156_v11, %v8153_v41  ;;  %v5348_v2 = vmax.f32 %v5300_v50, 0.0  ;;  %v5346_v8 = vmax.f32 %v5298_v51, 0.0  ;;  %v13437_v37 = vpop.f32.mrb[21].mxu0  ;;  %v13448_v53 = vld [vmem:[#allocation2 + $0xa8] sm:$0xff] }
 0x420   : > { %v5873_v57 = vmul.f32 %v13277_v62, %v5537_v20  ;;  %v11122_v0 = vround.rtne.f32 %v5443_v42  ;;  %v5441_v55 = vmul.f32 15.0, %v5393_v23  ;;  %v5351_v29 = vmax.f32 %v5303_v43, 0.0  ;;  %v13440_v47 = vpop.f32.mrb[22].mxu0 }
 0x421   : > { %v5535_v6 = vmul.f32 0.06666667, %v11117_v39  ;;  %v8158_v52 = vsel %vm7681_vm11, %v8148_v35, %v13435_v49  ;;  %v5396_v28 = vmin.f32 %v5348_v2, 1.0  ;;  %v5394_v16 = vmin.f32 %v5346_v8, 1.0  ;;  %v13444_v24 = vpop.f32.mrb[23].mxu0 }
 0x422   : > { %v5921_v19 = vpack.c.bf16 %v5873_v57, %v5872_v21  ;;  %v5540_v54 = vmul.f32 0.06666667, %v11122_v0  ;;  %v11120_v61 = vround.rtne.f32 %v5441_v55  ;;  %v8268_v45 = vsel %vm532_vm1, %v8158_v52, 0 }
 0x423   : > { %v5871_v62 = vmul.f32 %v13269_v33, %v5535_v6  ;;  %v5444_v17 = vmul.f32 15.0, %v5396_v28  ;;  %v5442_v59 = vmul.f32 15.0, %v5394_v16  ;;  %v5399_v41 = vmin.f32 %v5351_v29, 1.0 }
 0x424   : > { %v5974_v11 = vrot.slane %v5921_v19, 4  ;;  %v5876_v50 = vmul.f32 %v13224_v44, %v5540_v54  ;;  %v5538_v35 = vmul.f32 0.06666667, %v11120_v61  ;;  %10558 = vmatpush3.bf16.xpose.msra.mxu0 %v8268_v45  ;;  %v5301_v51 = vadd.f32 %v13294_v32, %v5103_v22 }
 0x425   : > { %v5920_v21 = vpack.c.bf16 %v5871_v62, %v13406_v63  ;;  %v11123_v20 = vround.rtne.f32 %v5444_v17  ;;  %v11121_v42 = vround.rtne.f32 %v5442_v59  ;;  %v5447_v23 = vmul.f32 15.0, %v5399_v41  ;;  %10559 = vmatprep.subr.bf16.mxu0 %v15579_v15 }
 0x426   : > { %v5874_v33 = vmul.f32 %v13222_v3, %v5538_v35  ;;  %v5349_v43 = vmax.f32 %v5301_v51, 0.0  ;;  %v8160_v39 = vshrl.u32 %v13448_v53, 16  ;;  %v8163_v2 = vshll.u32 %v13448_v53, 16  ;;  %v13457_v8 = vpop.f32.mrb[24].mxu0 }
 0x427   : > { %v5972_v44 = vrot.slane %v5920_v21, 4  ;;  %v5541_v57 = vmul.f32 0.06666667, %v11123_v20  ;;  %v5539_v0 = vmul.f32 0.06666667, %v11121_v42  ;;  %v11126_v22 = vround.rtne.f32 %v5447_v23  ;;  %v13459_v55 = vpop.f32.mrb[25].mxu0 }
 0x428   : > { %v5397_v63 = vmin.f32 %v5349_v43, 1.0  ;;  %v8162_v29 = vrot.slane %v8160_v39, 4  ;;  %v8165_v3 = vrot.slane %v8163_v2, 5  ;;  %v5304_v6 = vadd.f32 %v13409_v30, %v13294_v32  ;;  %v13467_v52 = vpop.f32.mrb[26].mxu0  ;;  %v13485_v20 = vld [vmem:[#allocation2 + $0xb0] sm:$0xff] }
 0x429   : > { %v5973_v28 = vsel %vm5964_vm10, %v13394_v1, %v5972_v44  ;;  %v5975_v16 = vsel %vm5964_vm10, %v5972_v44, %v5974_v11  ;;  %v5877_v19 = vmul.f32 %v13228_v9, %v5541_v57  ;;  %v5875_v54 = vmul.f32 %v13226_v7, %v5539_v0  ;;  %v13474_v61 = vpop.f32.mrb[27].mxu0 }
 0x42a   : > { %6041 = vst.msk [vmem:[#allocation2 + $0x28] sm:$0xff] %vm532_vm1, %v5973_v28  ;;  %6042 = vst.msk [vmem:[#allocation2 + $0x30] sm:$0xff] %vm532_vm1, %v5975_v16  ;;  %v5544_v45 = vmul.f32 0.06666667, %v11126_v22  ;;  %v5445_v62 = vmul.f32 15.0, %v5397_v63  ;;  %v8166_v30 = vor.u32 %v8165_v3, %v8162_v29  ;;  %v5352_v17 = vmax.f32 %v5304_v6, 0.0 }
 0x42b   : > { %v5923_v59 = vpack.c.bf16 %v5877_v19, %v5876_v50  ;;  %v5922_v41 = vpack.c.bf16 %v5875_v54, %v5874_v33  ;;  %v5302_v1 = vadd.f32 %v13294_v32, %v13416_v60  ;;  %v5307_v9 = vadd.f32 %v13433_v10, %v13294_v32 }
 0x42c   : > { %v5880_v7 = vmul.f32 %v13247_v58, %v5544_v45  ;;  %v11124_v35 = vround.rtne.f32 %v5445_v62  ;;  %v8167_v51 = vsel %vm7681_vm11, %v13435_v49, %v8166_v30  ;;  %v5400_v21 = vmin.f32 %v5352_v17, 1.0 }
 0x42d   : > { %v13487_v42 = vrot.slane %v5923_v59, 4  ;;  %v5976_v23 = vrot.slane %v5922_v41, 4  ;;  %v8271_v50 = vsel %vm532_vm1, %v8167_v51, 0  ;;  %v5350_v33 = vmax.f32 %v5302_v1, 0.0 }
 0x42e   : > { %v5542_v43 = vmul.f32 0.06666667, %v11124_v35  ;;  %10560 = vmatpush3.bf16.xpose.msra.mxu0 %v8271_v50  ;;  %v5448_v60 = vmul.f32 15.0, %v5400_v21  ;;  %v5355_v44 = vmax.f32 %v5307_v9, 0.0  ;;  %v5305_v58 = vadd.f32 %v13294_v32, %v13437_v37  ;;  %v13492_v10 = vpop.f32.mrb[28].mxu0 }
 0x42f   : > { %v5977_v49 = vsel %vm5964_vm10, %v5974_v11, %v5976_v23  ;;  %v5979_v57 = vsel %vm5964_vm10, %v5976_v23, %v13487_v42  ;;  %v5398_v0 = vmin.f32 %v5350_v33, 1.0  ;;  %10561 = vmatprep.subr.bf16.mxu0 %v15579_v15  ;;  %v8169_v22 = vshrl.u32 %v13485_v20, 16  ;;  %v13499_v63 = vpop.f32.mrb[29].mxu0 }
 0x430   : > { %6043 = vst.msk [vmem:[#allocation2 + $0x38] sm:$0xff] %vm532_vm1, %v5977_v49  ;;  %6044 = vst.msk [vmem:[#allocation2 + $0x40] sm:$0xff] %vm532_vm1, %v5979_v57  ;;  %v5878_v37 = vmul.f32 %v13230_v34, %v5542_v43  ;;  %v11127_v29 = vround.rtne.f32 %v5448_v60  ;;  %v5403_v3 = vmin.f32 %v5355_v44, 1.0  ;;  %v5353_v6 = vmax.f32 %v5305_v58, 0.0  ;;  %v13504_v11 = vpop.f32.mrb[30].mxu0 }
 0x431   : > { %v5446_v28 = vmul.f32 15.0, %v5398_v0  ;;  %v8171_v16 = vrot.slane %v8169_v22, 4  ;;  %v8172_v19 = vshll.u32 %v13485_v20, 16  ;;  %v5308_v54 = vadd.f32 %v13440_v47, %v13294_v32  ;;  %v13511_v45 = vpop.f32.mrb[31].mxu0 }
 0x432   : > { %v5545_v62 = vmul.f32 0.06666667, %v11127_v29  ;;  %v5451_v17 = vmul.f32 15.0, %v5403_v3  ;;  %v5401_v59 = vmin.f32 %v5353_v6, 1.0  ;;  %v5306_v34 = vadd.f32 %v13294_v32, %v13444_v24 }
 0x433   : > { %v11125_v41 = vround.rtne.f32 %v5446_v28  ;;  %v8174_v1 = vrot.slane %v8172_v19, 5  ;;  %v5356_v9 = vmax.f32 %v5308_v54, 0.0  ;;  %v5311_v35 = vadd.f32 %v13457_v8, %v13294_v32  ;;  %v13522_v8 = vld [vmem:[#allocation2 + $0xb8] sm:$0xff] }
 0x434   : > { %v5881_v51 = vmul.f32 %v13249_v18, %v5545_v62  ;;  %v11130_v21 = vround.rtne.f32 %v5451_v17  ;;  %v5449_v47 = vmul.f32 15.0, %v5401_v59  ;;  %v5354_v23 = vmax.f32 %v5306_v34, 0.0 }
 0x435   : > { %v5543_v50 = vmul.f32 0.06666667, %v11125_v41  ;;  %v8175_v33 = vor.u32 %v8174_v1, %v8171_v16  ;;  %v5404_v43 = vmin.f32 %v5356_v9, 1.0  ;;  %v5359_v60 = vmax.f32 %v5311_v35, 0.0 }
 0x436   : > { %v5925_v44 = vpack.c.bf16 %v5881_v51, %v5880_v7  ;;  %v5548_v58 = vmul.f32 0.06666667, %v11130_v21  ;;  %v11128_v24 = vround.rtne.f32 %v5449_v47  ;;  %v5402_v49 = vmin.f32 %v5354_v23, 1.0 }
 0x437   : > { %v5879_v57 = vmul.f32 %v13232_v5, %v5543_v50  ;;  %v8176_v0 = vsel %vm7681_vm11, %v8166_v30, %v8175_v33  ;;  %v5452_v29 = vmul.f32 15.0, %v5404_v43  ;;  %v5407_v3 = vmin.f32 %v5359_v60, 1.0  ;;  %v15583_v60 = vld [vmem:[#allocation7_spill] sm:$0xff] }
 0x438   : > { %v5982_v18 = vrot.slane %v5925_v44, 4  ;;  %v5884_v6 = vmul.f32 %v13263_v48, %v5548_v58  ;;  %v8274_v28 = vsel %vm532_vm1, %v8176_v0, 0  ;;  %v15582_v16 = vshrl.u32 %v13301_v46, 16  ;;  %v15584_v0 = vld [vmem:[#allocation6_spill] sm:$0xff] }
 0x439   : > { %v5924_v7 = vpack.c.bf16 %v5879_v57, %v5878_v37  ;;  %10562 = vmatpush3.bf16.xpose.msra.mxu0 %v8274_v28  ;;  %v11131_v62 = vround.rtne.f32 %v5452_v29  ;;  %v5450_v17 = vmul.f32 15.0, %v5402_v49  ;;  %v5455_v5 = vmul.f32 15.0, %v5407_v3 }
 0x43a   : > { %v13528_v54 = vrot.slane %v15582_v16, 4  ;;  %v5546_v59 = vmul.f32 0.06666667, %v11128_v24  ;;  %10563 = vmatprep.subr.bf16.mxu0 %v15579_v15  ;;  %v5309_v30 = vadd.f32 %v13294_v32, %v13459_v55  ;;  %v13534_v34 = vshrl.u32 %v13522_v8, 16 }
 0x43b   : > { %v13537_v48 = vshll.u32 %v13522_v8, 16  ;;  %v5980_v41 = vrot.slane %v5924_v7, 4  ;;  %v5549_v1 = vmul.f32 0.06666667, %v11131_v62  ;;  %v11129_v9 = vround.rtne.f32 %v5450_v17  ;;  %v13556_v7 = vld [vmem:[#allocation2 + $0xc0] sm:$0xff] }
 0x43c   : > { %v11134_v37 = vround.rtne.f32 %v5455_v5  ;;  %v5357_v35 = vmax.f32 %v5309_v30, 0.0  ;;  %v8180_v51 = vrot.slane %v13534_v34, 4  ;;  %v5312_v47 = vadd.f32 %v13467_v52, %v13294_v32 }
 0x43d   : > { %v8183_v21 = vrot.slane %v13537_v48, 5  ;;  %v5981_v55 = vsel %vm5964_vm10, %v13487_v42, %v5980_v41  ;;  %v5983_v23 = vsel %vm5964_vm10, %v5980_v41, %v5982_v18  ;;  %v5885_v50 = vmul.f32 %v13265_v36, %v5549_v1 }
 0x43e   : > { %v5547_v43 = vmul.f32 0.06666667, %v11129_v9  ;;  %6045 = vst.msk [vmem:[#allocation2 + $0x48] sm:$0xff] %vm532_vm1, %v5981_v55  ;;  %6046 = vst.msk [vmem:[#allocation2 + $0x50] sm:$0xff] %vm532_vm1, %v5983_v23  ;;  %v5882_v44 = vmul.f32 %v15583_v60, %v5546_v59  ;;  %v5405_v58 = vmin.f32 %v5357_v35, 1.0  ;;  %v5360_v49 = vmax.f32 %v5312_v47, 0.0 }
 0x43f   : > { %v8184_v24 = vor.u32 %v8183_v21, %v8180_v51  ;;  %v5927_v57 = vpack.c.bf16 %v5885_v50, %v5884_v6  ;;  %v5310_v42 = vadd.f32 %v13294_v32, %v13474_v61  ;;  %v5315_v29 = vadd.f32 %v13492_v10, %v13294_v32  ;;  %v11355_v32 = vld [vmem:[%s15364_s2] ss:$0 sm:$0xff] }
 0x440   : > { %v5883_v52 = vmul.f32 %v15584_v0, %v5547_v43  ;;  %v5552_v36 = vmul.f32 0.06666667, %v11134_v37  ;;  %v5453_v3 = vmul.f32 15.0, %v5405_v58  ;;  %v5408_v16 = vmin.f32 %v5360_v49, 1.0  ;;  %v15585_v37 = vld [vmem:[#allocation9_spill] sm:$0xff]  ;;  %v13574_v43 = vld [vmem:[#allocation2 + $0xc8] sm:$0xff] }
 0x441   : > { %v8185_v28 = vsel %vm7681_vm11, %v8175_v33, %v8184_v24  ;;  %v13558_v62 = vrot.slane %v5927_v57, 4  ;;  %v5358_v5 = vmax.f32 %v5310_v42, 0.0  ;;  %v5363_v61 = vmax.f32 %v5315_v29, 0.0  ;;  %v6089_v42 = vld [vmem:[#allocation2] sm:$0xf8]  ;;  %v15586_v29 = vld [vmem:[#allocation11_spill] sm:$0xff] }
 0x442   : > { %v5926_v17 = vpack.c.bf16 %v5883_v52, %v5882_v44  ;;  %v8277_v6 = vsel %vm532_vm1, %v8185_v28, 0  ;;  %v11132_v59 = vround.rtne.f32 %v5453_v3  ;;  %v5456_v30 = vmul.f32 15.0, %v5408_v16 }
 0x443   : > { %10564 = vmatpush3.bf16.xpose.msra.mxu0 %v8277_v6  ;;  %v5313_v10 = vadd.f32 %v11355_v32, %v13499_v63  ;;  %v5406_v41 = vmin.f32 %v5358_v5, 1.0  ;;  %v8187_v1 = vshrl.u32 %v13556_v7, 16  ;;  %v8190_v9 = vshll.u32 %v13556_v7, 16 }
 0x444   : > { %v5984_v33 = vrot.slane %v5926_v17, 4  ;;  %10565 = vmatprep.subr.bf16.mxu0 %v15579_v15  ;;  %v5888_v35 = vmul.f32 %v15585_v37, %v5552_v36  ;;  %v11135_v51 = vround.rtne.f32 %v5456_v30  ;;  %v5411_v21 = vmin.f32 %v5363_v61, 1.0  ;;  %v15587_v30 = vld [vmem:[#allocation8_spill] sm:$0xff]  ;;  %v15588_v37 = vld [vmem:[#allocation10_spill] sm:$0xff] }
 0x445   : > { %v5361_v47 = vmax.f32 %v5313_v10, 0.0  ;;  %v5454_v50 = vmul.f32 15.0, %v5406_v41  ;;  %v8189_v63 = vrot.slane %v8187_v1, 4  ;;  %v5550_v60 = vmul.f32 0.06666667, %v11132_v59 }
 0x446   : > { %v5985_v55 = vsel %vm5964_vm10, %v5982_v18, %v5984_v33  ;;  %v5987_v23 = vsel %vm5964_vm10, %v5984_v33, %v13558_v62  ;;  %v5553_v44 = vmul.f32 0.06666667, %v11135_v51  ;;  %v5459_v58 = vmul.f32 15.0, %v5411_v21  ;;  %v13587_v21 = vld [vmem:[#allocation2 + $0x40] sm:$0xff] }
 0x447   : > { %6047 = vst.msk [vmem:[#allocation2 + $0x58] sm:$0xff] %vm532_vm1, %v5985_v55  ;;  %6048 = vst.msk [vmem:[#allocation2 + $0x60] sm:$0xff] %vm532_vm1, %v5987_v23  ;;  %v5409_v49 = vmin.f32 %v5361_v47, 1.0  ;;  %v11133_v57 = vround.rtne.f32 %v5454_v50  ;;  %v8192_v18 = vrot.slane %v8190_v9, 5  ;;  %v5316_v0 = vadd.f32 %v11355_v32, %v13504_v11  ;;  %v13589_v47 = vld [vmem:[#allocation2 + $0x48] sm:$0xff] }
 0x448   : > { %v5314_v52 = vadd.f32 %v11355_v32, %v13511_v45  ;;  %v5889_v36 = vmul.f32 %v15586_v29, %v5553_v44  ;;  %v11138_v3 = vround.rtne.f32 %v5459_v58  ;;  %v8196_v16 = vshrl.u32 %v13574_v43, 16  ;;  %v13591_v55 = vld [vmem:[#allocation2 + $0x8] sm:$0xff] }
 0x449   : > { %v5457_v28 = vmul.f32 15.0, %v5409_v49  ;;  %v5551_v17 = vmul.f32 0.06666667, %v11133_v57  ;;  %v8193_v6 = vor.u32 %v8192_v18, %v8189_v63  ;;  %v5364_v5 = vmax.f32 %v5316_v0, 0.0  ;;  %v13597_v49 = vld [vmem:[#allocation2 + $0x50] sm:$0xff] }
 0x44a   : > { %v5362_v59 = vmax.f32 %v5314_v52, 0.0  ;;  %v5886_v61 = vmul.f32 %v15587_v30, %v5550_v60  ;;  %v5929_v10 = vpack.c.bf16 %v5889_v36, %v5888_v35  ;;  %v6123_v41 = vrot.slane %v6089_v42, 3 }
 0x44b   : > { %v11136_v33 = vround.rtne.f32 %v5457_v28  ;;  %v5887_v11 = vmul.f32 %v15588_v37, %v5551_v17  ;;  %v8194_v45 = vsel %vm7681_vm11, %v8184_v24, %v8193_v6  ;;  %v5412_v32 = vmin.f32 %v5364_v5, 1.0 }
 0x44c   : > { %v5410_v51 = vmin.f32 %v5362_v59, 1.0  ;;  %v5990_v23 = vrot.slane %v5929_v10, 4  ;;  %v5556_v50 = vmul.f32 0.06666667, %v11138_v3  ;;  %v8280_v63 = vsel %vm532_vm1, %v8194_v45, 0 }
 0x44d   : > { %v8198_v35 = vrot.slane %v8196_v16, 4  ;;  %v5928_v60 = vpack.c.bf16 %v5887_v11, %v5886_v61  ;;  %10566 = vmatpush3.bf16.xpose.msra.mxu0 %v8280_v63  ;;  %v5460_v44 = vmul.f32 15.0, %v5412_v32  ;;  %v8199_v24 = vshll.u32 %v13574_v43, 16  ;;  %v13612_v61 = vld [vmem:[#allocation2 + $0x10] sm:$0xff]  ;;  %v15591_v32 = vld [vmem:[#allocation12_spill] sm:$0xff] }
 0x44e   : > { %v5458_v58 = vmul.f32 15.0, %v5410_v51  ;;  %v5554_v57 = vmul.f32 0.06666667, %v11136_v33  ;;  %10567 = vmatprep.subr.bf16.mxu0 %v15579_v15  ;;  %v6138_v18 = vrot.slane %v13587_v21, 3  ;;  %v6140_v0 = vrot.slane %v13589_v47, 3 }
 0x44f   : > { %v6124_v52 = vrot.slane %v13591_v55, 3  ;;  %v5988_v42 = vrot.slane %v5928_v60, 4  ;;  %v11139_v29 = vround.rtne.f32 %v5460_v44  ;;  %v8201_v3 = vrot.slane %v8199_v24, 5  ;;  %v15592_v60 = vld [vmem:[#allocation15_spill] sm:$0xff] }
 0x450   : > { %v11137_v36 = vround.rtne.f32 %v5458_v58  ;;  %v6141_v28 = vsel %vm476_vm0, %v6138_v18, %v6140_v0  ;;  %v6142_v5 = vrot.slane %v13597_v49, 3  ;;  %v15589_v59 = vshll.u32 %v13301_v46, 16 }
 0x451   : > { %v6125_v17 = vsel %vm476_vm0, %v6123_v41, %v6124_v52  ;;  %v5989_v10 = vsel %vm5964_vm10, %v13558_v62, %v5988_v42  ;;  %v5991_v33 = vsel %vm5964_vm10, %v5988_v42, %v5990_v23  ;;  %v5557_v37 = vmul.f32 0.06666667, %v11139_v29  ;;  %11033 = vmatprep.subr.msk.bf16.mxu1 %vm532_vm1, %v6141_v28  ;;  %v15590_v41 = vld [vmem:[#allocation14_spill] sm:$0xff]  ;;  %v15593_v62 = vld [vmem:[#allocation13_spill] sm:$0xff]  ;;  %v13629_v28 = vld [vmem:[#allocation2 + $0x58] sm:$0xff] }
 0x452   : > { %v8210_v30 = vrot.slane %v15589_v59, 5  ;;  %v5555_v11 = vmul.f32 0.06666667, %v11137_v36  ;;  %6049 = vst.msk [vmem:[#allocation2 + $0x68] sm:$0xff] %vm532_vm1, %v5989_v10  ;;  %6050 = vst.msk [vmem:[#allocation2 + $0x70] sm:$0xff] %vm532_vm1, %v5991_v33  ;;  %v5892_v45 = vmul.f32 %v15590_v41, %v5556_v50  ;;  %v5890_v46 = vmul.f32 %v15591_v32, %v5554_v57 }
 0x453   : > { %v8202_v51 = vor.u32 %v8201_v3, %v8198_v35  ;;  %v6176_v63 = vsel %vm532_vm1, %v6125_v17, 0  ;;  %v5893_v44 = vmul.f32 %v15592_v60, %v5557_v37  ;;  %v6143_v42 = vsel %vm476_vm0, %v6140_v0, %v6142_v5  ;;  %v11346_v60 = vld [vmem:[%s15365_s3 + $0x30] sm:$0xff]  }
 0x454   : > { %v5891_v58 = vmul.f32 %v15593_v62, %v5555_v11  ;;  %9743 = vmatpush3.bf16.xpose.msra.mxu1 %v6176_v63  ;;  %v6126_v29 = vrot.slane %v13612_v61, 3  ;;  %v8211_v3 = vor.u32 %v8210_v30, %v13528_v54  ;;  %v6144_v10 = vrot.slane %v13629_v28, 3  ;;  %v13659_v63 = vld [vmem:[#allocation2 + $0x20] sm:$0xff] }
 0x455   : > { %v8203_v36 = vsel %vm7681_vm11, %v8193_v6, %v8202_v51  ;;  %11034 = vmatprep.subr.msk.bf16.mxu1 %vm532_vm1, %v6143_v42  ;;  %v5931_v50 = vpack.c.bf16 %v5893_v44, %v5892_v45  ;;  %v13636_v6 = vld [vmem:[#allocation2 + $0x18] sm:$0xff]  ;;  %v8446_v45 = vrot.slane %v13372_v31, 5  ;;  %v15425_v44 = vrot.slane %v13574_v43, 5 }
 0x456   : > { %v5930_v57 = vpack.c.bf16 %v5891_v58, %v5890_v46  ;;  %v8283_v35 = vsel %vm532_vm1, %v8203_v36, 0  ;;  %v6127_v0 = vsel %vm476_vm0, %v6124_v52, %v6126_v29  ;;  %v8212_v54 = vsel %vm7681_vm11, %v8202_v51, %v8211_v3 }
 0x457   : > { %10568 = vmatpush3.bf16.xpose.msra.mxu0 %v8283_v35  ;;  %v5994_v17 = vrot.slane %v5931_v50, 4  ;;  %v6179_v52 = vsel %vm532_vm1, %v6127_v0, 0  ;;  %v6145_v30 = vsel %vm476_vm0, %v6142_v5, %v6144_v10  ;;  %v6128_v41 = vrot.slane %v13636_v6, 3 }
 0x458   : > { %v5992_v59 = vrot.slane %v5930_v57, 4  ;;  %10569 = vmatprep.subr.bf16.mxu0 %v15579_v15  ;;  %v8456_v5 = vrot.slane %v13556_v7, 5  ;;  %v15420_v51 = vrot.slane %v13364_v40, 5  ;;  %v8448_v35 = vrot.slane %v13399_v25, 5 }
 0x459   : > { %v5997_v33 = vsel %vm5964_vm10, %v5994_v17, %v13322_v13  ;;  %v13650_v13 = vld [vmem:[#allocation2 + $0x60] sm:$0xff]  ;;  %v6129_v32 = vsel %vm476_vm0, %v6126_v29, %v6128_v41  ;;  %v6130_v29 = vrot.slane %v13659_v63, 3  ;;  %v13679_v50 = vld [vmem:[#allocation2 + $0x68] sm:$0xff]  ;;  %v8717_v0 = vrot.slane %v8160_v39, 5  ;;  %v13704_v39 = vld [vmem:[#allocation2 + $0x70] sm:$0xff] }
 0x45a   : > { %v5993_v37 = vsel %vm5964_vm10, %v5990_v23, %v5992_v59  ;;  %v5995_v11 = vsel %vm5964_vm10, %v5992_v59, %v5994_v17  ;;  %6053 = vst.msk [vmem:[#allocation2 + $0x88] sm:$0xff] %vm532_vm1, %v5997_v33  ;;  %v8286_v23 = vsel %vm532_vm1, %v8212_v54, 0  ;;  %v6146_v46 = vrot.slane %v13650_v13, 3  ;;  %v13689_v59 = vld [vmem:[#allocation2 + $0x28] sm:$0xff] }
 0x45b   : > { %6051 = vst.msk [vmem:[#allocation2 + $0x78] sm:$0xff] %vm532_vm1, %v5993_v37  ;;  %6052 = vst.msk [vmem:[#allocation2 + $0x80] sm:$0xff] %vm532_vm1, %v5995_v11  ;;  %v8447_v62 = vsel %vm8412_vm12, %v15420_v51, %v8446_v45  ;;  %v6182_v58 = vsel %vm532_vm1, %v6129_v32, 0  ;;  %v13676_v36 = vsel %vm8412_vm12, %v8456_v5, %v15425_v44  ;;  %v6131_v3 = vsel %vm476_vm0, %v6128_v41, %v6130_v29 }
 0x45c   : > { %9745 = vmatpush3.bf16.xpose.msra.mxu1 %v6179_v52  ;;  %v6147_v42 = vsel %vm476_vm0, %v6144_v10, %v6146_v46  ;;  %v8514_v57 = vsel %vm532_vm1, %v8447_v62, 0  ;;  %v6148_v17 = vrot.slane %v13679_v50, 3  ;;  %v8718_v10 = vrot.slane %v8163_v2, 6 }
 0x45d   : > { %11035 = vmatprep.subr.msk.bf16.mxu1 %vm532_vm1, %v6145_v30  ;;  %v8450_v33 = vrot.slane %v13448_v53, 5  ;;  %v8449_v37 = vsel %vm8412_vm12, %v8446_v45, %v8448_v35  ;;  %v6185_v11 = vsel %vm532_vm1, %v6131_v3, 0  ;;  %v8721_v52 = vrot.slane %v8169_v22, 5 }
 0x45e   : > { %v13698_v54 = vor.u32 %v8718_v10, %v8717_v0  ;;  %v6149_v30 = vsel %vm476_vm0, %v6146_v46, %v6148_v17  ;;  %v6132_v41 = vrot.slane %v13689_v59, 3  ;;  %v8722_v2 = vrot.slane %v8172_v19, 6 }
 0x45f   : > { %10570 = vmatpush3.bf16.xpose.msra.mxu0 %v8286_v23  ;;  %v8517_v23 = vsel %vm532_vm1, %v8449_v37, 0  ;;  %v8451_v45 = vsel %vm8412_vm12, %v8448_v35, %v8450_v33  ;;  %v8725_v32 = vrot.slane %v13534_v34, 5  ;;  %v8726_v22 = vrot.slane %v13537_v48, 6 }
 0x460   : > { %10575 = vmatprep.subr.bf16.mxu0 %v15579_v15  ;;  %v6150_v46 = vrot.slane %v13704_v39, 3  ;;  %v8729_v62 = vrot.slane %v8187_v1, 5  ;;  %v6133_v19 = vsel %vm476_vm0, %v6130_v29, %v6132_v41  ;;  %v15422_v35 = vshrl.u32 %v13587_v21, 16 }
 0x461   : > { %v8520_v1 = vsel %vm532_vm1, %v8451_v45, 0  ;;  %v8452_v10 = vrot.slane %v13485_v20, 5  ;;  %v6188_v29 = vsel %vm532_vm1, %v6133_v19, 0  ;;  %v15423_v45 = vshrl.u32 %v13589_v47, 16 }
 0x462   : > { %v13794_v14 = vld [vmem:[#allocation2 + $0x80] sm:$0xff] }
 0x464   : > { %9747 = vmatpush3.bf16.xpose.msra.mxu1 %v6182_v58  ;;  %v8730_v58 = vrot.slane %v8190_v9, 6  ;;  %v13729_v9 = vld [vmem:[#allocation2 + $0x38] sm:$0xff] }
 0x465   : > { %11036 = vmatprep.subr.msk.bf16.mxu1 %vm532_vm1, %v6147_v42  ;;  %v13720_v42 = vld [vmem:[#allocation2 + $0x30] sm:$0xff] }
 0x466   : > { %10572 = vmatmul.mubr.msk.bf16.vlgmr.msra.gmra.mrb[48].mxu0 %vm532_vm1, %v11346_v60  ;;  %v8723_v60 = vor.u32 %v8722_v2, %v8721_v52  ;;  %v8731_v0 = vor.u32 %v8730_v58, %v8729_v62  ;;  %v6134_v52 = vrot.slane %v13720_v42, 3  ;;  %v6410_v2 = vrot.slane %v15422_v35, 2 }
 0x467   : > { %10576 = vmatpush3.bf16.xpose.msra.mxu0 %v8514_v57  ;;  %10591 = vmatprep.mubr.msk.bf16.mxu0 %vm11434_vm9, %v15579_v15  ;;  %v8727_v57 = vor.u32 %v8726_v22, %v8725_v32  ;;  %v15424_v32 = vshll.u32 %v13589_v47, 16  ;;  %v13746_v22 = vld [vmem:[#allocation2 + $0x78] sm:$0xff]  ;;  %v8733_v62 = vrot.slane %v8196_v16, 5  ;;  %v8734_v58 = vrot.slane %v8199_v24, 6 }
 0x468   : > { %10577 = vmatprep.subr.bf16.mxu0 %v15579_v15  ;;  %v13725_v3 = vsel %vm8636_vm13, %v13698_v54, %v8723_v60  ;;  %v6135_v51 = vsel %vm476_vm0, %v6132_v41, %v6134_v52  ;;  %v15428_v24 = vshll.u32 %v13591_v55, 16  ;;  %v15430_v41 = vshll.u32 %v13597_v49, 16 }
 0x469   : > { %v13732_v37 = vsel %vm8636_vm13, %v8723_v60, %v8727_v57  ;;  %v6136_v60 = vrot.slane %v13729_v9, 3  ;;  %v13763_v16 = vor.u32 %v8734_v58, %v8733_v62  ;;  %v15454_v26 = vshll.u32 %v13720_v42, 16 }
 0x46a   : > { %v6350_v58 = vrot.slane %v15428_v24, 3  ;;  %v15434_v24 = vshrl.u32 %v13629_v28, 16 }
 0x46c   : > { %9749 = vmatpush3.bf16.xpose.msra.mxu1 %v6185_v11  ;;  %v6151_v11 = vsel %vm476_vm0, %v6148_v17, %v6150_v46  ;;  %v8454_v17 = vrot.slane %v13522_v8, 5  ;;  %v8453_v8 = vsel %vm8412_vm12, %v8450_v33, %v8452_v10  ;;  %v13775_v33 = vsel %vm8636_vm13, %v8731_v0, %v13763_v16 }
 0x46d   : > { %11037 = vmatprep.subr.msk.bf16.mxu1 %vm532_vm1, %v6149_v30  ;;  %v13738_v30 = vsel %vm8636_vm13, %v8727_v57, %v8731_v0  ;;  %v6419_v57 = vrot.slane %v15423_v45, 2  ;;  %v6191_v0 = vsel %vm532_vm1, %v6135_v51, 0  ;;  %v6437_v27 = vrot.slane %v15434_v24, 2 }
 0x46e   : > { %v8455_v44 = vsel %vm8412_vm12, %v8452_v10, %v8454_v17  ;;  %v15439_v24 = vshll.u32 %v13650_v13, 16 }
 0x46f   : > { %10578 = vmatpush3.bf16.xpose.msra.mxu0 %v8517_v23  ;;  %v15421_v23 = vshll.u32 %v13587_v21, 16  ;;  %v8526_v51 = vsel %vm532_vm1, %v8455_v44, 0  ;;  %v15453_v44 = vrot.slane %v13794_v14, 3 }
 0x470   : > { %10579 = vmatprep.subr.bf16.mxu0 %v15579_v15 }
 0x471   : > { %v6413_v19 = vrot.slane %v15421_v23, 3  ;;  %v6152_v23 = vrot.slane %v13746_v22, 3 }
 0x473   : > { %v13768_v35 = vor.u32 %v6413_v19, %v6410_v2  ;;  %v6431_v19 = vrot.slane %v15430_v41, 3 }
 0x474   : > { %9751 = vmatpush3.bf16.xpose.msra.mxu1 %v6188_v29  ;;  %v6422_v29 = vrot.slane %v15424_v32, 3  ;;  %v15429_v32 = vshrl.u32 %v13597_v49, 16 }
 0x475   : > { %11038 = vmatprep.subr.msk.bf16.mxu1 %vm532_vm1, %v6151_v11  ;;  %v15427_v11 = vshrl.u32 %v13591_v55, 16 }
 0x476   : > { %v6423_v45 = vor.u32 %v6422_v29, %v6419_v57  ;;  %v6428_v10 = vrot.slane %v15429_v32, 2  ;;  %v15442_v57 = vshrl.u32 %v13612_v61, 16  ;;  %v6153_v29 = vsel %vm476_vm0, %v6150_v46, %v6152_v23 }
 0x477   : > { %10580 = vmatpush3.bf16.xpose.msra.mxu0 %v8520_v1  ;;  %v6137_v1 = vsel %vm476_vm0, %v6134_v52, %v6136_v60  ;;  %v6347_v2 = vrot.slane %v15427_v11, 2  ;;  %v8523_v52 = vsel %vm532_vm1, %v8453_v8, 0  ;;  %v15436_v11 = vshll.u32 %v13612_v61, 16 }
 0x478   : > { %10581 = vmatprep.subr.bf16.mxu0 %v15579_v15  ;;  %v13780_v62 = vsel %vm833_vm2, %v13768_v35, %v6423_v45  ;;  %v15435_v32 = vshll.u32 %v13629_v28, 16  ;;  %v6194_v8 = vsel %vm532_vm1, %v6137_v1, 0  ;;  %v6432_v41 = vor.u32 %v6431_v19, %v6428_v10 }
 0x479   : > { %v13804_v4 = vor.u32 %v6350_v58, %v6347_v2  ;;  %v6359_v46 = vrot.slane %v15436_v11, 3  ;;  %v15441_v10 = vshrl.u32 %v13636_v6, 16  ;;  %v15437_v2 = vshll.u32 %v13636_v6, 16 }
 0x47a   : > { %v6440_v56 = vrot.slane %v15435_v32, 3  ;;  %v13814_v1 = vsel %vm833_vm2, %v6423_v45, %v6432_v41  ;;  %v15440_v11 = vshrl.u32 %v13659_v63, 16 }
 0x47b   : > { %v6365_v45 = vrot.slane %v15441_v10, 2  ;;  %v6368_v32 = vrot.slane %v15437_v2, 3  ;;  %v15445_v2 = vshll.u32 %v13679_v50, 16 }
 0x47c   : > { %9753 = vmatpush3.bf16.xpose.msra.mxu1 %v6191_v0  ;;  %v6356_v0 = vrot.slane %v15442_v57, 2  ;;  %v6441_v19 = vor.u32 %v6440_v56, %v6437_v27  ;;  %v6139_v56 = vsel %vm476_vm0, %v6136_v60, %v6138_v18  ;;  %v6374_v18 = vrot.slane %v15440_v11, 2 }
 0x47d   : > { %11039 = vmatprep.subr.msk.bf16.mxu1 %vm532_vm1, %v6153_v29  ;;  %v15438_v29 = vshrl.u32 %v13650_v13, 16  ;;  %v15444_v60 = vshll.u32 %v13659_v63, 16  ;;  %v6458_v57 = vrot.slane %v15445_v2, 3  ;;  %v13877_v2 = vld [vmem:[#allocation2 + $0x88] sm:$0xff] }
 0x47e   : > { %v6360_v58 = vor.u32 %v6359_v46, %v6356_v0  ;;  %v13837_v7 = vsel %vm833_vm2, %v6432_v41, %v6441_v19  ;;  %v6369_v0 = vor.u32 %v6368_v32, %v6365_v45  ;;  %v6449_v46 = vrot.slane %v15439_v24, 3 }
 0x47f   : > { %10582 = vmatpush3.bf16.xpose.msra.mxu0 %v8523_v52  ;;  %v8457_v52 = vsel %vm8412_vm12, %v8454_v17, %v8456_v5  ;;  %v6446_v5 = vrot.slane %v15438_v29, 2  ;;  %v6155_v17 = vsel %vm476_vm0, %v6152_v23, %v15453_v44  ;;  %v15443_v41 = vshrl.u32 %v13679_v50, 16 }
 0x480   : > { %10583 = vmatprep.subr.bf16.mxu0 %v15579_v15  ;;  %v13834_v27 = vsel %vm833_vm2, %v13804_v4, %v6360_v58  ;;  %v15447_v29 = vshrl.u32 %v13689_v59, 16  ;;  %v13854_v23 = vsel %vm833_vm2, %v6360_v58, %v6369_v0  ;;  %v15448_v45 = vshll.u32 %v13689_v59, 16 }
 0x481   : > { %v6450_v32 = vor.u32 %v6449_v46, %v6446_v5  ;;  %v15450_v24 = vshrl.u32 %v13704_v39, 16  ;;  %v6377_v11 = vrot.slane %v15444_v60, 3  ;;  %v6455_v10 = vrot.slane %v15443_v41, 2 }
 0x482   : > { %v6383_v5 = vrot.slane %v15447_v29, 2  ;;  %v15451_v60 = vshll.u32 %v13704_v39, 16  ;;  %v15455_v29 = vshrl.u32 %v13746_v22, 16  ;;  %v15460_v44 = vshrl.u32 %v13794_v14, 16 }
 0x483   : > { %v13866_v58 = vsel %vm833_vm2, %v6441_v19, %v6450_v32  ;;  %v6378_v46 = vor.u32 %v6377_v11, %v6374_v18  ;;  %v6459_v41 = vor.u32 %v6458_v57, %v6455_v10  ;;  %v6197_v10 = vsel %vm532_vm1, %v6139_v56, 0 }
 0x484   : > { %9755 = vmatpush3.bf16.xpose.msra.mxu1 %v6194_v8  ;;  %v8529_v8 = vsel %vm532_vm1, %v8457_v52, 0  ;;  %v6464_v52 = vrot.slane %v15450_v24, 2  ;;  %v6467_v11 = vrot.slane %v15451_v60, 3 }
 0x485   : > { %11040 = vmatprep.subr.msk.bf16.mxu1 %vm532_vm1, %v6155_v17  ;;  %v6386_v17 = vrot.slane %v15448_v45, 3  ;;  %v15456_v45 = vshll.u32 %v13746_v22, 16  ;;  %v13883_v38 = vsel %vm833_vm2, %v6369_v0, %v6378_v46  ;;  %v13886_v24 = vsel %vm833_vm2, %v6450_v32, %v6459_v41 }
 0x486   : > { %v6473_v0 = vrot.slane %v15455_v29, 2  ;;  %v6156_v32 = vrot.slane %v13877_v2, 3 }
 0x487   : > { %10584 = vmatpush3.bf16.xpose.msra.mxu0 %v8526_v51  ;;  %v15452_v51 = vshrl.u32 %v13720_v42, 16  ;;  %v6387_v19 = vor.u32 %v6386_v17, %v6383_v5  ;;  %v6395_v5 = vrot.slane %v15454_v26, 3  ;;  %v6468_v17 = vor.u32 %v6467_v11, %v6464_v52 }
 0x488   : > { %10585 = vmatprep.subr.bf16.mxu0 %v15579_v15  ;;  %v6476_v60 = vrot.slane %v15456_v45, 3  ;;  %v15461_v26 = vshll.u32 %v13794_v14, 16  ;;  %v15462_v11 = vshrl.u32 %v13877_v2, 16 }
 0x489   : > { %v6392_v57 = vrot.slane %v15452_v51, 2  ;;  %v13894_v18 = vsel %vm833_vm2, %v6378_v46, %v6387_v19  ;;  %v15458_v51 = vshrl.u32 %v13729_v9, 16  ;;  %v15457_v46 = vshll.u32 %v13729_v9, 16 }
 0x48a   : > { %v13909_v29 = vsel %vm833_vm2, %v6459_v41, %v6468_v17  ;;  %v6485_v41 = vrot.slane %v15461_v26, 3  ;;  %v13938_v26 = vld [vmem:[%s15365_s3 + $0x8] sm:$0xff]  }
 0x48b   : > { %v6396_v56 = vor.u32 %v6395_v5, %v6392_v57  ;;  %v6401_v52 = vrot.slane %v15458_v51, 2  ;;  %v6404_v57 = vrot.slane %v15457_v46, 3  ;;  %v6482_v5 = vrot.slane %v15460_v44, 2 }
 0x48c   : > { %9757 = vmatpush3.bf16.xpose.msra.mxu1 %v6197_v10  ;;  %v6477_v10 = vor.u32 %v6476_v60, %v6473_v0  ;;  %v15594_v60 = vrot.slane %v13794_v14, 3  ;;  %v15463_v46 = vshll.u32 %v13877_v2, 16 }
 0x48d   : > { %10435 = vmatprep.subr.bf16.mxu1 %v15579_v15  ;;  %v13915_v45 = vsel %vm833_vm2, %v6387_v19, %v6396_v56  ;;  %v6491_v19 = vrot.slane %v15462_v11, 2  ;;  %v6405_v51 = vor.u32 %v6404_v57, %v6401_v52  ;;  %v6486_v12 = vor.u32 %v6485_v41, %v6482_v5  ;;  %v11357_v5 = vld [vmem:[#allocation2 + $0xd0] sm:$0x1f] }
 0x48e   : > { %v6157_v0 = vsel %vm476_vm0, %v15594_v60, %v6156_v32  ;;  %v6494_v44 = vrot.slane %v15463_v46, 3  ;;  %v8460_v41 = vrot.slane %v11357_v5, 5  ;;  %v15603_v5 = vshll.u32 %v13399_v25, 16 }
 0x48f   : > { %10586 = vmatpush3.bf16.xpose.msra.mxu0 %v8529_v8  ;;  %v13928_v8 = vsel %vm833_vm2, %v6468_v17, %v6477_v10  ;;  %v6224_v17 = vsel %vm532_vm1, %v6157_v0, 0  ;;  %v13944_v60 = vsel %vm833_vm2, %v6396_v56, %v6405_v51  ;;  %v13947_v11 = vsel %vm833_vm2, %v6477_v10, %v6486_v12  ;;  %v13958_v0 = vld [vmem:[#allocation2 + $0x90] sm:$0xff] }
 0x490   : > { %10587 = vmatprep.subr.bf16.mxu0 %v15579_v15  ;;  %15595 = vst [vmem:[#allocation7_spill] sm:$0xff] %v13928_v8  ;;  %15596 = vst [vmem:[#allocation6_spill] sm:$0xff] %v13944_v60  ;;  %v13951_v52 = vsel %vm833_vm2, %v6405_v51, %v13768_v35  ;;  %v13955_v57 = vor.u32 %v6494_v44, %v6491_v19  ;;  %v6158_v56 = vrot.slane %v13958_v0, 3  ;;  %v15600_v10 = vshrl.u32 %v13372_v31, 16  ;;  %v13981_v8 = vld [vmem:[#allocation2 + $0x98] sm:$0xff] }
 0x491   : > { %15597 = vst [vmem:[#allocation9_spill] sm:$0xff] %v13947_v11  ;;  %15598 = vst [vmem:[#allocation11_spill] sm:$0xff] %v13951_v52  ;;  %v15601_v35 = vshll.u32 %v13372_v31, 16  ;;  %v15602_v44 = vshrl.u32 %v13399_v25, 16  ;;  %v8714_v52 = vrot.slane %v15603_v5, 6  ;;  %v15605_v60 = vshrl.u32 %v13364_v40, 16 }
 0x492   : > { %15599 = vst [vmem:[#allocation8_spill] sm:$0xff] %v13955_v57  ;;  %v8709_v46 = vrot.slane %v15600_v10, 5  ;;  %v13973_v11 = vsel %vm833_vm2, %v6486_v12, %v13955_v57  ;;  %v15606_v31 = vshll.u32 %v13364_v40, 16  ;;  %v6160_v25 = vrot.slane %v13981_v8, 3  ;;  %v13984_v5 = vld [vmem:[#allocation2 + $0xa0] sm:$0xff] }
 0x493   : > { %9759 = vmatmul.mubr.msk.bf16.vlgmr.msra.gmra.mrb[16].mxu1 %vm532_vm1, %v13938_v26  ;;  %v8710_v51 = vrot.slane %v15601_v35, 6  ;;  %v8713_v19 = vrot.slane %v15602_v44, 5  ;;  %15604 = vst [vmem:[#allocation10_spill] sm:$0xff] %v13973_v11  ;;  %v8705_v10 = vrot.slane %v15605_v60, 5  ;;  %v6162_v12 = vrot.slane %v13984_v5, 3 }
 0x494   : > { %10436 = vmatpush3.bf16.xpose.msra.mxu1 %v6224_v17  ;;  %10451 = vmatprep.mubr.msk.bf16.mxu1 %vm11434_vm9, %v15579_v15  ;;  %v8532_v17 = vsel %vm532_vm1, %v13676_v36, 0  ;;  %v8706_v35 = vrot.slane %v15606_v31, 6  ;;  %v6159_v36 = vsel %vm476_vm0, %v6156_v32, %v6158_v56  ;;  %v15466_v32 = vrot.slane %v13448_v53, 3 }
 0x495   : > { %10437 = vmatprep.subr.bf16.mxu1 %v15579_v15  ;;  %v8711_v44 = vor.u32 %v8710_v51, %v8709_v46  ;;  %v8715_v57 = vor.u32 %v8714_v52, %v8713_v19  ;;  %v6227_v31 = vsel %vm532_vm1, %v6159_v36, 0  ;;  %v6161_v11 = vsel %vm476_vm0, %v6158_v56, %v6160_v25 }
 0x496   : > { %v13991_v40 = vor.u32 %v8706_v35, %v8705_v10  ;;  %v15610_v10 = vshll.u32 %v13587_v21, 16  ;;  %v15611_v36 = vshrl.u32 %v13589_v47, 16 }
 0x497   : > { %10588 = vmatpush3.bf16.xpose.msra.mxu0 %v8532_v17  ;;  %v15607_v17 = vrot.slane %v13574_v43, 5  ;;  %v6163_v43 = vsel %vm476_vm0, %v6160_v25, %v6162_v12  ;;  %v8716_v52 = vsel %vm8636_vm13, %v8711_v44, %v8715_v57  ;;  %v15612_v25 = vshll.u32 %v13589_v47, 16 }
 0x498   : > { %10589 = vmatprep.subr.bf16.mxu0 %v15579_v15  ;;  %15608 = vst [vmem:[#allocation14_spill] sm:$0xff] %v13991_v40  ;;  %v8712_v51 = vsel %vm8636_vm13, %v13991_v40, %v8711_v44  ;;  %v6765_v35 = vrot.slane %v15610_v10, 4  ;;  %v6768_v56 = vrot.slane %v15611_v36, 3  ;;  %v15613_v10 = vshrl.u32 %v13591_v55, 16 }
 0x499   : > { %v8461_v60 = vsel %vm8412_vm12, %v15607_v17, %v8460_v41  ;;  %v15609_v41 = vshrl.u32 %v13587_v21, 16  ;;  %v6230_v17 = vsel %vm532_vm1, %v6161_v11, 0  ;;  %v8798_v44 = vsel %vm532_vm1, %v8712_v51, 0  ;;  %v11348_v51 = vld [vmem:[%s15365_s3 + $0x38] sm:$0xff]  }
 0x49a   : > { %v8535_v46 = vsel %vm532_vm1, %v8461_v60, 0  ;;  %v6165_v60 = vsel %vm476_vm0, %v6162_v12, %v15466_v32  ;;  %v6233_v21 = vsel %vm532_vm1, %v6163_v43, 0  ;;  %v14021_v11 = vsel %vm532_vm1, %v8716_v52, 0 }
 0x49b   : > { %v6764_v19 = vrot.slane %v15609_v41, 3  ;;  %v14025_v12 = vsel %vm8636_vm13, %v8715_v57, %v13698_v54  ;;  %v15614_v36 = vshll.u32 %v13591_v55, 16  ;;  %v14033_v43 = vsel %vm532_vm1, %v6165_v60, 0 }
 0x49c   : > { %10438 = vmatpush3.bf16.xpose.msra.mxu1 %v6227_v31  ;;  %v6769_v31 = vrot.slane %v15612_v25, 4  ;;  %v15616_v55 = vshrl.u32 %v13597_v49, 16  ;;  %v15620_v52 = vshrl.u32 %v13629_v28, 16 }
 0x49d   : > { %10439 = vmatprep.subr.bf16.mxu1 %v15579_v15  ;;  %v14016_v41 = vor.u32 %v6765_v35, %v6764_v19  ;;  %v6737_v25 = vrot.slane %v15614_v36, 4  ;;  %v15618_v36 = vshrl.u32 %v13612_v61, 16  ;;  %v15619_v19 = vshll.u32 %v13612_v61, 16 }
 0x49e   : > { %v6770_v47 = vor.u32 %v6769_v31, %v6768_v56  ;;  %v6772_v56 = vrot.slane %v15616_v55, 3  ;;  %v15617_v31 = vshll.u32 %v13597_v49, 16  ;;  %v6776_v40 = vrot.slane %v15620_v52, 3 }
 0x49f   : > { %10590 = vmatpush3.bf16.xpose.msra.mxu0 %v8535_v46  ;;  %v6736_v46 = vrot.slane %v15613_v10, 3  ;;  %v6740_v32 = vrot.slane %v15618_v36, 3  ;;  %v6741_v35 = vrot.slane %v15619_v19, 4  ;;  %v15622_v49 = vshrl.u32 %v13636_v6, 16 }
 0x4a0   : > { %10595 = vmatprep.subr.bf16.mxu0 %v15579_v15  ;;  %v14040_v54 = vsel %vm1368_vm3, %v14016_v41, %v6770_v47  ;;  %v6773_v10 = vrot.slane %v15617_v31, 4  ;;  %v15623_v31 = vshll.u32 %v13636_v6, 16  ;;  %v15624_v36 = vshrl.u32 %v13650_v13, 16 }
 0x4a1   : > { %15615 = vst [vmem:[#allocation12_spill] sm:$0xff] %v14040_v54  ;;  %v14042_v57 = vor.u32 %v6737_v25, %v6736_v46  ;;  %v15621_v25 = vshll.u32 %v13629_v28, 16  ;;  %v6742_v19 = vor.u32 %v6741_v35, %v6740_v32  ;;  %v15625_v54 = vshll.u32 %v13650_v13, 16 }
 0x4a2   : > { %v6774_v46 = vor.u32 %v6773_v10, %v6772_v56  ;;  %v6745_v60 = vrot.slane %v15623_v31, 4  ;;  %v6780_v52 = vrot.slane %v15624_v36, 3  ;;  %v15626_v13 = vshrl.u32 %v13659_v63, 16 }
 0x4a3   : > { %v6777_v55 = vrot.slane %v15621_v25, 4  ;;  %v6781_v56 = vrot.slane %v15625_v54, 4  ;;  %v14077_v32 = vsel %vm1368_vm3, %v14042_v57, %v6742_v19  ;;  %v15627_v35 = vshll.u32 %v13659_v63, 16 }
 0x4a4   : > { %10440 = vmatpush3.bf16.xpose.msra.mxu1 %v6230_v17  ;;  %v6744_v17 = vrot.slane %v15622_v49, 3  ;;  %v14070_v10 = vsel %vm1368_vm3, %v6770_v47, %v6774_v46  ;;  %v15632_v47 = vshrl.u32 %v13704_v39, 16  ;;  %v15633_v28 = vshll.u32 %v13704_v39, 16 }
 0x4a5   : > { %10441 = vmatprep.subr.bf16.mxu1 %v15579_v15  ;;  %v6778_v25 = vor.u32 %v6777_v55, %v6776_v40  ;;  %v6749_v54 = vrot.slane %v15627_v35, 4  ;;  %v15628_v55 = vshrl.u32 %v13679_v50, 16  ;;  %v15636_v39 = vshrl.u32 %v13746_v22, 16 }
 0x4a6   : > { %10592 = vmatmul.mubr.msk.bf16.vlgmr.msra.gmra.mrb[52].mxu0 %vm532_vm1, %v11348_v51  ;;  %v6746_v6 = vor.u32 %v6745_v60, %v6744_v17  ;;  %v6782_v51 = vor.u32 %v6781_v56, %v6780_v52  ;;  %v14092_v17 = vld [vmem:[#allocation2 + $0xa8] sm:$0xff]  ;;  %v15629_v52 = vshll.u32 %v13679_v50, 16  ;;  %v6789_v61 = vrot.slane %v15633_v28, 4 }
 0x4a7   : > { %10596 = vmatpush3.bf16.xpose.msra.mxu0 %v8798_v44  ;;  %10611 = vmatprep.mubr.msk.bf16.mxu0 %vm11434_vm9, %v15579_v15  ;;  %v6748_v44 = vrot.slane %v15626_v13, 3  ;;  %v14085_v40 = vsel %vm1368_vm3, %v6774_v46, %v6778_v25  ;;  %v6784_v49 = vrot.slane %v15628_v55, 3  ;;  %v15630_v46 = vshrl.u32 %v13689_v59, 16 }
 0x4a8   : > { %10597 = vmatprep.subr.bf16.mxu0 %v15579_v15  ;;  %v14088_v60 = vsel %vm1368_vm3, %v6742_v19, %v6746_v6  ;;  %v14096_v36 = vsel %vm1368_vm3, %v6778_v25, %v6782_v51  ;;  %v6785_v56 = vrot.slane %v15629_v52, 4  ;;  %v15631_v19 = vshll.u32 %v13689_v59, 16 }
 0x4a9   : > { %v6750_v63 = vor.u32 %v6749_v54, %v6748_v44  ;;  %v6752_v13 = vrot.slane %v15630_v46, 3  ;;  %v6788_v55 = vrot.slane %v15632_v47, 3  ;;  %v15634_v50 = vshrl.u32 %v13720_v42, 16 }
 0x4aa   : > { %v6753_v35 = vrot.slane %v15631_v19, 4  ;;  %v6786_v44 = vor.u32 %v6785_v56, %v6784_v49  ;;  %v15635_v52 = vshll.u32 %v13720_v42, 16  ;;  %v6792_v28 = vrot.slane %v15636_v39, 3 }
 0x4ab   : > { %v14109_v25 = vsel %vm1368_vm3, %v6746_v6, %v6750_v63  ;;  %v6756_v54 = vrot.slane %v15634_v50, 3  ;;  %v6790_v47 = vor.u32 %v6789_v61, %v6788_v55  ;;  %v15637_v49 = vshll.u32 %v13746_v22, 16  ;;  %v14138_v22 = vld [vmem:[#allocation2 + $0xb0] sm:$0xff] }
 0x4ac   : > { %10442 = vmatpush3.bf16.xpose.msra.mxu1 %v6233_v21  ;;  %v6757_v46 = vrot.slane %v15635_v52, 4  ;;  %v6754_v19 = vor.u32 %v6753_v35, %v6752_v13  ;;  %v14120_v21 = vsel %vm1368_vm3, %v6782_v51, %v6786_v44  ;;  %v15638_v50 = vshrl.u32 %v13729_v9, 16 }
 0x4ad   : > { %10443 = vmatprep.subr.bf16.mxu1 %v15579_v15  ;;  %v6793_v56 = vrot.slane %v15637_v49, 4  ;;  %v14131_v61 = vsel %vm1368_vm3, %v6786_v44, %v6790_v47  ;;  %v15639_v13 = vshll.u32 %v13729_v9, 16  ;;  %v15640_v51 = vshrl.u32 %v13794_v14, 16 }
 0x4ae   : > { %v6758_v6 = vor.u32 %v6757_v46, %v6756_v54  ;;  %v6760_v42 = vrot.slane %v15638_v50, 3  ;;  %v14128_v52 = vsel %vm1368_vm3, %v6750_v63, %v6754_v19  ;;  %v15641_v46 = vshll.u32 %v13794_v14, 16 }
 0x4af   : > { %10598 = vmatpush3.bf16.xpose.msra.mxu0 %v14021_v11  ;;  %v6761_v35 = vrot.slane %v15639_v13, 4  ;;  %v6796_v55 = vrot.slane %v15640_v51, 3  ;;  %v6794_v63 = vor.u32 %v6793_v56, %v6792_v28  ;;  %v15469_v39 = vshll.u32 %v14138_v22, 16 }
 0x4b0   : > { %10599 = vmatprep.subr.bf16.mxu0 %v15579_v15  ;;  %v14142_v11 = vsel %vm1368_vm3, %v6754_v19, %v6758_v6  ;;  %v6797_v44 = vrot.slane %v15641_v46, 4  ;;  %v15642_v49 = vshrl.u32 %v13877_v2, 16  ;;  %v15643_v13 = vshll.u32 %v13877_v2, 16 }
 0x4b1   : > { %v6762_v9 = vor.u32 %v6761_v35, %v6760_v42  ;;  %v14152_v59 = vsel %vm1368_vm3, %v6790_v47, %v6794_v63  ;;  %v15644_v19 = vshrl.u32 %v13958_v0, 16  ;;  %v15645_v28 = vshll.u32 %v13958_v0, 16 }
 0x4b2   : > { %v6800_v50 = vrot.slane %v15642_v49, 3  ;;  %v6801_v51 = vrot.slane %v15643_v13, 4  ;;  %v6798_v54 = vor.u32 %v6797_v44, %v6796_v55  ;;  %v15646_v2 = vshrl.u32 %v13981_v8, 16 }
 0x4b3   : > { %v6804_v31 = vrot.slane %v15644_v19, 3  ;;  %v6805_v14 = vrot.slane %v15645_v28, 4  ;;  %v14159_v56 = vsel %vm1368_vm3, %v6758_v6, %v6762_v9  ;;  %v14163_v42 = vsel %vm1368_vm3, %v6762_v9, %v14016_v41 }
 0x4b4   : > { %v6802_v35 = vor.u32 %v6801_v51, %v6800_v50  ;;  %v6808_v46 = vrot.slane %v15646_v2, 3  ;;  %10444 = vmatpush3.bf16.xpose.msra.mxu1 %v14033_v43  ;;  %v14169_v47 = vsel %vm1368_vm3, %v6794_v63, %v6798_v54  ;;  %v15647_v6 = vshll.u32 %v13981_v8, 16 }
 0x4b5   : > { %v6806_v55 = vor.u32 %v6805_v14, %v6804_v31  ;;  %10445 = vmatprep.subr.bf16.mxu1 %v15579_v15  ;;  %v15648_v41 = vshrl.u32 %v13984_v5, 16  ;;  %v15649_v50 = vshll.u32 %v13984_v5, 16  ;;  %v8804_v43 = vsel %vm532_vm1, %v14025_v12, 0 }
 0x4b6   : > { %v14173_v44 = vsel %vm1368_vm3, %v6798_v54, %v6802_v35  ;;  %v6809_v49 = vrot.slane %v15647_v6, 4  ;;  %v15651_v31 = vshrl.u32 %v14092_v17, 16  ;;  %v15652_v54 = vshll.u32 %v14092_v17, 16 }
 0x4b7   : > { %v6812_v9 = vrot.slane %v15648_v41, 3  ;;  %v6813_v13 = vrot.slane %v15649_v50, 4  ;;  %v14184_v63 = vsel %vm1368_vm3, %v6802_v35, %v6806_v55  ;;  %10600 = vmatpush3.bf16.xpose.msra.mxu0 %v8804_v43  ;;  %v15653_v28 = vrot.slane %v13485_v20, 3 }
 0x4b8   : > { %15650 = vst [vmem:[#allocation15_spill] sm:$0xff] %v14184_v63  ;;  %v6816_v51 = vrot.slane %v15651_v31, 3  ;;  %v6817_v19 = vrot.slane %v15652_v54, 4  ;;  %v15654_v14 = vrot.slane %v13448_v53, 3  ;;  %v6810_v6 = vor.u32 %v6809_v49, %v6808_v46  ;;  %10601 = vmatprep.subr.bf16.mxu0 %v15579_v15 }
 0x4b9   : > { %v6814_v41 = vor.u32 %v6813_v13, %v6812_v9  ;;  %v15655_v12 = vshrl.u32 %v14138_v22, 16  ;;  %v6821_v31 = vrot.slane %v15469_v39, 4  ;;  %v6824_v54 = vrot.slane %v13534_v34, 3 }
 0x4ba   : > { %v6167_v2 = vsel %vm476_vm0, %v15654_v14, %v15653_v28  ;;  %v6818_v35 = vor.u32 %v6817_v19, %v6816_v51  ;;  %v6825_v43 = vrot.slane %v13537_v48, 4  ;;  %v14203_v63 = vsel %vm1368_vm3, %v6806_v55, %v6810_v6  ;;  %v11363_v51 = vld [vmem:[#allocation2 + $0xb8] sm:$0xff] }
 0x4bb   : > { %v6820_v50 = vrot.slane %v15655_v12, 3  ;;  %v14206_v53 = vsel %vm1368_vm3, %v6810_v6, %v6814_v41  ;;  %v6239_v9 = vsel %vm532_vm1, %v6167_v2, 0  ;;  %v6168_v19 = vrot.slane %v11363_v51, 3  ;;  %v6062_v12 = vld [vmem:[#allocation2] sm:$0xfc] }
 0x4bc   : > { %v14209_v46 = vsel %vm1368_vm3, %v6814_v41, %v6818_v35  ;;  %v14212_v13 = vor.u32 %v6825_v43, %v6824_v54  ;;  %10446 = vmatpush3.bf16.xpose.msra.mxu1 %v6239_v9  ;;  %v8807_v14 = vsel %vm532_vm1, %v13725_v3, 0  ;;  %v15656_v2 = vrot.slane %v13485_v20, 3  ;;  %v14228_v41 = vld [vmem:[#allocation2 + $0xc0] sm:$0x7] }
 0x4bd   : > { %v6822_v49 = vor.u32 %v6821_v31, %v6820_v50  ;;  %10447 = vmatprep.subr.bf16.mxu1 %v15579_v15  ;;  %v6337_v31 = vshrl.u32 %v6062_v12, 16  ;;  %v6340_v54 = vshll.u32 %v6062_v12, 16  ;;  %v8810_v3 = vsel %vm532_vm1, %v13732_v37, 0  ;;  %v14248_v12 = vld [vmem:[%s15365_s3] sm:$0xff]  }
 0x4be   : > { %v6169_v6 = vsel %vm476_vm0, %v15656_v2, %v6168_v19  ;;  %v8813_v2 = vsel %vm532_vm1, %v13738_v30, 0 }
 0x4bf   : > { %v14215_v28 = vsel %vm1368_vm3, %v6818_v35, %v6822_v49  ;;  %v14220_v55 = vsel %vm1368_vm3, %v6822_v49, %v14212_v13  ;;  %10602 = vmatpush3.bf16.xpose.msra.mxu0 %v8807_v14  ;;  %v6242_v50 = vsel %vm532_vm1, %v6169_v6, 0  ;;  %v6170_v35 = vrot.slane %v14228_v41, 3  ;;  %v8627_v14 = vld [vmem:[#allocation2 + $0xd0] sm:$0x3f] }
 0x4c0   : > { %10603 = vmatprep.subr.bf16.mxu0 %v15579_v15  ;;  %v6339_v43 = vrot.slane %v6337_v31, 2  ;;  %v6342_v49 = vrot.slane %v6340_v54, 3  ;;  %v8738_v37 = vshrl.u32 %v8627_v14, 16  ;;  %v8741_v6 = vshll.u32 %v8627_v14, 16 }
 0x4c1   : > { %v6171_v20 = vsel %vm476_vm0, %v6168_v19, %v6170_v35  ;;  %v6567_v31 = vsel %vm532_vm1, %v13834_v27, 0  ;;  %v14277_v27 = vld [vmem:[#allocation2 + $0x98] sm:$0xff] }
 0x4c2   : > { %v6245_v9 = vsel %vm532_vm1, %v6171_v20, 0  ;;  %v6343_v51 = vor.u32 %v6342_v49, %v6339_v43  ;;  %v8743_v30 = vrot.slane %v8741_v6, 6  ;;  %v14285_v20 = vld [vmem:[#allocation2 + $0xb0] sm:$0xff]  ;;  %v7493_v49 = vrot.slane %v14277_v27, 4 }
 0x4c3   : > { %v14289_v43 = vld [vmem:[#allocation2 + $0x10] sm:$0xff]  ;;  %v7499_v6 = vrot.slane %v14285_v20, 4 }
 0x4c4   : > { %10448 = vmatpush3.bf16.xpose.msra.mxu1 %v6242_v50  ;;  %v6352_v19 = vsel %vm833_vm2, %v6343_v51, %v13804_v4  ;;  %v8740_v50 = vrot.slane %v8738_v37, 5  ;;  %v8816_v4 = vsel %vm532_vm1, %v13775_v33, 0  ;;  %v6570_v33 = vsel %vm532_vm1, %v13854_v23, 0  ;;  %v14283_v23 = vld [vmem:[#allocation2 + $0x48] sm:$0xff]  ;;  %v14299_v37 = vld [vmem:[#allocation2 + $0xc0] sm:$0xff] }
 0x4c5   : > { %10449 = vmatprep.subr.bf16.mxu1 %v15579_v15  ;;  %v15470_v14 = vshrl.u32 %v14283_v23, 16 }
 0x4c6   : > { %v8744_v35 = vor.u32 %v8743_v30, %v8740_v50 }
 0x4c7   : > { %10604 = vmatpush3.bf16.xpose.msra.mxu0 %v8810_v3  ;;  %v14281_v3 = vld [vmem:[#allocation2 + $0xa8] sm:$0xff] }
 0x4c8   : > { %10605 = vmatprep.subr.bf16.mxu0 %v15579_v15  ;;  %v7497_v51 = vrot.slane %v14281_v3, 4 }
 0x4cc   : > { %10450 = vmatpush3.bf16.xpose.msra.mxu1 %v6245_v9 }
 0x4cd   : > { %11041 = vmatprep.subr.msk.bf16.mxu1 %vm532_vm1, %v13780_v62  ;;  %v6564_v62 = vsel %vm532_vm1, %v6352_v19, 0 }
 0x4cf   : > { %10606 = vmatpush3.bf16.xpose.msra.mxu0 %v8813_v2  ;;  %v15471_v2 = vshll.u32 %v14283_v23, 16 }
 0x4d0   : > { %10607 = vmatprep.subr.bf16.mxu0 %v15579_v15 }
 0x4d3   : > { %10452 = vmatmul.mubr.msk.bf16.vlgmr.msra.gmra.mrb[20].mxu1 %vm532_vm1, %v13938_v26  ;;  %v8745_v26 = vsel %vm8636_vm13, %v13763_v16, %v8744_v35  ;;  %v6573_v16 = vsel %vm532_vm1, %v13883_v38, 0  ;;  %v14291_v38 = vld [vmem:[#allocation2 + $0xc8] sm:$0xf]  ;;  %v15472_v35 = vshrl.u32 %v14289_v43, 16 }
 0x4d4   : > { %9770 = vmatpush3.bf16.xpose.msra.mxu1 %v6564_v62  ;;  %9785 = vmatprep.mubr.msk.bf16.mxu1 %vm532_vm1, %v14248_v12  ;;  %v8819_v54 = vsel %vm532_vm1, %v8745_v26, 0  ;;  %v6576_v62 = vsel %vm532_vm1, %v13894_v18, 0  ;;  %v14317_v26 = vld [vmem:[#allocation2 + $0x8] sm:$0xf0] }
 0x4d5   : > { %11042 = vmatprep.subr.msk.bf16.mxu1 %vm532_vm1, %v13814_v1  ;;  %v14275_v1 = vld [vmem:[#allocation2 + $0x90] sm:$0xff]  ;;  %v7690_v18 = vrot.slane %v15472_v35, 4 }
 0x4d7   : > { %10608 = vmatpush3.bf16.xpose.msra.mxu0 %v8816_v4 }
 0x4d8   : > { %10609 = vmatprep.subr.bf16.mxu0 %v15579_v15 }
 0x4dc   : > { %9772 = vmatpush3.bf16.xpose.msra.mxu1 %v6567_v31  ;;  %v14320_v31 = vsel %vm5964_vm10, %v7497_v51, %v7499_v6 }
 0x4dd   : > { %11043 = vmatprep.subr.msk.bf16.mxu1 %vm532_vm1, %v13837_v7  ;;  %v14279_v7 = vld [vmem:[#allocation2 + $0xa0] sm:$0xff]  ;;  %15659 = vst [vmem:[#allocation19_spill] sm:$0xff] %v14320_v31 }
 0x4de   : > { %v7495_v9 = vrot.slane %v14279_v7, 4 }
 0x4df   : > { %10610 = vmatpush3.bf16.xpose.msra.mxu0 %v8819_v54 }
 0x4e0   : > { %v14311_v30 = vsel %vm5964_vm10, %v7493_v49, %v7495_v9  ;;  %v14314_v4 = vsel %vm5964_vm10, %v7495_v9, %v7497_v51  ;;  %v7719_v9 = vrot.slane %v15471_v2, 5 }
 0x4e1   : > { %15657 = vst [vmem:[#allocation13_spill] sm:$0xff] %v14311_v30  ;;  %15658 = vst [vmem:[#allocation18_spill] sm:$0xff] %v14314_v4  ;;  %v15680_v4 = vshrl.u32 %v14299_v37, 16 }
 0x4e3   : > { %v7778_v30 = vrot.slane %v15680_v4, 4 }
 0x4e4   : > { %9774 = vmatpush3.bf16.xpose.msra.mxu1 %v6570_v33  ;;  %v7503_v33 = vrot.slane %v14299_v37, 4 }
 0x4e5   : > { %11044 = vmatprep.subr.msk.bf16.mxu1 %vm532_vm1, %v13866_v58  ;;  %v14287_v58 = vld [vmem:[#allocation2 + $0xb8] sm:$0xff] }
 0x4e6   : > { %v7501_v19 = vrot.slane %v14287_v58, 4 }
 0x4e8   : > { %v14326_v54 = vsel %vm5964_vm10, %v7499_v6, %v7501_v19  ;;  %v14335_v51 = vsel %vm5964_vm10, %v7501_v19, %v7503_v33  ;;  %v6579_v19 = vsel %vm532_vm1, %v13915_v45, 0  ;;  %v15474_v45 = vshrl.u32 %v14275_v1, 16 }
 0x4e9   : > { %15660 = vst [vmem:[#allocation20_spill] sm:$0xff] %v14326_v54  ;;  %15661 = vst [vmem:[#allocation21_spill] sm:$0xff] %v14335_v51 }
 0x4ec   : > { %9776 = vmatpush3.bf16.xpose.msra.mxu1 %v6573_v16  ;;  %v7505_v16 = vrot.slane %v14291_v38, 4 }
 0x4ed   : > { %11045 = vmatprep.subr.msk.bf16.mxu1 %vm532_vm1, %v13886_v24  ;;  %v15468_v24 = vrot.slane %v14275_v1, 4 }
 0x4ef   : > { %v14308_v50 = vsel %vm5964_vm10, %v15468_v24, %v7493_v49  ;;  %v7718_v49 = vrot.slane %v15470_v14, 4  ;;  %v7686_v24 = vshll.u32 %v14317_v26, 16  ;;  %v15664_v14 = vshll.u32 %v14289_v43, 16 }
 0x4f1   : > { %v14341_v6 = vor.u32 %v7719_v9, %v7718_v49  ;;  %v7691_v54 = vrot.slane %v15664_v14, 5  ;;  %v7688_v2 = vrot.slane %v7686_v24, 5  ;;  %v15668_v9 = vld [vmem:[#allocation6_spill] sm:$0xff]  ;;  %v15669_v14 = vld [vmem:[#allocation9_spill] sm:$0xff]  ;;  %v15475_v24 = vshll.u32 %v14275_v1, 16 }
 0x4f3   : > { %15663 = vst [vmem:[#allocation23_spill] sm:$0xff] %v14341_v6  ;;  %v14350_v51 = vor.u32 %v7691_v54, %v7690_v18  ;;  %v15670_v18 = vld [vmem:[#allocation11_spill] sm:$0xff] }
 0x4f4   : > { %9778 = vmatpush3.bf16.xpose.msra.mxu1 %v6576_v62  ;;  %v7683_v62 = vshrl.u32 %v14317_v26, 16 }
 0x4f5   : > { %11046 = vmatprep.subr.msk.bf16.mxu1 %vm532_vm1, %v13909_v29  ;;  %v14338_v29 = vsel %vm5964_vm10, %v7503_v33, %v7505_v16  ;;  %15665 = vst [vmem:[#allocation24_spill] sm:$0xff] %v14350_v51  ;;  %v15666_v16 = vld [vmem:[#allocation7_spill] sm:$0xff] }
 0x4f6   : > { %15662 = vst [vmem:[#allocation22_spill] sm:$0xff] %v14338_v29  ;;  %v7685_v39 = vrot.slane %v7683_v62, 4  ;;  %v6582_v62 = vsel %vm532_vm1, %v15668_v9, 0 }
 0x4f8   : > { %v7689_v33 = vor.u32 %v7688_v2, %v7685_v39  ;;  %v15476_v39 = vshrl.u32 %v14277_v27, 16  ;;  %v15477_v2 = vshll.u32 %v14277_v27, 16 }
 0x4fa   : > { %v14356_v49 = vsel %vm7681_vm11, %v7689_v33, %v14350_v51  ;;  %v7758_v35 = vrot.slane %v15476_v39, 4  ;;  %v7759_v54 = vrot.slane %v15477_v2, 5  ;;  %v15479_v51 = vshll.u32 %v14287_v58, 16 }
 0x4fb   : > { %15667 = vst [vmem:[#allocation7_spill] sm:$0xff] %v14356_v49  ;;  %v15673_v2 = vshll.u32 %v14279_v7, 16  ;;  %v15675_v33 = vshll.u32 %v14281_v3, 16 }
 0x4fc   : > { %9780 = vmatpush3.bf16.xpose.msra.mxu1 %v6579_v19  ;;  %v6585_v19 = vsel %vm532_vm1, %v15670_v18, 0  ;;  %v15674_v18 = vshrl.u32 %v14281_v3, 16 }
 0x4fd   : > { %11047 = vmatprep.subr.msk.bf16.mxu1 %vm532_vm1, %v15666_v16  ;;  %v15671_v16 = vshrl.u32 %v14279_v7, 16  ;;  %v7763_v6 = vrot.slane %v15673_v2, 5  ;;  %v7767_v31 = vrot.slane %v15675_v33, 5  ;;  %v7775_v33 = vrot.slane %v15479_v51, 5 }
 0x4fe   : > { %v7766_v29 = vrot.slane %v15674_v18, 4  ;;  %v15679_v18 = vshrl.u32 %v14287_v58, 16 }
 0x4ff   : > { %v7762_v9 = vrot.slane %v15671_v16, 4 }
 0x500   : > { %v7768_v2 = vor.u32 %v7767_v31, %v7766_v29 }
 0x504   : > { %9782 = vmatpush3.bf16.xpose.msra.mxu1 %v6582_v62  ;;  %v7754_v62 = vrot.slane %v15474_v45, 4  ;;  %v7774_v45 = vrot.slane %v15679_v18, 4 }
 0x505   : > { %11048 = vmatprep.subr.msk.bf16.mxu1 %vm532_vm1, %v15669_v14  ;;  %v7755_v14 = vrot.slane %v15475_v24, 5  ;;  %v7760_v24 = vor.u32 %v7759_v54, %v7758_v35  ;;  %v15677_v35 = vshrl.u32 %v14285_v20, 16 }
 0x506   : > { %v7776_v29 = vor.u32 %v7775_v33, %v7774_v45  ;;  %v15692_v33 = vshrl.u32 %v13981_v8, 16 }
 0x507   : > { %v14387_v49 = vor.u32 %v7755_v14, %v7754_v62  ;;  %v7770_v54 = vrot.slane %v15677_v35, 4  ;;  %v7764_v14 = vor.u32 %v7763_v6, %v7762_v9  ;;  %v15685_v9 = vshrl.u32 %v13958_v0, 16 }
 0x509   : > { %15672 = vst [vmem:[#allocation6_spill] sm:$0xff] %v14387_v49  ;;  %v14399_v16 = vsel %vm7681_vm11, %v14387_v49, %v7760_v24  ;;  %v14415_v35 = vsel %vm7681_vm11, %v7764_v14, %v7768_v2 }
 0x50a   : > { %15676 = vst [vmem:[#allocation9_spill] sm:$0xff] %v14399_v16  ;;  %v14412_v16 = vsel %vm7681_vm11, %v7760_v24, %v7764_v14  ;;  %15682 = vst [vmem:[#allocation25_spill] sm:$0xff] %v14415_v35  ;;  %v15688_v24 = vld [vmem:[#allocation10_spill] sm:$0xff] }
 0x50b   : > { %15681 = vst [vmem:[#allocation11_spill] sm:$0xff] %v14412_v16  ;;  %v6612_v14 = vsel %vm532_vm1, %v15688_v24, 0 }
 0x50c   : > { %9784 = vmatpush3.bf16.xpose.msra.mxu1 %v6585_v19  ;;  %v15678_v19 = vshll.u32 %v14285_v20, 16 }
 0x50d   : > { %10455 = vmatprep.subr.bf16.mxu1 %v15579_v15 }
 0x50e   : > { %v7771_v62 = vrot.slane %v15678_v19, 5  ;;  %v15683_v19 = vshll.u32 %v14299_v37, 16 }
 0x510   : > { %v7772_v39 = vor.u32 %v7771_v62, %v7770_v54  ;;  %v7779_v6 = vrot.slane %v15683_v19, 5  ;;  %v6500_v54 = vrot.slane %v15685_v9, 2  ;;  %v15686_v62 = vshll.u32 %v13958_v0, 16 }
 0x512   : > { %v14420_v31 = vsel %vm7681_vm11, %v7768_v2, %v7772_v39  ;;  %v6503_v18 = vrot.slane %v15686_v62, 3  ;;  %v14426_v4 = vor.u32 %v7779_v6, %v7778_v30  ;;  %v14433_v19 = vsel %vm7681_vm11, %v7772_v39, %v7776_v29  ;;  %v15691_v30 = vld [vmem:[#allocation8_spill] sm:$0xff] }
 0x513   : > { %15684 = vst [vmem:[#allocation26_spill] sm:$0xff] %v14420_v31  ;;  %9786 = vmatmul.mubr.msk.bf16.vlgmr.msra.gmra.mrb[16].mxu1 %vm532_vm1, %v14248_v12  ;;  %15689 = vst [vmem:[#allocation10_spill] sm:$0xff] %v14433_v19  ;;  %v6509_v6 = vrot.slane %v15692_v33, 2  ;;  %v15693_v39 = vshll.u32 %v13981_v8, 16 }
 0x514   : > { %15687 = vst [vmem:[#allocation27_spill] sm:$0xff] %v14426_v4  ;;  %10456 = vmatpush3.bf16.xpose.msra.mxu1 %v6612_v14  ;;  %10471 = vmatprep.mubr.msk.bf16.mxu1 %vm11434_vm9, %v15579_v15  ;;  %v14439_v45 = vsel %vm7681_vm11, %v7776_v29, %v14426_v4  ;;  %v6504_v0 = vor.u32 %v6503_v18, %v6500_v54  ;;  %v15694_v14 = vshrl.u32 %v13984_v5, 16  ;;  %v15695_v18 = vshll.u32 %v13984_v5, 16 }
 0x515   : > { %15690 = vst [vmem:[#allocation28_spill] sm:$0xff] %v14439_v45  ;;  %10457 = vmatprep.subr.bf16.mxu1 %v15579_v15  ;;  %v6512_v9 = vrot.slane %v15693_v39, 3  ;;  %v15697_v39 = vshll.u32 %v14092_v17, 16 }
 0x516   : > { %v6505_v2 = vsel %vm833_vm2, %v15691_v30, %v6504_v0  ;;  %v6518_v54 = vrot.slane %v15694_v14, 2  ;;  %v6521_v30 = vrot.slane %v15695_v18, 3  ;;  %v15699_v14 = vshrl.u32 %v14138_v22, 16 }
 0x517   : > { %v6615_v62 = vsel %vm532_vm1, %v6505_v2, 0  ;;  %v6513_v24 = vor.u32 %v6512_v9, %v6509_v6  ;;  %v15696_v2 = vshrl.u32 %v14092_v17, 16  ;;  %v14462_v9 = vld [vmem:[#allocation2 + $0x48] sm:$0xff]  ;;  %v15700_v17 = vshll.u32 %v14138_v22, 16 }
 0x518   : > { %v6522_v33 = vor.u32 %v6521_v30, %v6518_v54  ;;  %15698 = vst [vmem:[#allocation8_spill] sm:$0xff] %v14462_v9  ;;  %v6536_v54 = vrot.slane %v15699_v14, 2  ;;  %v6548_v22 = vrot.slane %v13537_v48, 3 }
 0x519   : > { %v6514_v29 = vsel %vm833_vm2, %v6504_v0, %v6513_v24  ;;  %v6527_v6 = vrot.slane %v15696_v2, 2  ;;  %v6530_v0 = vrot.slane %v15697_v39, 3  ;;  %v6539_v18 = vrot.slane %v15700_v17, 3 }
 0x51a   : > { %v6618_v51 = vsel %vm532_vm1, %v6514_v29, 0  ;;  %v6523_v8 = vsel %vm833_vm2, %v6513_v24, %v6522_v33  ;;  %v15480_v29 = vshll.u32 %v14462_v9, 16  ;;  %v6552_v17 = vshrl.u32 %v14228_v41, 16 }
 0x51b   : > { %v6531_v5 = vor.u32 %v6530_v0, %v6527_v6  ;;  %v6540_v6 = vor.u32 %v6539_v18, %v6536_v54  ;;  %v6545_v0 = vrot.slane %v13534_v34, 2 }
 0x51c   : > { %10458 = vmatpush3.bf16.xpose.msra.mxu1 %v6615_v62  ;;  %v6621_v62 = vsel %vm532_vm1, %v6523_v8, 0  ;;  %v8670_v8 = vrot.slane %v15480_v29, 6  ;;  %v6554_v18 = vrot.slane %v6552_v17, 2 }
 0x51d   : > { %10459 = vmatprep.subr.bf16.mxu1 %v15579_v15  ;;  %v6532_v24 = vsel %vm833_vm2, %v6522_v33, %v6531_v5  ;;  %v6541_v33 = vsel %vm833_vm2, %v6531_v5, %v6540_v6  ;;  %v6549_v14 = vor.u32 %v6548_v22, %v6545_v0 }
 0x51e   : > { %v6624_v2 = vsel %vm532_vm1, %v6532_v24, 0  ;;  %v6555_v24 = vshll.u32 %v14228_v41, 16 }
 0x51f   : > { %v6550_v54 = vsel %vm833_vm2, %v6540_v6, %v6549_v14  ;;  %v15702_v6 = vld [vmem:[#allocation12_spill] sm:$0xff] }
 0x520   : > { %v6630_v5 = vsel %vm532_vm1, %v6550_v54, 0  ;;  %v6847_v54 = vsel %vm532_vm1, %v14088_v60, 0  ;;  %v6862_v60 = vsel %vm532_vm1, %v14163_v42, 0  ;;  %v6898_v42 = vsel %vm532_vm1, %v14206_v53, 0 }
 0x524   : > { %10460 = vmatpush3.bf16.xpose.msra.mxu1 %v6618_v51  ;;  %v15481_v51 = vshrl.u32 %v14462_v9, 16 }
 0x525   : > { %10461 = vmatprep.subr.bf16.mxu1 %v15579_v15 }
 0x526   : > { %v8669_v30 = vrot.slane %v15481_v51, 5 }
 0x528   : > { %v14478_v39 = vor.u32 %v8670_v8, %v8669_v30  ;;  %v6557_v30 = vrot.slane %v6555_v24, 3  ;;  %v11364_v8 = vld [vmem:[#allocation2] sm:$0xf8]  ;;  %v14500_v24 = vld [vmem:[%s15365_s3 + $0x10] sm:$0xff]  }
 0x529   : > { %v6729_v48 = vshrl.u32 %v11364_v8, 16 }
 0x52a   : > { %15701 = vst [vmem:[#allocation29_spill] sm:$0xff] %v14478_v39  ;;  %v6558_v34 = vor.u32 %v6557_v30, %v6554_v18  ;;  %v6904_v30 = vsel %vm532_vm1, %v14215_v28, 0  ;;  %v15704_v28 = vshrl.u32 %v14283_v23, 16 }
 0x52b   : > { %v6731_v0 = vrot.slane %v6729_v48, 3  ;;  %v7002_v48 = vld [vmem:[#allocation2 + $0x8] sm:$0xf8] }
 0x52c   : > { %10462 = vmatpush3.bf16.xpose.msra.mxu1 %v6621_v62  ;;  %v6627_v62 = vsel %vm532_vm1, %v6541_v33, 0  ;;  %v6559_v33 = vsel %vm833_vm2, %v6549_v14, %v6558_v34 }
 0x52d   : > { %10463 = vmatprep.subr.bf16.mxu1 %v15579_v15  ;;  %v6633_v41 = vsel %vm532_vm1, %v6559_v33, 0 }
 0x534   : > { %10464 = vmatpush3.bf16.xpose.msra.mxu1 %v6624_v2  ;;  %v6732_v2 = vshll.u32 %v11364_v8, 16 }
 0x535   : > { %10465 = vmatprep.subr.bf16.mxu1 %v15579_v15 }
 0x536   : > { %v6734_v22 = vrot.slane %v6732_v2, 4  ;;  %v6907_v2 = vsel %vm532_vm1, %v14220_v55, 0 }
 0x53c   : > { %10466 = vmatpush3.bf16.xpose.msra.mxu1 %v6627_v62  ;;  %v6735_v62 = vor.u32 %v6734_v22, %v6731_v0  ;;  %v7109_v0 = vrot.slane %v15704_v28, 3  ;;  %v15705_v22 = vshll.u32 %v14283_v23, 16 }
 0x53d   : > { %10467 = vmatprep.subr.bf16.mxu1 %v15579_v15 }
 0x53e   : > { %v6739_v17 = vsel %vm1368_vm3, %v6735_v62, %v14042_v57  ;;  %v6844_v57 = vsel %vm532_vm1, %v14077_v32, 0  ;;  %v6856_v32 = vsel %vm532_vm1, %v14142_v11, 0 }
 0x53f   : > { %v6841_v14 = vsel %vm532_vm1, %v6739_v17, 0  ;;  %v7036_v17 = vshrl.u32 %v7002_v48, 16 }
 0x544   : > { %10468 = vmatpush3.bf16.xpose.msra.mxu1 %v6630_v5  ;;  %v14561_v5 = vld [vmem:[#allocation2 + $0x50] sm:$0xff] }
 0x545   : > { %10469 = vmatprep.subr.bf16.mxu1 %v15579_v15  ;;  %v14565_v8 = vshrl.u32 %v14561_v5, 16 }
 0x547   : > { %v7118_v62 = vrot.slane %v14565_v8, 3 }
 0x54c   : > { %10470 = vmatpush3.bf16.xpose.msra.mxu1 %v6633_v41  ;;  %v7112_v41 = vrot.slane %v15705_v22, 4  ;;  %v14620_v22 = vld [vmem:[#allocation2 + $0x20] sm:$0xff] }
 0x54d   : > { %11049 = vmatprep.subr.msk.bf16.mxu1 %vm532_vm1, %v15702_v6 }
 0x553   : > { %10472 = vmatmul.mubr.msk.bf16.vlgmr.msra.gmra.mrb[24].mxu1 %vm532_vm1, %v14248_v12  ;;  %v6850_v12 = vsel %vm532_vm1, %v14109_v25, 0  ;;  %v15703_v25 = vld [vmem:[#allocation15_spill] sm:$0xff] }
 0x554   : > { %9797 = vmatpush3.bf16.xpose.msra.mxu1 %v6841_v14  ;;  %9812 = vmatprep.mubr.msk.bf16.mxu1 %vm532_vm1, %v14500_v24  ;;  %v7039_v14 = vshll.u32 %v7002_v48, 16 }
 0x555   : > { %11050 = vmatprep.subr.msk.bf16.mxu1 %vm532_vm1, %v14070_v10  ;;  %v6853_v10 = vsel %vm532_vm1, %v14128_v52, 0 }
 0x55c   : > { %9799 = vmatpush3.bf16.xpose.msra.mxu1 %v6844_v57  ;;  %v14579_v57 = vld [vmem:[#allocation2 + $0x58] sm:$0xff] }
 0x55d   : > { %11051 = vmatprep.subr.msk.bf16.mxu1 %vm532_vm1, %v14085_v40  ;;  %v6859_v40 = vsel %vm532_vm1, %v14159_v56, 0 }
 0x564   : > { %9801 = vmatpush3.bf16.xpose.msra.mxu1 %v6847_v54  ;;  %v14583_v54 = vor.u32 %v7112_v41, %v7109_v0  ;;  %v14625_v41 = vld [vmem:[%s15365_s3 + $0x18] sm:$0xff]  }
 0x565   : > { %11052 = vmatprep.subr.msk.bf16.mxu1 %vm532_vm1, %v14096_v36  ;;  %v6889_v36 = vsel %vm532_vm1, %v14173_v44, 0  ;;  %v6719_v44 = vld [vmem:[#allocation2 + $0xc0] sm:$0xf] }
 0x566   : > { %v6832_v18 = vshll.u32 %v6719_v44, 16 }
 0x568   : > { %v6834_v34 = vrot.slane %v6832_v18, 4 }
 0x56c   : > { %9803 = vmatpush3.bf16.xpose.msra.mxu1 %v6850_v12 }
 0x56d   : > { %11053 = vmatprep.subr.msk.bf16.mxu1 %vm532_vm1, %v14120_v21  ;;  %v6895_v21 = vsel %vm532_vm1, %v14203_v63, 0  ;;  %v6829_v63 = vshrl.u32 %v6719_v44, 16 }
 0x56f   : > { %v6831_v53 = vrot.slane %v6829_v63, 3 }
 0x571   : > { %v6835_v33 = vor.u32 %v6834_v34, %v6831_v53  ;;  %v14608_v53 = vld [vmem:[#allocation2 + $0x60] sm:$0xff] }
 0x572   : > { %v14613_v48 = vshrl.u32 %v14608_v53, 16  ;;  %v14618_v0 = vshll.u32 %v14608_v53, 16 }
 0x573   : > { %v6836_v55 = vsel %vm1368_vm3, %v14212_v13, %v6835_v33 }
 0x574   : > { %9805 = vmatpush3.bf16.xpose.msra.mxu1 %v6853_v10  ;;  %v7038_v10 = vrot.slane %v7036_v17, 3  ;;  %v6910_v13 = vsel %vm532_vm1, %v6836_v55, 0  ;;  %v14634_v17 = vshll.u32 %v14620_v22, 16 }
 0x575   : > { %11054 = vmatprep.subr.msk.bf16.mxu1 %vm532_vm1, %v14131_v61 }
 0x57c   : > { %9807 = vmatpush3.bf16.xpose.msra.mxu1 %v6856_v32  ;;  %v7041_v32 = vrot.slane %v7039_v14, 4 }
 0x57d   : > { %11055 = vmatprep.subr.msk.bf16.mxu1 %vm532_vm1, %v14152_v59  ;;  %v6892_v59 = vsel %vm532_vm1, %v15703_v25, 0 }
 0x584   : > { %9809 = vmatpush3.bf16.xpose.msra.mxu1 %v6859_v40  ;;  %v15706_v40 = vshrl.u32 %v14289_v43, 16 }
 0x585   : > { %11056 = vmatprep.subr.msk.bf16.mxu1 %vm532_vm1, %v14169_v47  ;;  %v6901_v47 = vsel %vm532_vm1, %v14209_v46, 0  ;;  %v14568_v46 = vshll.u32 %v14561_v5, 16 }
 0x587   : > { %v7121_v6 = vrot.slane %v14568_v46, 4 }
 0x589   : > { %v7122_v12 = vor.u32 %v7121_v6, %v7118_v62  ;;  %v14631_v6 = vshrl.u32 %v14620_v22, 16 }
 0x58c   : > { %9811 = vmatpush3.bf16.xpose.msra.mxu1 %v6862_v60  ;;  %v7046_v60 = vrot.slane %v15706_v40, 3  ;;  %v14639_v40 = vld [vmem:[#allocation2 + $0x68] sm:$0xff] }
 0x58d   : > { %10475 = vmatprep.subr.bf16.mxu1 %v15579_v15 }
 0x593   : > { %9813 = vmatmul.mubr.msk.bf16.vlgmr.msra.gmra.mrb[16].mxu1 %vm532_vm1, %v14500_v24 }
 0x594   : > { %10476 = vmatpush3.bf16.xpose.msra.mxu1 %v6889_v36  ;;  %10491 = vmatprep.mubr.msk.bf16.mxu1 %vm11434_vm9, %v15579_v15  ;;  %v15707_v36 = vshll.u32 %v14289_v43, 16 }
 0x595   : > { %10477 = vmatprep.subr.bf16.mxu1 %v15579_v15 }
 0x596   : > { %v7049_v25 = vrot.slane %v15707_v36, 4 }
 0x598   : > { %v7050_v44 = vor.u32 %v7049_v25, %v7046_v60  ;;  %v14646_v60 = vshrl.u32 %v14639_v40, 16  ;;  %v7067_v25 = vrot.slane %v14634_v17, 4 }
 0x59c   : > { %10478 = vmatpush3.bf16.xpose.msra.mxu1 %v6892_v59  ;;  %v14590_v59 = vshrl.u32 %v14579_v57, 16 }
 0x59d   : > { %10479 = vmatprep.subr.bf16.mxu1 %v15579_v15 }
 0x59e   : > { %v7127_v63 = vrot.slane %v14590_v59, 3 }
 0x5a4   : > { %10480 = vmatpush3.bf16.xpose.msra.mxu1 %v6895_v21  ;;  %v14593_v21 = vshll.u32 %v14579_v57, 16 }
 0x5a5   : > { %10481 = vmatprep.subr.bf16.mxu1 %v15579_v15 }
 0x5a6   : > { %v14549_v52 = vpop.f32.mrb[20].mxu1  ;;  %v7130_v18 = vrot.slane %v14593_v21, 4 }
 0x5a7   : > { %v10453_v61 = vpop.f32.mrb[21].mxu1 }
 0x5a8   : > { %v14551_v11 = vpop.f32.mrb[22].mxu1  ;;  %v14595_v61 = vld [vmem:[#allocation2 + $0x18] sm:$0xff]  ;;  %v7131_v33 = vor.u32 %v7130_v18, %v7127_v63  ;;  %v7145_v63 = vrot.slane %v14646_v60, 3 }
 0x5a9   : > { %v10454_v56 = vpop.f32.mrb[23].mxu1 }
 0x5aa   : > { %v7123_v56 = vsel %vm1368_vm3, %v14583_v54, %v7122_v12  ;;  %v7132_v14 = vsel %vm1368_vm3, %v7122_v12, %v7131_v33 }
 0x5ac   : > { %10482 = vmatpush3.bf16.xpose.msra.mxu1 %v6898_v42  ;;  %v7042_v42 = vor.u32 %v7041_v32, %v7038_v10  ;;  %v7136_v10 = vrot.slane %v14613_v48, 3  ;;  %v7139_v32 = vrot.slane %v14618_v0, 4 }
 0x5ad   : > { %10483 = vmatprep.subr.bf16.mxu1 %v15579_v15 }
 0x5ae   : > { %v7140_v12 = vor.u32 %v7139_v32, %v7136_v10 }
 0x5b4   : > { %10484 = vmatpush3.bf16.xpose.msra.mxu1 %v6901_v47  ;;  %v14601_v47 = vshrl.u32 %v14595_v61, 16 }
 0x5b5   : > { %10485 = vmatprep.subr.bf16.mxu1 %v15579_v15 }
 0x5b6   : > { %v7055_v34 = vrot.slane %v14601_v47, 3 }
 0x5bc   : > { %10486 = vmatpush3.bf16.xpose.msra.mxu1 %v6904_v30  ;;  %v14606_v30 = vshll.u32 %v14595_v61, 16 }
 0x5bd   : > { %10487 = vmatprep.subr.bf16.mxu1 %v15579_v15 }
 0x5be   : > { %v7058_v28 = vrot.slane %v14606_v30, 4 }
 0x5c0   : > { %v7059_v55 = vor.u32 %v7058_v28, %v7055_v34  ;;  %v7141_v34 = vsel %vm1368_vm3, %v7131_v33, %v7140_v12 }
 0x5c2   : > { %v7060_v36 = vsel %vm1368_vm3, %v7050_v44, %v7059_v55 }
 0x5c4   : > { %10488 = vmatpush3.bf16.xpose.msra.mxu1 %v6907_v2  ;;  %v7051_v2 = vsel %vm1368_vm3, %v7042_v42, %v7050_v44  ;;  %v7266_v42 = vsel %vm532_vm1, %v7060_v36, 0 }
 0x5c5   : > { %10489 = vmatprep.subr.bf16.mxu1 %v15579_v15  ;;  %v7263_v62 = vsel %vm532_vm1, %v7051_v2, 0 }
 0x5cc   : > { %10490 = vmatpush3.bf16.xpose.msra.mxu1 %v6910_v13  ;;  %v14651_v13 = vshll.u32 %v14639_v40, 16 }
 0x5cd   : > { %11057 = vmatprep.subr.msk.bf16.mxu1 %vm532_vm1, %v7123_v56  ;;  %v14653_v56 = vld [vmem:[#allocation2 + $0x28] sm:$0xff] }
 0x5ce   : > { %v14658_v18 = vshrl.u32 %v14653_v56, 16  ;;  %v7148_v44 = vrot.slane %v14651_v13, 4  ;;  %v14663_v28 = vshll.u32 %v14653_v56, 16 }
 0x5d0   : > { %15708 = vst [vmem:[#allocation12_spill] sm:$0xff] %v14663_v28  ;;  %v7149_v36 = vor.u32 %v7148_v44, %v7145_v63  ;;  %v7076_v33 = vrot.slane %v14663_v28, 4  ;;  %v14689_v44 = vld [vmem:[#allocation2 + $0x78] sm:$0xff] }
 0x5d1   : > { %v14694_v9 = vshrl.u32 %v14689_v44, 16 }
 0x5d2   : > { %v7150_v51 = vsel %vm1368_vm3, %v7140_v12, %v7149_v36 }
 0x5d3   : > { %10492 = vmatmul.mubr.msk.bf16.vlgmr.msra.gmra.mrb[28].mxu1 %vm532_vm1, %v14500_v24  ;;  %v7064_v24 = vrot.slane %v14631_v6, 3  ;;  %15713 = vst [vmem:[#allocation33_spill] sm:$0xff] %v14694_v9  ;;  %v7163_v19 = vrot.slane %v14694_v9, 3 }
 0x5d4   : > { %9824 = vmatpush3.bf16.xpose.msra.mxu1 %v7263_v62  ;;  %9839 = vmatprep.mubr.msk.bf16.mxu1 %vm532_vm1, %v14625_v41  ;;  %v14665_v62 = vld [vmem:[#allocation2 + $0x70] sm:$0xff] }
 0x5d5   : > { %11058 = vmatprep.subr.msk.bf16.mxu1 %vm532_vm1, %v7132_v14  ;;  %v7068_v2 = vor.u32 %v7067_v25, %v7064_v24  ;;  %v7073_v14 = vrot.slane %v14658_v18, 3  ;;  %v14670_v10 = vshrl.u32 %v14665_v62, 16  ;;  %v14675_v24 = vshll.u32 %v14665_v62, 16  ;;  %v14677_v25 = vld [vmem:[#allocation2 + $0x30] sm:$0xff] }
 0x5d6   : > { %v14687_v63 = vshll.u32 %v14677_v25, 16 }
 0x5d7   : > { %15709 = vst [vmem:[#allocation15_spill] sm:$0xff] %v14670_v10  ;;  %v7069_v32 = vsel %vm1368_vm3, %v7059_v55, %v7068_v2  ;;  %15710 = vst [vmem:[#allocation30_spill] sm:$0xff] %v14675_v24  ;;  %v7154_v29 = vrot.slane %v14670_v10, 3  ;;  %v7077_v39 = vor.u32 %v7076_v33, %v7073_v14  ;;  %v7157_v55 = vrot.slane %v14675_v24, 4  ;;  %v14701_v33 = vld [vmem:[#allocation2 + $0x38] sm:$0xff] }
 0x5d8   : > { %15712 = vst [vmem:[#allocation32_spill] sm:$0xff] %v14687_v63  ;;  %v7085_v12 = vrot.slane %v14687_v63, 4  ;;  %v14699_v14 = vshll.u32 %v14689_v44, 16 }
 0x5d9   : > { %v7078_v4 = vsel %vm1368_vm3, %v7068_v2, %v7077_v39  ;;  %v14711_v2 = vshll.u32 %v14701_v33, 16 }
 0x5da   : > { %15714 = vst [vmem:[#allocation34_spill] sm:$0xff] %v14699_v14  ;;  %v7272_v45 = vsel %vm532_vm1, %v7078_v4, 0 }
 0x5db   : > { %15716 = vst [vmem:[#allocation36_spill] sm:$0xff] %v14711_v2 }
 0x5dc   : > { %9826 = vmatpush3.bf16.xpose.msra.mxu1 %v7266_v42  ;;  %v7269_v42 = vsel %vm532_vm1, %v7069_v32, 0 }
 0x5dd   : > { %11059 = vmatprep.subr.msk.bf16.mxu1 %vm532_vm1, %v7141_v34  ;;  %v14682_v34 = vshrl.u32 %v14677_v25, 16 }
 0x5df   : > { %15711 = vst [vmem:[#allocation31_spill] sm:$0xff] %v14682_v34  ;;  %v7082_v32 = vrot.slane %v14682_v34, 3 }
 0x5e1   : > { %v7086_v35 = vor.u32 %v7085_v12, %v7082_v32  ;;  %v14725_v12 = vld [vmem:[#allocation2 + $0x40] sm:$0xff] }
 0x5e3   : > { %v7087_v49 = vsel %vm1368_vm3, %v7077_v39, %v7086_v35  ;;  %v14735_v39 = vshll.u32 %v14725_v12, 16 }
 0x5e4   : > { %9828 = vmatpush3.bf16.xpose.msra.mxu1 %v7269_v42  ;;  %v7158_v42 = vor.u32 %v7157_v55, %v7154_v29  ;;  %v7166_v29 = vrot.slane %v14699_v14, 4  ;;  %v14713_v55 = vld [vmem:[#allocation2 + $0x80] sm:$0xff]  ;;  %v7275_v14 = vsel %vm532_vm1, %v7087_v49, 0 }
 0x5e5   : > { %11060 = vmatprep.subr.msk.bf16.mxu1 %vm532_vm1, %v7150_v51  ;;  %v14706_v51 = vshrl.u32 %v14701_v33, 16  ;;  %v14718_v16 = vshrl.u32 %v14713_v55, 16  ;;  %v14723_v32 = vshll.u32 %v14713_v55, 16  ;;  %15720 = vst [vmem:[#allocation40_spill] sm:$0xff] %v14735_v39 }
 0x5e6   : > { %v7159_v31 = vsel %vm1368_vm3, %v7149_v36, %v7158_v42  ;;  %v7094_v36 = vrot.slane %v14711_v2, 4 }
 0x5e7   : > { %15715 = vst [vmem:[#allocation35_spill] sm:$0xff] %v14706_v51  ;;  %v7091_v4 = vrot.slane %v14706_v51, 3  ;;  %15717 = vst [vmem:[#allocation37_spill] sm:$0xff] %v14718_v16  ;;  %v7172_v9 = vrot.slane %v14718_v16, 3 }
 0x5e8   : > { %15718 = vst [vmem:[#allocation38_spill] sm:$0xff] %v14723_v32 }
 0x5e9   : > { %v7095_v63 = vor.u32 %v7094_v36, %v7091_v4 }
 0x5eb   : > { %v7096_v2 = vsel %vm1368_vm3, %v7086_v35, %v7095_v63 }
 0x5ec   : > { %9830 = vmatpush3.bf16.xpose.msra.mxu1 %v7272_v45  ;;  %v7167_v45 = vor.u32 %v7166_v29, %v7163_v19  ;;  %v7175_v19 = vrot.slane %v14723_v32, 4  ;;  %v14737_v29 = vld [vmem:[#allocation2 + $0x88] sm:$0xff]  ;;  %v7278_v36 = vsel %vm532_vm1, %v7096_v2, 0 }
 0x5ed   : > { %11061 = vmatprep.subr.msk.bf16.mxu1 %vm532_vm1, %v7159_v31  ;;  %v14730_v31 = vshrl.u32 %v14725_v12, 16  ;;  %v14742_v16 = vshrl.u32 %v14737_v29, 16  ;;  %v14747_v4 = vshll.u32 %v14737_v29, 16 }
 0x5ee   : > { %v7168_v51 = vsel %vm1368_vm3, %v7158_v42, %v7167_v45  ;;  %v7103_v42 = vrot.slane %v14735_v39, 4 }
 0x5ef   : > { %15719 = vst [vmem:[#allocation39_spill] sm:$0xff] %v14730_v31  ;;  %v7100_v49 = vrot.slane %v14730_v31, 3  ;;  %15721 = vst [vmem:[#allocation41_spill] sm:$0xff] %v14742_v16  ;;  %v7184_v31 = vrot.slane %v14747_v4, 4 }
 0x5f0   : > { %15722 = vst [vmem:[#allocation42_spill] sm:$0xff] %v14747_v4 }
 0x5f1   : > { %v7104_v34 = vor.u32 %v7103_v42, %v7100_v49  ;;  %v15724_v42 = vshll.u32 %v14275_v1, 16 }
 0x5f3   : > { %v7105_v35 = vsel %vm1368_vm3, %v7095_v63, %v7104_v34  ;;  %v7114_v2 = vsel %vm1368_vm3, %v7104_v34, %v14583_v54 }
 0x5f4   : > { %9832 = vmatpush3.bf16.xpose.msra.mxu1 %v7275_v14  ;;  %v7176_v14 = vor.u32 %v7175_v19, %v7172_v9  ;;  %v7281_v19 = vsel %vm532_vm1, %v7105_v35, 0 }
 0x5f5   : > { %11062 = vmatprep.subr.msk.bf16.mxu1 %vm532_vm1, %v7168_v51  ;;  %v7181_v51 = vrot.slane %v14742_v16, 3 }
 0x5f6   : > { %v7177_v32 = vsel %vm1368_vm3, %v7167_v45, %v7176_v14  ;;  %v15723_v45 = vshrl.u32 %v14275_v1, 16 }
 0x5f7   : > { %v7185_v9 = vor.u32 %v7184_v31, %v7181_v51  ;;  %v15726_v51 = vshll.u32 %v14277_v27, 16 }
 0x5f8   : > { %v7190_v49 = vrot.slane %v15723_v45, 3 }
 0x5f9   : > { %v7186_v39 = vsel %vm1368_vm3, %v7176_v14, %v7185_v9  ;;  %v15725_v14 = vshrl.u32 %v14277_v27, 16  ;;  %v7202_v54 = vrot.slane %v15726_v51, 4  ;;  %v15728_v27 = vshll.u32 %v14279_v7, 16 }
 0x5fb   : > { %v7211_v45 = vrot.slane %v15728_v27, 4 }
 0x5fc   : > { %9834 = vmatpush3.bf16.xpose.msra.mxu1 %v7278_v36  ;;  %v7193_v36 = vrot.slane %v15724_v42, 4 }
 0x5fd   : > { %11063 = vmatprep.subr.msk.bf16.mxu1 %vm532_vm1, %v7177_v32  ;;  %v7284_v32 = vsel %vm532_vm1, %v7114_v2, 0 }
 0x5fe   : > { %v7194_v63 = vor.u32 %v7193_v36, %v7190_v49 }
 0x600   : > { %v7195_v31 = vsel %vm1368_vm3, %v7185_v9, %v7194_v63 }
 0x601   : > { %v7311_v34 = vsel %vm532_vm1, %v7195_v31, 0 }
 0x604   : > { %9836 = vmatpush3.bf16.xpose.msra.mxu1 %v7281_v19  ;;  %v15727_v19 = vshrl.u32 %v14279_v7, 16 }
 0x605   : > { %11064 = vmatprep.subr.msk.bf16.mxu1 %vm532_vm1, %v7186_v39  ;;  %v7199_v39 = vrot.slane %v15725_v14, 3  ;;  %v15730_v14 = vshll.u32 %v14281_v3, 16 }
 0x606   : > { %v7208_v2 = vrot.slane %v15727_v19, 3  ;;  %v15731_v19 = vshrl.u32 %v14285_v20, 16 }
 0x607   : > { %v7203_v35 = vor.u32 %v7202_v54, %v7199_v39 }
 0x608   : > { %v7212_v42 = vor.u32 %v7211_v45, %v7208_v2  ;;  %v7226_v2 = vrot.slane %v15731_v19, 3 }
 0x609   : > { %v7204_v9 = vsel %vm1368_vm3, %v7194_v63, %v7203_v35  ;;  %v7220_v63 = vrot.slane %v15730_v14, 4  ;;  %v15734_v14 = vshll.u32 %v14287_v58, 16 }
 0x60a   : > { %v7314_v49 = vsel %vm532_vm1, %v7204_v9, 0  ;;  %v7213_v36 = vsel %vm1368_vm3, %v7203_v35, %v7212_v42 }
 0x60b   : > { %v7317_v39 = vsel %vm532_vm1, %v7213_v36, 0 }
 0x60c   : > { %9838 = vmatpush3.bf16.xpose.msra.mxu1 %v7284_v32  ;;  %v15729_v32 = vshrl.u32 %v14281_v3, 16  ;;  %v15732_v3 = vshll.u32 %v14285_v20, 16 }
 0x60d   : > { %10495 = vmatprep.subr.bf16.mxu1 %v15579_v15 }
 0x60e   : > { %v7217_v31 = vrot.slane %v15729_v32, 3  ;;  %v7229_v27 = vrot.slane %v15732_v3, 4 }
 0x610   : > { %v7221_v51 = vor.u32 %v7220_v63, %v7217_v31  ;;  %v7230_v32 = vor.u32 %v7229_v27, %v7226_v2  ;;  %v7238_v63 = vrot.slane %v15734_v14, 4  ;;  %v7254_v2 = vshll.u32 %v14291_v38, 16 }
 0x611   : > { %v7458_v14 = vrot.slane %v14317_v26, 4 }
 0x612   : > { %v7222_v35 = vsel %vm1368_vm3, %v7212_v42, %v7221_v51  ;;  %v15733_v42 = vshrl.u32 %v14287_v58, 16  ;;  %v7251_v58 = vshrl.u32 %v14291_v38, 16 }
 0x613   : > { %9840 = vmatmul.mubr.msk.bf16.vlgmr.msra.gmra.mrb[16].mxu1 %vm532_vm1, %v14625_v41  ;;  %v7320_v36 = vsel %vm532_vm1, %v7222_v35, 0 }
 0x614   : > { %10496 = vmatpush3.bf16.xpose.msra.mxu1 %v7311_v34  ;;  %10511 = vmatprep.mubr.msk.bf16.mxu1 %vm11434_vm9, %v15579_v15  ;;  %v7235_v31 = vrot.slane %v15733_v42, 3  ;;  %v7253_v27 = vrot.slane %v7251_v58, 3  ;;  %v7475_v42 = vrot.slane %v14561_v5, 4 }
 0x615   : > { %10497 = vmatprep.subr.bf16.mxu1 %v15579_v15 }
 0x61c   : > { %10498 = vmatpush3.bf16.xpose.msra.mxu1 %v7314_v49 }
 0x61d   : > { %10499 = vmatprep.subr.bf16.mxu1 %v15579_v15 }
 0x624   : > { %10500 = vmatpush3.bf16.xpose.msra.mxu1 %v7317_v39 }
 0x625   : > { %10501 = vmatprep.subr.bf16.mxu1 %v15579_v15 }
 0x626   : > { %v6712_v7 = vpop.f32.mrb[24].mxu1 }
 0x627   : > { %v14792_v54 = vadd.f32 %v6712_v7, %v14549_v52  ;;  %v10473_v34 = vpop.f32.mrb[25].mxu1  ;;  %v7231_v52 = vsel %vm1368_vm3, %v7221_v51, %v7230_v32  ;;  %v15735_v7 = vshrl.u32 %v14299_v37, 16 }
 0x628   : > { %v6715_v9 = vpop.f32.mrb[26].mxu1  ;;  %v7323_v20 = vsel %vm532_vm1, %v7231_v52, 0  ;;  %v7473_v52 = vrot.slane %v14283_v23, 4  ;;  %v14836_v23 = vld [vmem:[%s15365_s3 + $0x20] sm:$0xff]  }
 0x629   : > { %v14800_v45 = vadd.f32 %v6715_v9, %v14551_v11  ;;  %v10474_v49 = vpop.f32.mrb[27].mxu1  ;;  %v7239_v11 = vor.u32 %v7238_v63, %v7235_v31  ;;  %v7244_v34 = vrot.slane %v15735_v7, 3  ;;  %v15736_v9 = vshll.u32 %v14299_v37, 16 }
 0x62a   : > { %v7256_v49 = vrot.slane %v7254_v2, 4  ;;  %v7476_v38 = vsel %vm5964_vm10, %v7473_v52, %v7475_v42  ;;  %v7459_v63 = vrot.slane %v14289_v43, 4  ;;  %v7461_v43 = vrot.slane %v14595_v61, 4 }
 0x62b   : > { %v7240_v39 = vsel %vm1368_vm3, %v7230_v32, %v7239_v11  ;;  %v7247_v51 = vrot.slane %v15736_v9, 4 }
 0x62c   : > { %10502 = vmatpush3.bf16.xpose.msra.mxu1 %v7320_v36  ;;  %v7326_v35 = vsel %vm532_vm1, %v7240_v39, 0  ;;  %v7257_v37 = vor.u32 %v7256_v49, %v7253_v27  ;;  %v7462_v7 = vsel %vm5964_vm10, %v7459_v63, %v7461_v43  ;;  %v7483_v49 = vrot.slane %v14665_v62, 4 }
 0x62d   : > { %10503 = vmatprep.subr.bf16.mxu1 %v15579_v15  ;;  %v7248_v19 = vor.u32 %v7247_v51, %v7244_v34  ;;  %v7479_v34 = vrot.slane %v14608_v53, 4  ;;  %v7514_v9 = vsel %vm532_vm1, %v7462_v7, 0  ;;  %v7463_v51 = vrot.slane %v14620_v22, 4 }
 0x62f   : > { %v7249_v3 = vsel %vm1368_vm3, %v7239_v11, %v7248_v19  ;;  %v7258_v32 = vsel %vm1368_vm3, %v7248_v19, %v7257_v37  ;;  %v7477_v11 = vrot.slane %v14579_v57, 4  ;;  %v7481_v19 = vrot.slane %v14639_v40, 4 }
 0x630   : > { %v7329_v36 = vsel %vm532_vm1, %v7249_v3, 0  ;;  %v7332_v31 = vsel %vm532_vm1, %v7258_v32, 0  ;;  %v7465_v3 = vrot.slane %v14653_v56, 4  ;;  %v7467_v32 = vrot.slane %v14677_v25, 4 }
 0x631   : > { %v7478_v26 = vsel %vm5964_vm10, %v7475_v42, %v7477_v11  ;;  %v7482_v2 = vsel %vm5964_vm10, %v7479_v34, %v7481_v19  ;;  %v7484_v37 = vsel %vm5964_vm10, %v7481_v19, %v7483_v49  ;;  %v15737_v19 = vrot.slane %v14275_v1, 4  ;;  %v15738_v1 = vld [vmem:[#allocation13_spill] sm:$0xff] }
 0x632   : > { %v7466_v27 = vsel %vm5964_vm10, %v7463_v51, %v7465_v3  ;;  %v7468_v42 = vsel %vm5964_vm10, %v7465_v3, %v7467_v32  ;;  %v7565_v3 = vsel %vm532_vm1, %v15738_v1, 0 }
 0x634   : > { %10504 = vmatpush3.bf16.xpose.msra.mxu1 %v7323_v20  ;;  %v7460_v20 = vsel %vm5964_vm10, %v7458_v14, %v7459_v63  ;;  %v7469_v63 = vrot.slane %v14701_v33, 4 }
 0x635   : > { %10505 = vmatprep.subr.bf16.mxu1 %v15579_v15  ;;  %v7511_v39 = vsel %vm532_vm1, %v7460_v20, 0 }
 0x636   : > { %v7470_v20 = vsel %vm5964_vm10, %v7467_v32, %v7469_v63 }
 0x63c   : > { %10506 = vmatpush3.bf16.xpose.msra.mxu1 %v7326_v35  ;;  %v7464_v35 = vsel %vm5964_vm10, %v7461_v43, %v7463_v51  ;;  %v7471_v43 = vrot.slane %v14725_v12, 4 }
 0x63d   : > { %10507 = vmatprep.subr.bf16.mxu1 %v15579_v15  ;;  %v7517_v58 = vsel %vm532_vm1, %v7464_v35, 0 }
 0x63e   : > { %v7472_v7 = vsel %vm5964_vm10, %v7469_v63, %v7471_v43  ;;  %v7474_v51 = vsel %vm5964_vm10, %v7471_v43, %v7473_v52  ;;  %v7562_v52 = vsel %vm532_vm1, %v14308_v50, 0  ;;  %v15739_v50 = vld [vmem:[#allocation18_spill] sm:$0xff] }
 0x63f   : > { %v7532_v35 = vsel %vm532_vm1, %v7474_v51, 0  ;;  %v15743_v43 = vld [vmem:[#allocation22_spill] sm:$0xff]  ;;  %v7727_v51 = vrot.slane %v14593_v21, 5 }
 0x644   : > { %10508 = vmatpush3.bf16.xpose.msra.mxu1 %v7329_v36  ;;  %v7520_v36 = vsel %vm532_vm1, %v7466_v27, 0 }
 0x645   : > { %10509 = vmatprep.subr.bf16.mxu1 %v15579_v15 }
 0x64c   : > { %10510 = vmatpush3.bf16.xpose.msra.mxu1 %v7332_v31  ;;  %v7485_v31 = vrot.slane %v14689_v44, 4 }
 0x64d   : > { %11065 = vmatprep.subr.msk.bf16.mxu1 %vm532_vm1, %v7476_v38  ;;  %v7523_v38 = vsel %vm532_vm1, %v7468_v42, 0 }
 0x64e   : > { %v7486_v14 = vsel %vm5964_vm10, %v7483_v49, %v7485_v31 }
 0x653   : > { %10512 = vmatmul.mubr.msk.bf16.vlgmr.msra.gmra.mrb[32].mxu1 %vm532_vm1, %v14625_v41  ;;  %v7480_v41 = vsel %vm5964_vm10, %v7477_v11, %v7479_v34  ;;  %v7487_v11 = vrot.slane %v14713_v55, 4  ;;  %v7489_v34 = vrot.slane %v14737_v29, 4 }
 0x654   : > { %9851 = vmatpush3.bf16.xpose.msra.mxu1 %v7511_v39  ;;  %9866 = vmatprep.mubr.msk.bf16.mxu1 %vm532_vm1, %v14836_v23  ;;  %v7526_v39 = vsel %vm532_vm1, %v7470_v20, 0 }
 0x655   : > { %11066 = vmatprep.subr.msk.bf16.mxu1 %vm532_vm1, %v7478_v26  ;;  %v7488_v26 = vsel %vm5964_vm10, %v7485_v31, %v7487_v11  ;;  %v7568_v31 = vsel %vm532_vm1, %v15739_v50, 0 }
 0x65c   : > { %9853 = vmatpush3.bf16.xpose.msra.mxu1 %v7514_v9  ;;  %v7529_v9 = vsel %vm532_vm1, %v7472_v7, 0  ;;  %v7580_v7 = vsel %vm532_vm1, %v15743_v43, 0 }
 0x65d   : > { %11067 = vmatprep.subr.msk.bf16.mxu1 %vm532_vm1, %v7480_v41  ;;  %v7490_v41 = vsel %vm5964_vm10, %v7487_v11, %v7489_v34  ;;  %v7722_v11 = vrot.slane %v14565_v8, 4 }
 0x664   : > { %9855 = vmatpush3.bf16.xpose.msra.mxu1 %v7517_v58  ;;  %v7492_v58 = vsel %vm5964_vm10, %v7489_v34, %v15737_v19  ;;  %v15744_v34 = vld [vmem:[#allocation23_spill] sm:$0xff]  ;;  %v7694_v19 = vrot.slane %v14601_v47, 4 }
 0x665   : > { %11068 = vmatprep.subr.msk.bf16.mxu1 %vm532_vm1, %v7482_v2  ;;  %v7559_v2 = vsel %vm532_vm1, %v7492_v58, 0  ;;  %v7695_v58 = vrot.slane %v14606_v30, 5 }
 0x66c   : > { %9857 = vmatpush3.bf16.xpose.msra.mxu1 %v7520_v36 }
 0x66d   : > { %11069 = vmatprep.subr.msk.bf16.mxu1 %vm532_vm1, %v7484_v37 }
 0x674   : > { %9859 = vmatpush3.bf16.xpose.msra.mxu1 %v7523_v38  ;;  %v15740_v38 = vld [vmem:[#allocation19_spill] sm:$0xff] }
 0x675   : > { %11070 = vmatprep.subr.msk.bf16.mxu1 %vm532_vm1, %v7486_v14  ;;  %v7571_v14 = vsel %vm532_vm1, %v15740_v38, 0  ;;  %v7698_v38 = vrot.slane %v14631_v6, 4 }
 0x67c   : > { %9861 = vmatpush3.bf16.xpose.msra.mxu1 %v7526_v39  ;;  %v7723_v39 = vrot.slane %v14568_v46, 5 }
 0x67d   : > { %11071 = vmatprep.subr.msk.bf16.mxu1 %vm532_vm1, %v7488_v26 }
 0x67e   : > { %v14919_v26 = vor.u32 %v7723_v39, %v7722_v11  ;;  %v7735_v11 = vrot.slane %v14651_v13, 5 }
 0x684   : > { %9863 = vmatpush3.bf16.xpose.msra.mxu1 %v7529_v9  ;;  %v7725_v9 = vsel %vm7681_vm11, %v15744_v34, %v14919_v26 }
 0x685   : > { %11072 = vmatprep.subr.msk.bf16.mxu1 %vm532_vm1, %v7490_v41  ;;  %v7726_v41 = vrot.slane %v14590_v59, 4 }
 0x68c   : > { %9865 = vmatpush3.bf16.xpose.msra.mxu1 %v7532_v35  ;;  %v7728_v35 = vor.u32 %v7727_v51, %v7726_v41 }
 0x68d   : > { %10515 = vmatprep.subr.bf16.mxu1 %v15579_v15 }
 0x693   : > { %9867 = vmatmul.mubr.msk.bf16.vlgmr.msra.gmra.mrb[16].mxu1 %vm532_vm1, %v14836_v23 }
 0x694   : > { %10516 = vmatpush3.bf16.xpose.msra.mxu1 %v7559_v2  ;;  %10531 = vmatprep.mubr.msk.bf16.mxu1 %vm11434_vm9, %v15579_v15  ;;  %v14934_v2 = vld [vmem:[%s15365_s3 + $0x28] sm:$0xff]  }
 0x695   : > { %10517 = vmatprep.subr.bf16.mxu1 %v15579_v15 }
 0x69c   : > { %10518 = vmatpush3.bf16.xpose.msra.mxu1 %v7562_v52  ;;  %v15745_v52 = vld [vmem:[#allocation7_spill] sm:$0xff] }
 0x69d   : > { %10519 = vmatprep.subr.bf16.mxu1 %v15579_v15  ;;  %v7795_v1 = vsel %vm532_vm1, %v15745_v52, 0 }
 0x6a4   : > { %10520 = vmatpush3.bf16.xpose.msra.mxu1 %v7565_v3  ;;  %v14942_v3 = vsel %vm7681_vm11, %v14919_v26, %v7728_v35 }
 0x6a5   : > { %10521 = vmatprep.subr.bf16.mxu1 %v15579_v15 }
 0x6a6   : > { %v6989_v27 = vpop.f32.mrb[28].mxu1 }
 0x6a7   : > { %v14900_v49 = vadd.f32 %v6989_v27, %v14792_v54  ;;  %v10493_v36 = vpop.f32.mrb[29].mxu1  ;;  %v15741_v54 = vld [vmem:[#allocation20_spill] sm:$0xff]  ;;  %v14944_v27 = vor.u32 %v7695_v58, %v7694_v19  ;;  %v7738_v19 = vrot.slane %v14670_v10, 4  ;;  %v7739_v58 = vrot.slane %v14675_v24, 5 }
 0x6a8   : > { %v6992_v37 = vpop.f32.mrb[30].mxu1  ;;  %v7574_v63 = vsel %vm532_vm1, %v15741_v54, 0  ;;  %v7730_v36 = vrot.slane %v14613_v48, 4 }
 0x6a9   : > { %v14903_v32 = vadd.f32 %v6992_v37, %v14800_v45  ;;  %v10494_v42 = vpop.f32.mrb[31].mxu1  ;;  %v15742_v45 = vld [vmem:[#allocation21_spill] sm:$0xff]  ;;  %v7731_v37 = vrot.slane %v14618_v0, 5 }
 0x6aa   : > { %v7577_v20 = vsel %vm532_vm1, %v15742_v45, 0  ;;  %v15746_v42 = vld [vmem:[#allocation24_spill] sm:$0xff] }
 0x6ab   : > { %v7697_v50 = vsel %vm7681_vm11, %v15746_v42, %v14944_v27  ;;  %v15748_v42 = vld [vmem:[#allocation32_spill] sm:$0xff] }
 0x6ac   : > { %10522 = vmatpush3.bf16.xpose.msra.mxu1 %v7568_v31  ;;  %v7732_v31 = vor.u32 %v7731_v37, %v7730_v36  ;;  %v7798_v54 = vsel %vm532_vm1, %v7697_v50, 0  ;;  %v15747_v36 = vld [vmem:[#allocation31_spill] sm:$0xff]  ;;  %v7707_v50 = vrot.slane %v15748_v42, 5 }
 0x6ad   : > { %10523 = vmatprep.subr.bf16.mxu1 %v15579_v15  ;;  %v7706_v37 = vrot.slane %v15747_v36, 4 }
 0x6b4   : > { %10524 = vmatpush3.bf16.xpose.msra.mxu1 %v7571_v14  ;;  %v7699_v14 = vrot.slane %v14634_v17, 5 }
 0x6b5   : > { %10525 = vmatprep.subr.bf16.mxu1 %v15579_v15 }
 0x6b6   : > { %v7700_v45 = vor.u32 %v7699_v14, %v7698_v38  ;;  %v7708_v14 = vor.u32 %v7707_v50, %v7706_v37  ;;  %v15753_v50 = vld [vmem:[#allocation37_spill] sm:$0xff] }
 0x6b8   : > { %v7701_v39 = vsel %vm7681_vm11, %v14944_v27, %v7700_v45 }
 0x6b9   : > { %v14977_v41 = vsel %vm532_vm1, %v7701_v39, 0 }
 0x6bc   : > { %10526 = vmatpush3.bf16.xpose.msra.mxu1 %v7574_v63  ;;  %v14966_v63 = vsel %vm7681_vm11, %v7728_v35, %v7732_v31 }
 0x6bd   : > { %10527 = vmatprep.subr.bf16.mxu1 %v15579_v15 }
 0x6c4   : > { %10528 = vmatpush3.bf16.xpose.msra.mxu1 %v7577_v20  ;;  %v7734_v20 = vrot.slane %v14646_v60, 4 }
 0x6c5   : > { %10529 = vmatprep.subr.bf16.mxu1 %v15579_v15 }
 0x6c6   : > { %v7736_v43 = vor.u32 %v7735_v11, %v7734_v20  ;;  %v15750_v11 = vld [vmem:[#allocation34_spill] sm:$0xff] }
 0x6c7   : > { %v7743_v39 = vrot.slane %v15750_v11, 5  ;;  %v7746_v11 = vrot.slane %v15753_v50, 4  ;;  %v15764_v50 = vld [vmem:[#allocation27_spill] sm:$0xff] }
 0x6c8   : > { %v14981_v51 = vsel %vm7681_vm11, %v7732_v31, %v7736_v43 }
 0x6cc   : > { %10530 = vmatpush3.bf16.xpose.msra.mxu1 %v7580_v7  ;;  %v7702_v7 = vrot.slane %v14658_v18, 4 }
 0x6cd   : > { %11073 = vmatprep.subr.msk.bf16.mxu1 %vm532_vm1, %v7725_v9  ;;  %v7703_v9 = vrot.slane %v14663_v28, 5 }
 0x6cf   : > { %v7704_v35 = vor.u32 %v7703_v9, %v7702_v7  ;;  %v15751_v9 = vld [vmem:[#allocation35_spill] sm:$0xff] }
 0x6d1   : > { %v7705_v52 = vsel %vm7681_vm11, %v7700_v45, %v7704_v35  ;;  %v7709_v45 = vsel %vm7681_vm11, %v7704_v35, %v7708_v14 }
 0x6d2   : > { %v14991_v38 = vsel %vm532_vm1, %v7705_v52, 0  ;;  %v15005_v42 = vsel %vm532_vm1, %v7709_v45, 0  ;;  %v15756_v45 = vld [vmem:[#allocation40_spill] sm:$0xff] }
 0x6d3   : > { %10532 = vmatmul.mubr.msk.bf16.vlgmr.msra.gmra.mrb[36].mxu1 %vm532_vm1, %v14836_v23  ;;  %v14955_v23 = vld [vmem:[%s15365_s3 + $0x40] sm:$0xff]  }
 0x6d4   : > { %9878 = vmatpush3.bf16.xpose.msra.mxu1 %v7795_v1  ;;  %9893 = vmatprep.mubr.msk.bf16.mxu1 %vm532_vm1, %v14934_v2  ;;  %v7740_v1 = vor.u32 %v7739_v58, %v7738_v19  ;;  %v7710_v19 = vrot.slane %v15751_v9, 4  ;;  %v15752_v58 = vld [vmem:[#allocation36_spill] sm:$0xff]  ;;  %v7715_v9 = vrot.slane %v15756_v45, 5  ;;  %v7956_v45 = vld [vmem:[#allocation2 + $0x10] sm:$0xf0] }
 0x6d5   : > { %11074 = vmatprep.subr.msk.bf16.mxu1 %vm532_vm1, %v14942_v3  ;;  %10612 = vmatmul.mubr.msk.bf16.vlgmr.msra.gmra.mrb[56].mxu0 %vm532_vm1, %v14955_v23  ;;  %v7711_v52 = vrot.slane %v15752_v58, 5 }
 0x6d6   : > { %v14995_v31 = vsel %vm7681_vm11, %v7736_v43, %v7740_v1 }
 0x6d7   : > { %v7712_v37 = vor.u32 %v7711_v52, %v7710_v19  ;;  %v7750_v52 = vrot.slane %v14742_v16, 4 }
 0x6d9   : > { %v7713_v35 = vsel %vm7681_vm11, %v7708_v14, %v7712_v37 }
 0x6da   : > { %v15019_v24 = vsel %vm532_vm1, %v7713_v35, 0 }
 0x6dc   : > { %9880 = vmatpush3.bf16.xpose.msra.mxu1 %v7798_v54  ;;  %v15749_v54 = vld [vmem:[#allocation33_spill] sm:$0xff] }
 0x6dd   : > { %11075 = vmatprep.subr.msk.bf16.mxu1 %vm532_vm1, %v14966_v63  ;;  %v7742_v20 = vrot.slane %v15749_v54, 4  ;;  %v15754_v54 = vld [vmem:[#allocation38_spill] sm:$0xff] }
 0x6de   : > { %v7747_v36 = vrot.slane %v15754_v54, 5  ;;  %v7751_v54 = vrot.slane %v14747_v4, 5 }
 0x6df   : > { %v7744_v7 = vor.u32 %v7743_v39, %v7742_v20  ;;  %v15755_v39 = vld [vmem:[#allocation39_spill] sm:$0xff] }
 0x6e0   : > { %v7748_v20 = vor.u32 %v7747_v36, %v7746_v11  ;;  %v7714_v58 = vrot.slane %v15755_v39, 4  ;;  %v15033_v14 = vor.u32 %v7751_v54, %v7750_v52  ;;  %v15757_v54 = vld [vmem:[#allocation6_spill] sm:$0xff]  ;;  %v15759_v52 = vld [vmem:[#allocation11_spill] sm:$0xff]  ;;  %v7993_v39 = vshll.u32 %v7956_v45, 16 }
 0x6e1   : > { %v15009_v43 = vsel %vm7681_vm11, %v7740_v1, %v7744_v7 }
 0x6e2   : > { %v15023_v1 = vsel %vm7681_vm11, %v7744_v7, %v7748_v20  ;;  %v15025_v19 = vor.u32 %v7715_v9, %v7714_v58  ;;  %v15041_v7 = vsel %vm7681_vm11, %v7748_v20, %v15033_v14  ;;  %v7995_v10 = vrot.slane %v7993_v39, 5 }
 0x6e4   : > { %9882 = vmatpush3.bf16.xpose.msra.mxu1 %v14977_v41  ;;  %v7717_v36 = vsel %vm7681_vm11, %v7712_v37, %v15025_v19  ;;  %v7721_v9 = vsel %vm7681_vm11, %v15025_v19, %v15744_v34  ;;  %v7757_v37 = vsel %vm7681_vm11, %v15033_v14, %v15757_v54  ;;  %v15758_v34 = vld [vmem:[#allocation9_spill] sm:$0xff] }
 0x6e5   : > { %11076 = vmatprep.subr.msk.bf16.mxu1 %vm532_vm1, %v14981_v51  ;;  %v15036_v11 = vsel %vm532_vm1, %v7717_v36, 0  ;;  %v7816_v58 = vsel %vm532_vm1, %v7721_v9, 0  ;;  %v7843_v35 = vsel %vm532_vm1, %v7757_v37, 0  ;;  %v7846_v20 = vsel %vm532_vm1, %v15758_v34, 0  ;;  %v15760_v34 = vld [vmem:[#allocation25_spill] sm:$0xff] }
 0x6e6   : > { %v7849_v36 = vsel %vm532_vm1, %v15759_v52, 0  ;;  %v15761_v52 = vld [vmem:[#allocation26_spill] sm:$0xff] }
 0x6ec   : > { %9884 = vmatpush3.bf16.xpose.msra.mxu1 %v14991_v38 }
 0x6ed   : > { %11077 = vmatprep.subr.msk.bf16.mxu1 %vm532_vm1, %v14995_v31 }
 0x6f4   : > { %9886 = vmatpush3.bf16.xpose.msra.mxu1 %v15005_v42 }
 0x6f5   : > { %11078 = vmatprep.subr.msk.bf16.mxu1 %vm532_vm1, %v15009_v43 }
 0x6fc   : > { %9888 = vmatpush3.bf16.xpose.msra.mxu1 %v15019_v24 }
 0x6fd   : > { %11079 = vmatprep.subr.msk.bf16.mxu1 %vm532_vm1, %v15023_v1 }
 0x704   : > { %9890 = vmatpush3.bf16.xpose.msra.mxu1 %v15036_v11 }
 0x705   : > { %11080 = vmatprep.subr.msk.bf16.mxu1 %vm532_vm1, %v15041_v7 }
 0x70c   : > { %9892 = vmatpush3.bf16.xpose.msra.mxu1 %v7816_v58 }
 0x70d   : > { %10535 = vmatprep.subr.bf16.mxu1 %v15579_v15 }
 0x713   : > { %9894 = vmatmul.mubr.msk.bf16.vlgmr.msra.gmra.mrb[16].mxu1 %vm532_vm1, %v14934_v2 }
 0x714   : > { %10536 = vmatpush3.bf16.xpose.msra.mxu1 %v7843_v35  ;;  %10551 = vmatprep.mubr.msk.bf16.mxu1 %vm11434_vm9, %v15579_v15 }
 0x715   : > { %10537 = vmatprep.subr.bf16.mxu1 %v15579_v15 }
 0x71c   : > { %10538 = vmatpush3.bf16.xpose.msra.mxu1 %v7846_v20  ;;  %v7852_v20 = vsel %vm532_vm1, %v15760_v34, 0 }
 0x71d   : > { %10539 = vmatprep.subr.bf16.mxu1 %v15579_v15 }
 0x724   : > { %10540 = vmatpush3.bf16.xpose.msra.mxu1 %v7849_v36  ;;  %v7855_v36 = vsel %vm532_vm1, %v15761_v52, 0 }
 0x725   : > { %10541 = vmatprep.subr.bf16.mxu1 %v15579_v15 }
 0x726   : > { %v7411_v9 = vpop.f32.mrb[32].mxu1 }
 0x727   : > { %v15066_v58 = vadd.f32 %v7411_v9, %v14900_v49  ;;  %v10513_v54 = vpop.f32.mrb[33].mxu1  ;;  %v15762_v49 = vld [vmem:[#allocation10_spill] sm:$0xff] }
 0x728   : > { %v7414_v37 = vpop.f32.mrb[34].mxu1  ;;  %v7858_v9 = vsel %vm532_vm1, %v15762_v49, 0  ;;  %v7672_v54 = vld [vmem:[#allocation2 + $0xc8] sm:$0x1f] }
 0x729   : > { %v15069_v35 = vadd.f32 %v7414_v37, %v14903_v32  ;;  %v10514_v4 = vpop.f32.mrb[35].mxu1  ;;  %v7786_v32 = vshll.u32 %v7672_v54, 16 }
 0x72a   : > { %v7783_v4 = vshrl.u32 %v7672_v54, 16 }
 0x72b   : > { %v7788_v34 = vrot.slane %v7786_v32, 5  ;;  %v8416_v32 = vrot.slane %v14620_v22, 5 }
 0x72c   : > { %10542 = vmatpush3.bf16.xpose.msra.mxu1 %v7852_v20  ;;  %v7785_v37 = vrot.slane %v7783_v4, 4  ;;  %v15763_v20 = vld [vmem:[#allocation28_spill] sm:$0xff] }
 0x72d   : > { %10543 = vmatprep.subr.bf16.mxu1 %v15579_v15  ;;  %v7861_v16 = vsel %vm532_vm1, %v15763_v20, 0 }
 0x72e   : > { %v7789_v52 = vor.u32 %v7788_v34, %v7785_v37  ;;  %v8434_v34 = vrot.slane %v14639_v40, 5  ;;  %v8420_v40 = vrot.slane %v14677_v25, 5 }
 0x730   : > { %v7790_v49 = vsel %vm7681_vm11, %v15764_v50, %v7789_v52  ;;  %v11365_v50 = vld [vmem:[%s15365_s3 + $0x30] sm:$0xff]   ;;  %v8418_v52 = vrot.slane %v14653_v56, 5 }
 0x731   : > { %v7864_v28 = vsel %vm532_vm1, %v7790_v49, 0  ;;  %v8436_v49 = vrot.slane %v14665_v62, 5  ;;  %v8438_v62 = vrot.slane %v14689_v44, 5 }
 0x734   : > { %10544 = vmatpush3.bf16.xpose.msra.mxu1 %v7855_v36  ;;  %v7990_v36 = vshrl.u32 %v7956_v45, 16  ;;  %v15130_v45 = vld [vmem:[#allocation2 + $0x10] sm:$0xe0] }
 0x735   : > { %10545 = vmatprep.subr.bf16.mxu1 %v15579_v15 }
 0x73c   : > { %10546 = vmatpush3.bf16.xpose.msra.mxu1 %v7858_v9  ;;  %v7992_v9 = vrot.slane %v7990_v36, 4  ;;  %v8419_v36 = vsel %vm8412_vm12, %v8416_v32, %v8418_v52 }
 0x73d   : > { %10547 = vmatprep.subr.bf16.mxu1 %v15579_v15 }
 0x73e   : > { %v7996_v54 = vor.u32 %v7995_v10, %v7992_v9  ;;  %v8472_v9 = vsel %vm532_vm1, %v8419_v36, 0  ;;  %v8674_v36 = vrot.slane %v14568_v46, 6 }
 0x744   : > { %10548 = vmatpush3.bf16.xpose.msra.mxu1 %v7861_v16  ;;  %v8005_v16 = vsel %vm7681_vm11, %v7996_v54, %v14944_v27  ;;  %v8437_v54 = vsel %vm8412_vm12, %v8434_v34, %v8436_v49 }
 0x745   : > { %10549 = vmatprep.subr.bf16.mxu1 %v15579_v15  ;;  %v8217_v15 = vsel %vm532_vm1, %v8005_v16, 0 }
 0x74c   : > { %10550 = vmatpush3.bf16.xpose.msra.mxu1 %v7864_v28  ;;  %v15765_v28 = vld [vmem:[#allocation8_spill] sm:$0xff] }
 0x74d   : > { %11081 = vmatprep.subr.msk.bf16.mxu1 %vm532_vm1, %v14942_v3  ;;  %v15766_v10 = vshrl.u32 %v15765_v28, 16  ;;  %v15767_v3 = vshll.u32 %v15765_v28, 16 }
 0x74f   : > { %v8057_v27 = vrot.slane %v15767_v3, 5 }
 0x753   : > { %10552 = vmatmul.mubr.msk.bf16.vlgmr.msra.gmra.mrb[40].mxu1 %vm532_vm1, %v14934_v2  ;;  %v8054_v2 = vrot.slane %v15766_v10, 4  ;;  %v8421_v10 = vsel %vm8412_vm12, %v8418_v52, %v8420_v40  ;;  %v8673_v52 = vrot.slane %v14565_v8, 5 }
 0x754   : > { %9905 = vmatpush3.bf16.xpose.msra.mxu1 %v8217_v15  ;;  %9920 = vmatprep.mubr.msk.bf16.mxu1 %vm532_vm1, %v11365_v50 }
 0x755   : > { %11082 = vmatprep.subr.msk.bf16.mxu1 %vm532_vm1, %v14966_v63  ;;  %v8058_v63 = vor.u32 %v8057_v27, %v8054_v2 }
 0x75c   : > { %9907 = vmatpush3.bf16.xpose.msra.mxu1 %v14977_v41  ;;  %v8059_v41 = vsel %vm7681_vm11, %v15025_v19, %v8058_v63  ;;  %v8414_v19 = vrot.slane %v14595_v61, 5  ;;  %v15149_v61 = vld [vmem:[%s15365_s3 + $0x38] sm:$0xff]  }
 0x75d   : > { %11083 = vmatprep.subr.msk.bf16.mxu1 %vm532_vm1, %v14981_v51  ;;  %v15768_v51 = vld [vmem:[#allocation17_spill] sm:$0xff] }
 0x75e   : > { %v8417_v37 = vsel %vm8412_vm12, %v8414_v19, %v8416_v32 }
 0x75f   : > { %v8469_v20 = vsel %vm532_vm1, %v8417_v37, 0  ;;  %v15769_v37 = vld [vmem:[#allocation16_spill] sm:$0xff] }
 0x764   : > { %9909 = vmatpush3.bf16.xpose.msra.mxu1 %v14991_v38  ;;  %v8068_v38 = vsel %vm7681_vm11, %v8058_v63, %v14919_v26 }
 0x765   : > { %11084 = vmatprep.subr.msk.bf16.mxu1 %vm532_vm1, %v14995_v31  ;;  %v8430_v31 = vrot.slane %v14579_v57, 5  ;;  %v8238_v39 = vsel %vm532_vm1, %v8068_v38, 0  ;;  %v8432_v57 = vrot.slane %v14608_v53, 5 }
 0x767   : > { %v8433_v4 = vsel %vm8412_vm12, %v8430_v31, %v8432_v57  ;;  %v8435_v22 = vsel %vm8412_vm12, %v8432_v57, %v8434_v34  ;;  %v15770_v34 = vrot.slane %v15769_v37, 5 }
 0x76c   : > { %9911 = vmatpush3.bf16.xpose.msra.mxu1 %v15005_v42  ;;  %v8140_v42 = vsel %vm7681_vm11, %v15033_v14, %v15768_v51  ;;  %v8413_v14 = vrot.slane %v15130_v45, 5  ;;  %v8422_v51 = vrot.slane %v14701_v33, 5 }
 0x76d   : > { %11085 = vmatprep.subr.msk.bf16.mxu1 %vm532_vm1, %v15009_v43  ;;  %v8428_v43 = vrot.slane %v14561_v5, 5  ;;  %v8681_v5 = vrot.slane %v14613_v48, 5 }
 0x76e   : > { %v8415_v26 = vsel %vm8412_vm12, %v8413_v14, %v8414_v19  ;;  %v8423_v38 = vsel %vm8412_vm12, %v8420_v40, %v8422_v51  ;;  %v8424_v19 = vrot.slane %v14725_v12, 5  ;;  %v8442_v14 = vrot.slane %v14737_v29, 5 }
 0x770   : > { %v8425_v33 = vsel %vm8412_vm12, %v8422_v51, %v8424_v19  ;;  %v8445_v29 = vsel %vm8412_vm12, %v8442_v14, %v15770_v34 }
 0x774   : > { %9913 = vmatpush3.bf16.xpose.msra.mxu1 %v15019_v24  ;;  %v8235_v24 = vsel %vm532_vm1, %v8059_v41, 0  ;;  %v8475_v41 = vsel %vm532_vm1, %v8421_v10, 0 }
 0x775   : > { %11086 = vmatprep.subr.msk.bf16.mxu1 %vm532_vm1, %v15023_v1  ;;  %v8431_v1 = vsel %vm8412_vm12, %v8428_v43, %v8430_v31  ;;  %v8440_v31 = vrot.slane %v14713_v55, 5 }
 0x777   : > { %v8443_v57 = vsel %vm8412_vm12, %v8440_v31, %v8442_v14 }
 0x77c   : > { %9915 = vmatpush3.bf16.xpose.msra.mxu1 %v15036_v11  ;;  %v8466_v11 = vsel %vm532_vm1, %v8415_v26, 0  ;;  %v8481_v26 = vsel %vm532_vm1, %v8425_v33, 0  ;;  %v15774_v33 = vld [vmem:[#allocation31_spill] sm:$0xff] }
 0x77d   : > { %11087 = vmatprep.subr.msk.bf16.mxu1 %vm532_vm1, %v15041_v7  ;;  %v15142_v7 = vpop.f32.mrb[48].mxu0  ;;  %v8657_v14 = vrot.slane %v15774_v33, 5  ;;  %v8930_v33 = vld [vmem:[%s15289_s9 + $0x8] ss:$12 sps:$4 sm:$0xff]  }
 0x77e   : > { %v10573_v53 = vpop.f32.mrb[49].mxu0 }
 0x784   : > { %9917 = vmatpush3.bf16.xpose.msra.mxu1 %v8235_v24  ;;  %v8439_v24 = vsel %vm8412_vm12, %v8436_v49, %v8438_v62  ;;  %v8638_v49 = vshrl.u32 %v15130_v45, 16 }
 0x785   : > { %11088 = vmatprep.subr.msk.bf16.mxu1 %vm532_vm1, %v8140_v42 }
 0x78c   : > { %9919 = vmatpush3.bf16.xpose.msra.mxu1 %v8238_v39  ;;  %v8478_v39 = vsel %vm532_vm1, %v8423_v38, 0  ;;  %v15772_v38 = vld [vmem:[#allocation15_spill] sm:$0xff] }
 0x78d   : > { %11089 = vmatprep.subr.msk.bf16.mxu1 %vm532_vm1, %v8431_v1  ;;  %v8441_v1 = vsel %vm8412_vm12, %v8438_v62, %v8440_v31  ;;  %v8649_v62 = vrot.slane %v14631_v6, 5  ;;  %v15773_v31 = vld [vmem:[#allocation30_spill] sm:$0xff] }
 0x793   : > { %9921 = vmatmul.mubr.msk.bf16.vlgmr.msra.gmra.mrb[16].mxu1 %vm532_vm1, %v11365_v50  ;;  %v15169_v50 = vpop.f32.mrb[50].mxu0 }
 0x794   : > { %9932 = vmatpush3.bf16.xpose.msra.mxu1 %v8466_v11  ;;  %9947 = vmatprep.mubr.msk.bf16.mxu1 %vm532_vm1, %v15149_v61  ;;  %v10574_v2 = vpop.f32.mrb[51].mxu0  ;;  %v11367_v11 = vld [vmem:[#allocation2 + $0x48] sm:$0xff] }
 0x795   : > { %11090 = vmatprep.subr.msk.bf16.mxu1 %vm532_vm1, %v8433_v4  ;;  %v15176_v25 = vpop.f32.mrb[52].mxu0  ;;  %v8426_v55 = vrot.slane %v11367_v11, 5  ;;  %v8650_v2 = vrot.slane %v14634_v17, 6 }
 0x796   : > { %v10593_v63 = vpop.f32.mrb[53].mxu0 }
 0x797   : > { %v8427_v32 = vsel %vm8412_vm12, %v8424_v19, %v8426_v55  ;;  %v8651_v63 = vor.u32 %v8650_v2, %v8649_v62  ;;  %v15784_v62 = vld [vmem:[#allocation41_spill] sm:$0xff] }
 0x798   : > { %v8484_v53 = vsel %vm532_vm1, %v8427_v32, 0  ;;  %v15776_v32 = vld [vmem:[#allocation33_spill] sm:$0xff]  ;;  %v8701_v2 = vrot.slane %v15784_v62, 5 }
 0x79c   : > { %9934 = vmatpush3.bf16.xpose.msra.mxu1 %v8469_v20  ;;  %v8677_v20 = vrot.slane %v14590_v59, 5  ;;  %v8646_v59 = vrot.slane %v14606_v30, 6 }
 0x79d   : > { %11091 = vmatprep.subr.msk.bf16.mxu1 %vm532_vm1, %v8435_v22  ;;  %v8678_v22 = vrot.slane %v14593_v21, 6  ;;  %v15216_v21 = vor.u32 %v8674_v36, %v8673_v52  ;;  %v15779_v52 = vld [vmem:[#allocation36_spill] sm:$0xff] }
 0x79e   : > { %v8662_v36 = vrot.slane %v15779_v52, 6 }
 0x79f   : > { %v8679_v40 = vor.u32 %v8678_v22, %v8677_v20  ;;  %v15778_v20 = vld [vmem:[#allocation35_spill] sm:$0xff] }
 0x7a0   : > { %v8661_v22 = vrot.slane %v15778_v20, 5 }
 0x7a1   : > { %v8680_v46 = vsel %vm8636_vm13, %v15216_v21, %v8679_v40 }
 0x7a4   : > { %9936 = vmatpush3.bf16.xpose.msra.mxu1 %v8472_v9  ;;  %v8641_v9 = vshll.u32 %v15130_v45, 16 }
 0x7a5   : > { %11092 = vmatprep.subr.msk.bf16.mxu1 %vm532_vm1, %v8437_v54  ;;  %v8429_v54 = vsel %vm8412_vm12, %v8426_v55, %v8428_v43  ;;  %v8682_v43 = vrot.slane %v14618_v0, 6  ;;  %v8685_v0 = vrot.slane %v14646_v60, 5 }
 0x7a6   : > { %v7659_v16 = vpop.f32.mrb[36].mxu1  ;;  %v8487_v8 = vsel %vm532_vm1, %v8429_v54, 0  ;;  %v8663_v54 = vor.u32 %v8662_v36, %v8661_v22 }
 0x7a7   : > { %v15167_v15 = vadd.f32 %v7659_v16, %v15066_v58  ;;  %v10533_v56 = vpop.f32.mrb[37].mxu1  ;;  %v15179_v58 = vpop.f32.mrb[54].mxu0  ;;  %v8645_v16 = vrot.slane %v14601_v47, 5  ;;  %v8683_v10 = vor.u32 %v8682_v43, %v8681_v5  ;;  %v15783_v5 = vld [vmem:[#allocation40_spill] sm:$0xff] }
 0x7a8   : > { %v7662_v28 = vpop.f32.mrb[38].mxu1  ;;  %v10594_v42 = vpop.f32.mrb[55].mxu0  ;;  %v8640_v56 = vrot.slane %v8638_v49, 5  ;;  %v8666_v43 = vrot.slane %v15783_v5, 6 }
 0x7a9   : > { %v15174_v3 = vadd.f32 %v7662_v28, %v15069_v35  ;;  %v10534_v27 = vpop.f32.mrb[39].mxu1  ;;  %v15184_v44 = vpop.f32.mrb[56].mxu0  ;;  %v8643_v28 = vrot.slane %v8641_v9, 6  ;;  %v8647_v45 = vor.u32 %v8646_v59, %v8645_v16  ;;  %v8684_v48 = vsel %vm8636_vm13, %v8679_v40, %v8683_v10  ;;  %v15780_v40 = vld [vmem:[#allocation37_spill] sm:$0xff]  ;;  %v15781_v59 = vld [vmem:[#allocation38_spill] sm:$0xff] }
 0x7aa   : > { %v10613_v35 = vpop.f32.mrb[57].mxu0  ;;  %v8697_v16 = vrot.slane %v15780_v40, 5 }
 0x7ab   : > { %v15197_v4 = vpop.f32.mrb[58].mxu0  ;;  %v8644_v47 = vor.u32 %v8643_v28, %v8640_v56  ;;  %v8652_v6 = vsel %vm8636_vm13, %v8647_v45, %v8651_v63  ;;  %v8698_v56 = vrot.slane %v15781_v59, 6 }
 0x7ac   : > { %9938 = vmatpush3.bf16.xpose.msra.mxu1 %v8475_v41  ;;  %v10614_v12 = vpop.f32.mrb[59].mxu0  ;;  %v8686_v41 = vrot.slane %v14651_v13, 6  ;;  %v8753_v42 = vsel %vm532_vm1, %v8652_v6, 0  ;;  %v8689_v13 = vrot.slane %v15772_v38, 5 }
 0x7ad   : > { %11093 = vmatprep.subr.msk.bf16.mxu1 %vm532_vm1, %v8439_v24  ;;  %v8648_v30 = vsel %vm8636_vm13, %v8644_v47, %v8647_v45  ;;  %v15771_v24 = vld [vmem:[#allocation12_spill] sm:$0xff]  ;;  %v8693_v12 = vrot.slane %v15776_v32, 5  ;;  %v8921_v32 = vpop.permute.xlu1 %8920 }
 0x7ae   : > { %v8750_v27 = vsel %vm532_vm1, %v8648_v30, 0  ;;  %v8687_v17 = vor.u32 %v8686_v41, %v8685_v0  ;;  %v8654_v51 = vrot.slane %v15771_v24, 6 }
 0x7b0   : > { %v8688_v35 = vsel %vm8636_vm13, %v8683_v10, %v8687_v17 }
 0x7b4   : > { %9940 = vmatpush3.bf16.xpose.msra.mxu1 %v8478_v39  ;;  %v8690_v39 = vrot.slane %v15773_v31, 6 }
 0x7b5   : > { %11094 = vmatprep.subr.msk.bf16.mxu1 %vm532_vm1, %v8441_v1 }
 0x7b6   : > { %v8691_v19 = vor.u32 %v8690_v39, %v8689_v13 }
 0x7b8   : > { %v8692_v11 = vsel %vm8636_vm13, %v8687_v17, %v8691_v19  ;;  %v15786_v17 = vld [vmem:[#allocation29_spill] sm:$0xff] }
 0x7bc   : > { %9942 = vmatpush3.bf16.xpose.msra.mxu1 %v8481_v26 }
 0x7bd   : > { %11095 = vmatprep.subr.msk.bf16.mxu1 %vm532_vm1, %v8443_v57 }
 0x7c4   : > { %9944 = vmatpush3.bf16.xpose.msra.mxu1 %v8484_v53  ;;  %v15777_v53 = vld [vmem:[#allocation34_spill] sm:$0xff] }
 0x7c5   : > { %11096 = vmatprep.subr.msk.bf16.mxu1 %vm532_vm1, %v8445_v29  ;;  %v8694_v37 = vrot.slane %v15777_v53, 6 }
 0x7c7   : > { %v8695_v29 = vor.u32 %v8694_v37, %v8693_v12 }
 0x7c9   : > { %v8696_v9 = vsel %vm8636_vm13, %v8691_v19, %v8695_v29 }
 0x7cc   : > { %9946 = vmatpush3.bf16.xpose.msra.mxu1 %v8487_v8  ;;  %v8699_v8 = vor.u32 %v8698_v56, %v8697_v16 }
 0x7cd   : > { %11097 = vmatprep.subr.msk.bf16.mxu1 %vm532_vm1, %v8680_v46  ;;  %v15782_v46 = vld [vmem:[#allocation39_spill] sm:$0xff] }
 0x7ce   : > { %v8665_v45 = vrot.slane %v15782_v46, 5  ;;  %v8700_v30 = vsel %vm8636_vm13, %v8695_v29, %v8699_v8 }
 0x7d0   : > { %v8667_v10 = vor.u32 %v8666_v43, %v8665_v45 }
 0x7d3   : > { %9948 = vmatmul.mubr.msk.bf16.vlgmr.msra.gmra.mrb[16].mxu1 %vm532_vm1, %v15149_v61  ;;  %v8653_v61 = vrot.slane %v14658_v18, 5  ;;  %v15775_v18 = vld [vmem:[#allocation32_spill] sm:$0xff] }
 0x7d4   : > { %9959 = vmatpush3.bf16.xpose.msra.mxu1 %v8750_v27  ;;  %9974 = vmatprep.mubr.msk.bf16.mxu1 %vm532_vm1, %v14955_v23  ;;  %v8658_v26 = vrot.slane %v15775_v18, 6  ;;  %v15785_v27 = vld [vmem:[#allocation42_spill] sm:$0xff] }
 0x7d5   : > { %11098 = vmatprep.subr.msk.bf16.mxu1 %vm532_vm1, %v8684_v48  ;;  %v8655_v60 = vor.u32 %v8654_v51, %v8653_v61  ;;  %v8702_v48 = vrot.slane %v15785_v27, 6  ;;  %v8672_v61 = vsel %vm8636_vm13, %v8667_v10, %v15786_v17  ;;  %v15787_v51 = vld [vmem:[#allocation14_spill] sm:$0xff] }
 0x7d6   : > { %v8659_v55 = vor.u32 %v8658_v26, %v8657_v14  ;;  %v8768_v24 = vsel %vm532_vm1, %v8672_v61, 0  ;;  %v8935_v26 = vunpack.c.l.bf16 %v8930_v33 }
 0x7d7   : > { %v8656_v1 = vsel %vm8636_vm13, %v8651_v63, %v8655_v60  ;;  %v8668_v63 = vsel %vm8636_vm13, %v8663_v54, %v8667_v10  ;;  %v8703_v0 = vor.u32 %v8702_v48, %v8701_v2 }
 0x7d8   : > { %v8756_v57 = vsel %vm532_vm1, %v8656_v1, 0  ;;  %v8660_v34 = vsel %vm8636_vm13, %v8655_v60, %v8659_v55  ;;  %v8664_v28 = vsel %vm8636_vm13, %v8659_v55, %v8663_v54  ;;  %v8765_v41 = vsel %vm532_vm1, %v8668_v63, 0 }
 0x7d9   : > { %v8759_v49 = vsel %vm532_vm1, %v8660_v34, 0  ;;  %v8762_v47 = vsel %vm532_vm1, %v8664_v28, 0  ;;  %v8704_v6 = vsel %vm8636_vm13, %v8699_v8, %v8703_v0 }
 0x7dc   : > { %9961 = vmatpush3.bf16.xpose.msra.mxu1 %v8753_v42  ;;  %v8708_v42 = vsel %vm8636_vm13, %v8703_v0, %v15787_v51 }
 0x7dd   : > { %11099 = vmatprep.subr.msk.bf16.mxu1 %vm532_vm1, %v8688_v35  ;;  %v8676_v35 = vsel %vm8636_vm13, %v15786_v17, %v15216_v21 }
 0x7de   : > { %v8771_v60 = vsel %vm532_vm1, %v8676_v35, 0 }
 0x7e4   : > { %9963 = vmatpush3.bf16.xpose.msra.mxu1 %v8756_v57  ;;  %v8916_v57 = vpop.permute.xlu0 %8915 }
 0x7e5   : > { %11100 = vmatprep.subr.msk.bf16.mxu1 %vm532_vm1, %v8692_v11 }
 0x7ec   : > { %9965 = vmatpush3.bf16.xpose.msra.mxu1 %v8759_v49  ;;  %v8929_v49 = vld [vmem:[%s15289_s9] sm:$0xff] }
 0x7ed   : > { %11101 = vmatprep.subr.msk.bf16.mxu1 %vm532_vm1, %v8696_v9  ;;  %v8931_v9 = vld [vmem:[%s15289_s9 + $0xc] sm:$0xff]  ;;  %v8933_v54 = vunpack.c.l.bf16 %v8929_v49  ;;  %v8934_v16 = vunpack.c.h.bf16 %v8929_v49 }
 0x7ee   : > { %v8936_v28 = vunpack.c.l.bf16 %v8931_v9  ;;  %v8937_v45 = vunpack.c.h.bf16 %v8931_v9 }
 0x7f4   : > { %9967 = vmatpush3.bf16.xpose.msra.mxu1 %v8762_v47 }
 0x7f5   : > { %11102 = vmatprep.subr.msk.bf16.mxu1 %vm532_vm1, %v8700_v30 }
 0x7fc   : > { %9969 = vmatpush3.bf16.xpose.msra.mxu1 %v8765_v41 }
 0x7fd   : > { %11103 = vmatprep.subr.msk.bf16.mxu1 %vm532_vm1, %v8704_v6 }
 0x804   : > { %9971 = vmatpush3.bf16.xpose.msra.mxu1 %v8768_v24 }
 0x805   : > { %11104 = vmatprep.subr.msk.bf16.mxu1 %vm532_vm1, %v8708_v42 }
 0x80c   : > { %9973 = vmatpush3.bf16.xpose.msra.mxu1 %v8771_v60 }
 0x813   : > { %9975 = vmatmul.mubr.msk.bf16.vlgmr.msra.gmra.mrb[16].mxu1 %vm532_vm1, %v14955_v23 }
 0x826   : > { %v7943_v38 = vpop.f32.mrb[40].mxu1 }
 0x827   : > { %v7952_v13 = vadd.f32 %v7943_v38, %v15167_v15  ;;  %v10553_v31 = vpop.f32.mrb[41].mxu1 }
 0x828   : > { %v7946_v39 = vpop.f32.mrb[42].mxu1 }
 0x829   : > { %v7955_v21 = vadd.f32 %v7946_v39, %v15174_v3  ;;  %v8374_v1 = vadd.f32 %v15142_v7, %v7952_v13  ;;  %v10554_v19 = vpop.f32.mrb[43].mxu1  ;;  %v8938_v3 = vunpack.c.h.bf16 %v8930_v33 }
 0x82b   : > { %v8623_v23 = vadd.f32 %v15176_v25, %v8374_v1  ;;  %v8377_v14 = vadd.f32 %v15169_v50, %v7955_v21 }
 0x82d   : > { %v8626_v15 = vadd.f32 %v15179_v58, %v8377_v14  ;;  %v8907_v18 = vadd.f32 %v15184_v44, %v8623_v23 }
 0x82f   : > { %v8925_v11 = vadd.f32 %v8916_v57, %v8907_v18  ;;  %v8910_v55 = vadd.f32 %v15197_v4, %v8626_v15 }
 0x831   : > { %v8941_v7 = vadd.f32 %v8935_v26, %v8925_v11  ;;  %v8928_v12 = vadd.f32 %v8921_v32, %v8910_v55 }
 0x833   : > { %v8947_v53 = vmax.f32 %v8941_v7, 0.0  ;;  %v8944_v37 = vadd.f32 %v8938_v3, %v8928_v12 }
 0x835   : > { %v8953_v25 = vmin.f32 %v8947_v53, 1.0  ;;  %v8950_v50 = vmax.f32 %v8944_v37, 0.0 }
 0x837   : > { %v8959_v58 = vmul.f32 15.0, %v8953_v25  ;;  %v8956_v34 = vmin.f32 %v8950_v50, 1.0 }
 0x839   : > { %v11158_v44 = vround.rtne.f32 %v8959_v58  ;;  %v8962_v29 = vmul.f32 15.0, %v8956_v34 }
 0x83b   : > { %v8971_v20 = vmul.f32 0.06666667, %v11158_v44  ;;  %v11161_v22 = vround.rtne.f32 %v8962_v29 }
 0x83d   : > { %v9514_v4 = vpack.c.bf16 %v8971_v20, %v8971_v20  ;;  %v8974_v52 = vmul.f32 0.06666667, %v11161_v22 }
 0x83f   : > { %8996 = vst [vmem:[%s15302_s14 + $0x8] sm:$0xf] %v9514_v4  ;;  %v9516_v36 = vpack.c.bf16 %v8974_v52, %v8974_v52 }
 0x841   : > { %8998 = vst [vmem:[%s15302_s14 + $0x14] sm:$0xf] %v9516_v36 }
 0x8e6   : > { %v8855_v40 = vpop.f32.mrb[16].mxu1 }
 0x8e7   : > { %v8923_v59 = vadd.f32 %v8916_v57, %v8855_v40  ;;  %v8857_v56 = vpop.f32.mrb[17].mxu1 }
 0x8e8   : > { %v8924_v8 = vadd.f32 %v8916_v57, %v8857_v56  ;;  %v8859_v46 = vpop.f32.mrb[18].mxu1 }
 0x8e9   : > { %v8939_v5 = vadd.f32 %v8933_v54, %v8923_v59  ;;  %v8926_v43 = vadd.f32 %v8921_v32, %v8859_v46  ;;  %v8861_v47 = vpop.f32.mrb[19].mxu1 }
 0x8ea   : > { %v8940_v30 = vadd.f32 %v8934_v16, %v8924_v8  ;;  %v8927_v10 = vadd.f32 %v8921_v32, %v8861_v47 }
 0x8eb   : > { %v8945_v62 = vmax.f32 %v8939_v5, 0.0  ;;  %v8942_v2 = vadd.f32 %v8936_v28, %v8926_v43 }
 0x8ec   : > { %v8946_v27 = vmax.f32 %v8940_v30, 0.0  ;;  %v8943_v48 = vadd.f32 %v8937_v45, %v8927_v10 }
 0x8ed   : > { %v8951_v63 = vmin.f32 %v8945_v62, 1.0  ;;  %v8948_v0 = vmax.f32 %v8942_v2, 0.0 }
 0x8ee   : > { %v8952_v41 = vmin.f32 %v8946_v27, 1.0  ;;  %v8949_v6 = vmax.f32 %v8943_v48, 0.0 }
 0x8ef   : > { %v8957_v17 = vmul.f32 15.0, %v8951_v63  ;;  %v8954_v61 = vmin.f32 %v8948_v0, 1.0 }
 0x8f0   : > { %v8958_v24 = vmul.f32 15.0, %v8952_v41  ;;  %v8955_v51 = vmin.f32 %v8949_v6, 1.0 }
 0x8f1   : > { %v11156_v42 = vround.rtne.f32 %v8957_v17  ;;  %v8960_v35 = vmul.f32 15.0, %v8954_v61 }
 0x8f2   : > { %v11157_v60 = vround.rtne.f32 %v8958_v24  ;;  %v8961_v38 = vmul.f32 15.0, %v8955_v51 }
 0x8f3   : > { %v8969_v13 = vmul.f32 0.06666667, %v11156_v42  ;;  %v11159_v31 = vround.rtne.f32 %v8960_v35 }
 0x8f4   : > { %v8970_v39 = vmul.f32 0.06666667, %v11157_v60  ;;  %v11160_v21 = vround.rtne.f32 %v8961_v38 }
 0x8f5   : > { %v8972_v1 = vmul.f32 0.06666667, %v11159_v31 }
 0x8f6   : > { %v9513_v19 = vpack.c.bf16 %v8970_v39, %v8969_v13  ;;  %v8973_v33 = vmul.f32 0.06666667, %v11160_v21 }
 0x8f8   : > { %8995 = vst [vmem:[%s15302_s14] sm:$0xff] %v9513_v19  ;;  %v9515_v23 = vpack.c.bf16 %v8973_v33, %v8972_v1 }
 0x8fa   : > { %8997 = vst [vmem:[%s15302_s14 + $0xc] sm:$0xff] %v9515_v23 }
 0x8fb   : > { %11381 = shalt.err (!%p11378_p3)
}
 0x8fc   : > { %s11382_s8 = scalar_lea.hbm %s15316_s20, 384  ;;  %s11386_s13 = scalar_lea.hbm %s15369_s7, 768 }
 0x8fd   : > { %p11383_p4 = scmp.ne.s32.totalorder %s15316_s20, %s11382_s8  ;;  %p11387_p9 = scmp.lt.u32.totalorder %s15316_s20, %s15369_s7 }
 0x8fe   : > { %p11388_p10 = scmp.lt.u32.totalorder %s11386_s13, %s11382_s8  ;;  %p11390_p12 = scmp.lt.u32.totalorder %s11382_s8, %s15316_s20 }
 0x8ff   : > { %p11384_p7 = pnand %p11383_p4, %p11516_p5 }
 0x900   : > { %p11389_p11 = por %p11388_p10, %p11387_p9 }
 0x901   : > { %p11385_p8 = pneg %p11384_p7 }
 0x902   : > { %p11391_p13 = por %p11390_p12, %p11389_p11 }
 0x904   : > { %p11392_p0 = pnand %p11391_p13, %p11385_p8 }
 0x906   : > { %11395 = shalt.err (!%p11392_p0)
}
 0x907   : > { %s11436_s18 = smov 192   ;;  %s11437_s19 = smov 12  }
 0x908   : > { %11163 = dma.vmem_to_hbm [thread:$0]  (%p11516_p5), %s15310_s17, 384, %s15316_s20, %s15321_s21, %s11436_s18, %s11436_s18, %s11437_s19  }
 0x909 PF: > { %p11169_p1 = scmp.ge.s32.totalorder %s11430_s27, 2  ;;  %s9028_s28 = sand.u32 1, %s11418_s24  }
 0x90a   : > { %s9029_s22 = scalar_lea.sflag [#allocation4], %s9028_s28 }
 0x90b   : > { %p11166_p2 = pnand %p11169_p1, %p11520_p6 }
 0x90d   : > { %11413 = dma.done.wait (!%p11166_p2), %s9029_s22, 384  }
 0x90e   : > { %11415 = vsyncadd (!%p11166_p2), %s9029_s22, 4294966912  ;;  %p17_p3 = scmp.ge.s32.totalorder %s11503_s30, 4   ;;  %s15788_s24 = smov %s11422_s25 }
 0x90f   : > { %s15789_s25 = smov %s11426_s26  ;;  %s15790_s26 = smov %s11514_s10 }
 0x910   : > { %s15791_s27 = smov %s11503_s30  ;;  %19 = sbr.rel (!%p17_p3) target bundleno = 3 (0x3), region = 102 }
 0x917   :  { %9034 = vsyncpa [#allocation4], 1 }
 0x918   :  { %9036 = vsyncpa [#allocation4 + $0x1], 1 }

</bundles_post_ra>
